<compile_context>
chip_gen: v7x
topology: tpu7x:2x2x1
jax: 0.10.0
libtpu: 0.0.40
codegen_flags: <defaults>
</compile_context>

<pallas_src>
import functools

import jax
import jax.numpy as jnp
from jax import lax
from jax.experimental import pallas as pl
from jax.experimental.pallas import tpu as pltpu


# ----------------------------- small helpers ---------------------------------
def _round_up(x, m):
    return (x + m - 1) // m * m


def _pick_time_chunk(T, target=16):
    """Largest divisor of T that is <= target (timesteps per grid step)."""
    best = 1
    for d in range(1, min(T, target) + 1):
        if T % d == 0:
            best = d
    return best


# ----------------------------- input-projection kernel ------------------------
# gates_x = x @ W_ih^T + (b_ih + b_hh), computed as one big (rows, Din) @ (Din, 4Hp)
# matmul, tiled over rows.  No time dependence -> "parallel" grid, high MXU occupancy.
def _proj_kernel(x_ref, w_ref, b_ref, g_ref):
    g_ref[...] = (
        jnp.dot(x_ref[...], w_ref[...], preferred_element_type=jnp.float32)
        + b_ref[...]
    ).astype(g_ref.dtype)


def _project_inputs(x2d, wih_t, bias, *, rows_per_block):
    R, Din = x2d.shape
    G4 = wih_t.shape[1]
    return pl.pallas_call(
        _proj_kernel,
        out_shape=jax.ShapeDtypeStruct((R, G4), jnp.float32),
        grid_spec=pltpu.PrefetchScalarGridSpec(
            num_scalar_prefetch=0,
            grid=(R // rows_per_block,),
            in_specs=[
                pl.BlockSpec((rows_per_block, Din), lambda r: (r, 0)),
                pl.BlockSpec((Din, G4), lambda r: (0, 0)),
                pl.BlockSpec((1, G4), lambda r: (0, 0)),
            ],
            out_specs=pl.BlockSpec((rows_per_block, G4), lambda r: (r, 0)),
        ),
        compiler_params=pltpu.CompilerParams(
            dimension_semantics=("parallel",),
            vmem_limit_bytes=32 * 1024 * 1024,
        ),
    )(x2d, wih_t, bias)


# ----------------------------- recurrent LSTM kernels -------------------------
# PyTorch gate order: i, f, g, o.  Hp is a multiple of 128 so the gate slices are
# lane-tile aligned (zero-cost).  h/c are carried in vregs inside the unrolled
# time-chunk loop and persisted in VMEM scratch across grid steps.
def _lstm_step(gx_row, h, c, whh_ref, hp):
    gates = gx_row + jnp.dot(h, whh_ref[...], preferred_element_type=jnp.float32)
    i = jax.nn.sigmoid(gates[:, 0 * hp:1 * hp])
    f = jax.nn.sigmoid(gates[:, 1 * hp:2 * hp])
    g = jnp.tanh(gates[:, 2 * hp:3 * hp])
    o = jax.nn.sigmoid(gates[:, 3 * hp:4 * hp])
    c = f * c + i * g
    h = o * jnp.tanh(c)
    return h, c


def _recurrence_kernel(gx_ref, whh_ref, hseq_ref, h_scr, c_scr, *, tc, hp):
    t0 = pl.program_id(0)

    @pl.when(t0 == 0)
    def _():
        h_scr[...] = jnp.zeros_like(h_scr)
        c_scr[...] = jnp.zeros_like(c_scr)

    def step(s, carry):
        h, c = carry
        h, c = _lstm_step(gx_ref[s], h, c, whh_ref, hp)
        hseq_ref[s] = h.astype(hseq_ref.dtype)
        return (h, c)

    h, c = lax.fori_loop(0, tc, step, (h_scr[...], c_scr[...]), unroll=True)
    h_scr[...] = h
    c_scr[...] = c


def _lstm_recurrence(gates_x, whh_t, *, tc, hp):
    T, Bp, G4 = gates_x.shape
    kernel = functools.partial(_recurrence_kernel, tc=tc, hp=hp)
    return pl.pallas_call(
        kernel,
        out_shape=jax.ShapeDtypeStruct((T, Bp, hp), jnp.float32),
        grid_spec=pltpu.PrefetchScalarGridSpec(
            num_scalar_prefetch=0,
            grid=(T // tc,),
            in_specs=[
                pl.BlockSpec((tc, Bp, G4), lambda t: (t, 0, 0)),
                pl.BlockSpec((hp, G4), lambda t: (0, 0)),
            ],
            out_specs=pl.BlockSpec((tc, Bp, hp), lambda t: (t, 0, 0)),
            scratch_shapes=[
                pltpu.VMEM((Bp, hp), jnp.float32),
                pltpu.VMEM((Bp, hp), jnp.float32),
            ],
        ),
        compiler_params=pltpu.CompilerParams(
            dimension_semantics=("arbitrary",),   # sequential time recurrence
            vmem_limit_bytes=32 * 1024 * 1024,
        ),
    )(gates_x, whh_t)


# Last layer: no hidden-sequence output.  Final grid step fuses FC + softmax and
# writes only the (S, Bp, F) probabilities.
def _final_kernel(gx_ref, whh_ref, fcw_ref, fcb_ref, out_ref, h_scr, c_scr,
                  *, tc, hp, forecast_steps):
    t0 = pl.program_id(0)

    @pl.when(t0 == 0)
    def _():
        h_scr[...] = jnp.zeros_like(h_scr)
        c_scr[...] = jnp.zeros_like(c_scr)

    def step(s, carry):
        h, c = carry
        return _lstm_step(gx_ref[s], h, c, whh_ref, hp)

    h, c = lax.fori_loop(0, tc, step, (h_scr[...], c_scr[...]), unroll=True)
    h_scr[...] = h
    c_scr[...] = c

    @pl.when(t0 == pl.num_programs(0) - 1)
    def _():
        # FC + softmax, computed per forecast-step to avoid odd in-kernel reshapes.
        for s in range(forecast_steps):
            logits = (
                jnp.dot(h, fcw_ref[s], preferred_element_type=jnp.float32)
                + fcb_ref[s]
            )                                              # (Bp, F)
            m = jnp.max(logits, axis=-1, keepdims=True)
            e = jnp.exp(logits - m)
            out_ref[s] = (e / jnp.sum(e, axis=-1, keepdims=True)).astype(out_ref.dtype)


def _lstm_final(gates_x, whh_t, fcw_p, fcb_p, *, tc, hp, forecast_steps, num_features):
    T, Bp, G4 = gates_x.shape
    kernel = functools.partial(_final_kernel, tc=tc, hp=hp,
                               forecast_steps=forecast_steps)
    return pl.pallas_call(
        kernel,
        out_shape=jax.ShapeDtypeStruct((forecast_steps, Bp, num_features), jnp.float32),
        grid_spec=pltpu.PrefetchScalarGridSpec(
            num_scalar_prefetch=0,
            grid=(T // tc,),
            in_specs=[
                pl.BlockSpec((tc, Bp, G4), lambda t: (t, 0, 0)),
                pl.BlockSpec((hp, G4), lambda t: (0, 0)),
                pl.BlockSpec(fcw_p.shape, lambda t: (0, 0, 0)),
                pl.BlockSpec(fcb_p.shape, lambda t: (0, 0, 0)),
            ],
            out_specs=pl.BlockSpec((forecast_steps, Bp, num_features),
                                   lambda t: (0, 0, 0)),
            scratch_shapes=[
                pltpu.VMEM((Bp, hp), jnp.float32),
                pltpu.VMEM((Bp, hp), jnp.float32),
            ],
        ),
        compiler_params=pltpu.CompilerParams(
            dimension_semantics=("arbitrary",),
            vmem_limit_bytes=32 * 1024 * 1024,
        ),
    )(gates_x, whh_t, fcw_p, fcb_p)


# ----------------------------- weight packing (padding + transpose) ------------
def _pack_lstm_weights(w_ih, w_hh, b_ih, b_hh, hp, din_p):
    """Pad each gate block from H->hp (and input dim to din_p) with zeros.

    Zero-padded gate columns give i=f=o=0.5, g=0 => padded h/c stay exactly 0,
    so padding is numerically exact for the real entries.
    """
    H4, Din = w_ih.shape
    H = H4 // 4
    wih4 = jnp.pad(w_ih.reshape(4, H, Din),
                   ((0, 0), (0, hp - H), (0, din_p - Din)))
    wih_t = jnp.transpose(wih4, (2, 0, 1)).reshape(din_p, 4 * hp)        # (Din_p, 4Hp)
    whh4 = jnp.pad(w_hh.reshape(4, H, H),
                   ((0, 0), (0, hp - H), (0, hp - H)))
    whh_t = jnp.transpose(whh4, (2, 0, 1)).reshape(hp, 4 * hp)           # (Hp, 4Hp)
    bias = jnp.pad((b_ih + b_hh).reshape(4, H),
                   ((0, 0), (0, hp - H))).reshape(1, 4 * hp)             # (1, 4Hp)
    return wih_t, whh_t, bias


def _pack_fc(fc_w, fc_b, hp, forecast_steps, num_features):
    Dout, H = fc_w.shape
    w = fc_w.reshape(forecast_steps, num_features, H)
    w = jnp.transpose(w, (0, 2, 1))                                      # (S, H, F)
    w = jnp.pad(w, ((0, 0), (0, hp - H), (0, 0)))                        # (S, Hp, F)
    b = fc_b.reshape(forecast_steps, 1, num_features)                    # (S, 1, F)
    return w, b


# ----------------------------- full model forward -----------------------------
def lstm_model_forward(x, params, *, forecast_steps, num_features):
    """x: (B, T, input_size) batch_first, like the PyTorch module."""
    B, T, Din = x.shape
    H = params["lstm"][0][1].shape[1]          # w_hh: (4H, H)
    hp = _round_up(H, 128)                     # lane-aligned hidden size
    bp = _round_up(B, 8)                       # sublane-aligned batch
    tc = _pick_time_chunk(T, target=16)        # timesteps per grid step

    # Time-major + batch pad (x is the smallest tensor in the model: one tiny pass).
    xt = jnp.transpose(x.astype(jnp.float32), (1, 0, 2))       # (T, B, Din)
    xt = jnp.pad(xt, ((0, 0), (0, bp - B), (0, 0)))            # (T, bp, Din)
    cur2d = xt.reshape(T * bp, Din)                            # contiguous merge

    num_layers = len(params["lstm"])
    out_p = None
    for layer, (w_ih, w_hh, b_ih, b_hh) in enumerate(params["lstm"]):
        din_p = cur2d.shape[1]
        wih_t, whh_t, bias = _pack_lstm_weights(w_ih, w_hh, b_ih, b_hh, hp, din_p)
        # Hoisted input projection: one big MXU matmul over all (T*bp) rows.
        gates2d = _project_inputs(cur2d, wih_t, bias, rows_per_block=tc * bp)
        gates_x = gates2d.reshape(T, bp, 4 * hp)               # time-major gates
        if layer < num_layers - 1:
            hseq = _lstm_recurrence(gates_x, whh_t, tc=tc, hp=hp)   # (T, bp, Hp)
            cur2d = hseq.reshape(T * bp, hp)
        else:
            fcw_p, fcb_p = _pack_fc(params["fc_w"], params["fc_b"], hp,
                                    forecast_steps, num_features)
            out_p = _lstm_final(gates_x, whh_t, fcw_p, fcb_p, tc=tc, hp=hp,
                                forecast_steps=forecast_steps,
                                num_features=num_features)     # (S, bp, F)
    return jnp.transpose(out_p, (1, 0, 2))[:B]                 # (B, S, F)


# ----------------------------- pure-JAX reference ------------------------------
def reference_forward(x, params, *, forecast_steps, num_features):
    B, T, _ = x.shape
    inp = x
    for (w_ih, w_hh, b_ih, b_hh) in params["lstm"]:
        H = w_hh.shape[1]
        h = jnp.zeros((B, H), jnp.float32)
        c = jnp.zeros((B, H), jnp.float32)
        hs = []
        for t in range(T):
            gates = inp[:, t, :] @ w_ih.T + h @ w_hh.T + b_ih + b_hh
            i = jax.nn.sigmoid(gates[:, 0 * H:1 * H])
            f = jax.nn.sigmoid(gates[:, 1 * H:2 * H])
            g = jnp.tanh(gates[:, 2 * H:3 * H])
            o = jax.nn.sigmoid(gates[:, 3 * H:4 * H])
            c = f * c + i * g
            h = o * jnp.tanh(c)
            hs.append(h)
        inp = jnp.stack(hs, axis=1)
    out = inp[:, -1, :] @ params["fc_w"].T + params["fc_b"]
    out = out.reshape(B, forecast_steps, num_features)
    return jax.nn.softmax(out, axis=2)


# ----------------------------- param init --------------------------------------
def init_params(key, input_size, hidden_size, num_layers, forecast_steps, num_features):
    stdv = 1.0 / jnp.sqrt(hidden_size)
    params = {"lstm": []}
    for layer in range(num_layers):
        d_in = input_size if layer == 0 else hidden_size
        key, k1, k2, k3, k4 = jax.random.split(key, 5)
        w_ih = jax.random.uniform(k1, (4 * hidden_size, d_in), jnp.float32, -stdv, stdv)
        w_hh = jax.random.uniform(k2, (4 * hidden_size, hidden_size), jnp.float32, -stdv, stdv)
        b_ih = jax.random.uniform(k3, (4 * hidden_size,), jnp.float32, -stdv, stdv)
        b_hh = jax.random.uniform(k4, (4 * hidden_size,), jnp.float32, -stdv, stdv)
        params["lstm"].append((w_ih, w_hh, b_ih, b_hh))
    key, k5, k6 = jax.random.split(key, 3)
    d_out = num_features * forecast_steps
    params["fc_w"] = jax.random.uniform(k5, (d_out, hidden_size), jnp.float32, -stdv, stdv)
    params["fc_b"] = jax.random.uniform(k6, (d_out,), jnp.float32, -stdv, stdv)
    return params


if __name__ == "__main__":
    # Small deterministic config
    input_size = 4
    hidden_size = 32
    num_layers = 2
    forecast_steps = 3
    num_features = 4
    batch = 2
    seq = 8

    key = jax.random.PRNGKey(0)
    key, kx, kp = jax.random.split(key, 3)
    x = jax.random.normal(kx, (batch, seq, input_size), jnp.float32)
    params = init_params(kp, input_size, hidden_size, num_layers,
                         forecast_steps, num_features)

    fwd = jax.jit(functools.partial(lstm_model_forward,
                                    forecast_steps=forecast_steps,
                                    num_features=num_features))
    out = fwd(x, params)
    out = jax.block_until_ready(out)

    ref = reference_forward(x, params,
                            forecast_steps=forecast_steps,
                            num_features=num_features)
    assert out.shape == (batch, forecast_steps, num_features)
    assert jnp.allclose(out, ref, atol=1e-5, rtol=1e-5), "mismatch vs reference"

    print("KERNEL_OK")
</pallas_src>

<mosaic_0001>
module attributes {stable_mosaic.version = 11 : i64} {
  func.func @_proj_kernel(%arg0: i32, %arg1: memref<64x128xf32, #tpu.memory_space<vmem>>, %arg2: memref<128x512xf32, #tpu.memory_space<vmem>>, %arg3: memref<1x512xf32, #tpu.memory_space<vmem>>, %arg4: memref<64x512xf32, #tpu.memory_space<vmem>>) attributes {dimension_semantics = [#tpu.dimension_semantics<parallel>], iteration_bounds = array<i64: 1>, scalar_prefetch = 0 : i64, scratch_operands = 0 : i64, tpu.core_type = #tpu.core_type<tc>, window_params = [{transform_indices = @transform_0, window_bounds = array<i64: 64, 128>}, {pipeline_mode = #tpu.pipeline_mode<synchronous>, transform_indices = @transform_1, window_bounds = array<i64: 128, 512>}, {pipeline_mode = #tpu.pipeline_mode<synchronous>, transform_indices = @transform_2, window_bounds = array<i64: 1, 512>}, {transform_indices = @transform_3, window_bounds = array<i64: 64, 512>}]} {
    %c0 = arith.constant 0 : index
    %c0_0 = arith.constant 0 : index
    %0 = vector.load %arg1[%c0, %c0_0] : memref<64x128xf32, #tpu.memory_space<vmem>>, vector<64x128xf32>
    %c0_1 = arith.constant 0 : index
    %c0_2 = arith.constant 0 : index
    %1 = vector.load %arg2[%c0_1, %c0_2] : memref<128x512xf32, #tpu.memory_space<vmem>>, vector<128x512xf32>
    %cst = arith.constant dense<0.000000e+00> : vector<64x512xf32>
    %2 = tpu.matmul %0, %1, %cst {dimension_numbers = #tpu.dot_dimension_numbers<[1], [0], [0], [1], [0, 0, 1, 1], [], []>} : vector<64x128xf32>, vector<128x512xf32>, vector<64x512xf32> -> vector<64x512xf32>
    %c0_3 = arith.constant 0 : index
    %c0_4 = arith.constant 0 : index
    %3 = vector.load %arg3[%c0_3, %c0_4] : memref<1x512xf32, #tpu.memory_space<vmem>>, vector<1x512xf32>
    %4 = vector.broadcast %3 : vector<1x512xf32> to vector<64x512xf32>
    %5 = arith.addf %2, %4 : vector<64x512xf32>
    %c0_5 = arith.constant 0 : index
    %c0_6 = arith.constant 0 : index
    %6 = vector.load %arg4[%c0_5, %c0_6] : memref<64x512xf32, #tpu.memory_space<vmem>>, vector<64x512xf32>
    tpu.vector_store %arg4[%c0_5, %c0_6], %5 {strides = array<i32>} : memref<64x512xf32, #tpu.memory_space<vmem>>, vector<64x512xf32>,
    return
  }
  func.func @transform_0(%arg0: i32) -> (i32, i32) {
    %c0_i32 = arith.constant 0 : i32
    %c0_i32_0 = arith.constant 0 : i32
    return %arg0, %c0_i32 : i32, i32
  }
  func.func @transform_1(%arg0: i32) -> (i32, i32) {
    %c0_i32 = arith.constant 0 : i32
    %c0_i32_0 = arith.constant 0 : i32
    %c0_i32_1 = arith.constant 0 : i32
    return %c0_i32, %c0_i32_0 : i32, i32
  }
  func.func @transform_2(%arg0: i32) -> (i32, i32) {
    %c0_i32 = arith.constant 0 : i32
    %c0_i32_0 = arith.constant 0 : i32
    %c0_i32_1 = arith.constant 0 : i32
    return %c0_i32, %c0_i32_0 : i32, i32
  }
  func.func @transform_3(%arg0: i32) -> (i32, i32) {
    %c0_i32 = arith.constant 0 : i32
    %c0_i32_0 = arith.constant 0 : i32
    return %arg0, %c0_i32 : i32, i32
  }
}

module attributes {stable_mosaic.version = 11 : i64} {
  func.func @_proj_kernel(%arg0: i32, %arg1: memref<64x4xf32, #tpu.memory_space<vmem>>, %arg2: memref<4x512xf32, #tpu.memory_space<vmem>>, %arg3: memref<1x512xf32, #tpu.memory_space<vmem>>, %arg4: memref<64x512xf32, #tpu.memory_space<vmem>>) attributes {dimension_semantics = [#tpu.dimension_semantics<parallel>], iteration_bounds = array<i64: 1>, scalar_prefetch = 0 : i64, scratch_operands = 0 : i64, tpu.core_type = #tpu.core_type<tc>, window_params = [{transform_indices = @transform_0, window_bounds = array<i64: 64, 4>}, {pipeline_mode = #tpu.pipeline_mode<synchronous>, transform_indices = @transform_1, window_bounds = array<i64: 4, 512>}, {pipeline_mode = #tpu.pipeline_mode<synchronous>, transform_indices = @transform_2, window_bounds = array<i64: 1, 512>}, {transform_indices = @transform_3, window_bounds = array<i64: 64, 512>}]} {
    %c0 = arith.constant 0 : index
    %c0_0 = arith.constant 0 : index
    %0 = vector.load %arg1[%c0, %c0_0] : memref<64x4xf32, #tpu.memory_space<vmem>>, vector<64x4xf32>
    %c0_1 = arith.constant 0 : index
    %c0_2 = arith.constant 0 : index
    %1 = vector.load %arg2[%c0_1, %c0_2] : memref<4x512xf32, #tpu.memory_space<vmem>>, vector<4x512xf32>
    %cst = arith.constant dense<0.000000e+00> : vector<64x512xf32>
    %2 = tpu.matmul %0, %1, %cst {dimension_numbers = #tpu.dot_dimension_numbers<[1], [0], [0], [1], [0, 0, 1, 1], [], []>} : vector<64x4xf32>, vector<4x512xf32>, vector<64x512xf32> -> vector<64x512xf32>
    %c0_3 = arith.constant 0 : index
    %c0_4 = arith.constant 0 : index
    %3 = vector.load %arg3[%c0_3, %c0_4] : memref<1x512xf32, #tpu.memory_space<vmem>>, vector<1x512xf32>
    %4 = vector.broadcast %3 : vector<1x512xf32> to vector<64x512xf32>
    %5 = arith.addf %2, %4 : vector<64x512xf32>
    %c0_5 = arith.constant 0 : index
    %c0_6 = arith.constant 0 : index
    %6 = vector.load %arg4[%c0_5, %c0_6] : memref<64x512xf32, #tpu.memory_space<vmem>>, vector<64x512xf32>
    tpu.vector_store %arg4[%c0_5, %c0_6], %5 {strides = array<i32>} : memref<64x512xf32, #tpu.memory_space<vmem>>, vector<64x512xf32>,
    return
  }
  func.func @transform_0(%arg0: i32) -> (i32, i32) {
    %c0_i32 = arith.constant 0 : i32
    %c0_i32_0 = arith.constant 0 : i32
    return %arg0, %c0_i32 : i32, i32
  }
  func.func @transform_1(%arg0: i32) -> (i32, i32) {
    %c0_i32 = arith.constant 0 : i32
    %c0_i32_0 = arith.constant 0 : i32
    %c0_i32_1 = arith.constant 0 : i32
    return %c0_i32, %c0_i32_0 : i32, i32
  }
  func.func @transform_2(%arg0: i32) -> (i32, i32) {
    %c0_i32 = arith.constant 0 : i32
    %c0_i32_0 = arith.constant 0 : i32
    %c0_i32_1 = arith.constant 0 : i32
    return %c0_i32, %c0_i32_0 : i32, i32
  }
  func.func @transform_3(%arg0: i32) -> (i32, i32) {
    %c0_i32 = arith.constant 0 : i32
    %c0_i32_0 = arith.constant 0 : i32
    return %arg0, %c0_i32 : i32, i32
  }
}

module attributes {stable_mosaic.version = 11 : i64} {
  func.func @_recurrence_kernel(%arg0: i32, %arg1: memref<8x8x512xf32, #tpu.memory_space<vmem>>, %arg2: memref<128x512xf32, #tpu.memory_space<vmem>>, %arg3: memref<8x8x128xf32, #tpu.memory_space<vmem>>, %arg4: memref<8x128xf32, #tpu.memory_space<vmem>>, %arg5: memref<8x128xf32, #tpu.memory_space<vmem>>) attributes {dimension_semantics = [#tpu.dimension_semantics<arbitrary>], iteration_bounds = array<i64: 1>, scalar_prefetch = 0 : i64, scratch_operands = 2 : i64, tpu.core_type = #tpu.core_type<tc>, window_params = [{transform_indices = @transform_0, window_bounds = array<i64: 8, 8, 512>}, {pipeline_mode = #tpu.pipeline_mode<synchronous>, transform_indices = @transform_1, window_bounds = array<i64: 128, 512>}, {transform_indices = @transform_2, window_bounds = array<i64: 8, 8, 128>}]} {
    %c0_i32 = arith.constant 0 : i32
    %0 = arith.cmpi eq, %arg0, %c0_i32 : i32
    %1 = arith.extui %0 : i1 to i32
    %c0_i32_0 = arith.constant 0 : i32
    %2 = arith.cmpi ne, %1, %c0_i32_0 : i32
    scf.if %2 {
      %cst_88 = arith.constant 0.000000e+00 : f32
      %287 = vector.broadcast %cst_88 : f32 to vector<8x128xf32>
      %c0_89 = arith.constant 0 : index
      %c0_90 = arith.constant 0 : index
      %288 = vector.load %arg4[%c0_89, %c0_90] : memref<8x128xf32, #tpu.memory_space<vmem>>, vector<8x128xf32>
      tpu.vector_store %arg4[%c0_89, %c0_90], %287 {strides = array<i32>} : memref<8x128xf32, #tpu.memory_space<vmem>>, vector<8x128xf32>,
      %cst_91 = arith.constant 0.000000e+00 : f32
      %289 = vector.broadcast %cst_91 : f32 to vector<8x128xf32>
      %c0_92 = arith.constant 0 : index
      %c0_93 = arith.constant 0 : index
      %290 = vector.load %arg5[%c0_92, %c0_93] : memref<8x128xf32, #tpu.memory_space<vmem>>, vector<8x128xf32>
      tpu.vector_store %arg5[%c0_92, %c0_93], %289 {strides = array<i32>} : memref<8x128xf32, #tpu.memory_space<vmem>>, vector<8x128xf32>,
    } else {
    }
    %c0 = arith.constant 0 : index
    %c0_1 = arith.constant 0 : index
    %3 = vector.load %arg4[%c0, %c0_1] : memref<8x128xf32, #tpu.memory_space<vmem>>, vector<8x128xf32>
    %c0_2 = arith.constant 0 : index
    %c0_3 = arith.constant 0 : index
    %4 = vector.load %arg5[%c0_2, %c0_3] : memref<8x128xf32, #tpu.memory_space<vmem>>, vector<8x128xf32>
    %c0_i32_4 = arith.constant 0 : i32
    %5 = arith.index_cast %c0_i32_4 : i32 to index
    %c0_5 = arith.constant 0 : index
    %c0_6 = arith.constant 0 : index
    %6 = vector.load %arg1[%5, %c0_5, %c0_6] : memref<8x8x512xf32, #tpu.memory_space<vmem>>, vector<1x8x512xf32>
    %7 = vector.shape_cast %6 : vector<1x8x512xf32> to vector<8x512xf32>
    %c0_7 = arith.constant 0 : index
    %c0_8 = arith.constant 0 : index
    %8 = vector.load %arg2[%c0_7, %c0_8] : memref<128x512xf32, #tpu.memory_space<vmem>>, vector<128x512xf32>
    %cst = arith.constant dense<0.000000e+00> : vector<8x512xf32>
    %9 = tpu.matmul %3, %8, %cst {dimension_numbers = #tpu.dot_dimension_numbers<[1], [0], [0], [1], [0, 0, 1, 1], [], []>} : vector<8x128xf32>, vector<128x512xf32>, vector<8x512xf32> -> vector<8x512xf32>
    %10 = arith.addf %7, %9 : vector<8x512xf32>
    %11 = vector.extract_strided_slice %10 {offsets = [0, 0], sizes = [8, 128], strides = [1, 1]} : vector<8x512xf32> to vector<8x128xf32>
    %12 = arith.negf %11 : vector<8x128xf32>
    %13 = math.exp %12 : vector<8x128xf32>
    %cst_9 = arith.constant 1.000000e+00 : f32
    %14 = vector.broadcast %cst_9 : f32 to vector<8x128xf32>
    %15 = arith.addf %14, %13 : vector<8x128xf32>
    %16 = arith.divf %14, %15 : vector<8x128xf32>
    %17 = vector.extract_strided_slice %10 {offsets = [0, 128], sizes = [8, 128], strides = [1, 1]} : vector<8x512xf32> to vector<8x128xf32>
    %18 = arith.negf %17 : vector<8x128xf32>
    %19 = math.exp %18 : vector<8x128xf32>
    %cst_10 = arith.constant 1.000000e+00 : f32
    %20 = vector.broadcast %cst_10 : f32 to vector<8x128xf32>
    %21 = arith.addf %20, %19 : vector<8x128xf32>
    %22 = arith.divf %20, %21 : vector<8x128xf32>
    %23 = vector.extract_strided_slice %10 {offsets = [0, 256], sizes = [8, 128], strides = [1, 1]} : vector<8x512xf32> to vector<8x128xf32>
    %24 = math.tanh %23 : vector<8x128xf32>
    %25 = vector.extract_strided_slice %10 {offsets = [0, 384], sizes = [8, 128], strides = [1, 1]} : vector<8x512xf32> to vector<8x128xf32>
    %26 = arith.negf %25 : vector<8x128xf32>
    %27 = math.exp %26 : vector<8x128xf32>
    %cst_11 = arith.constant 1.000000e+00 : f32
    %28 = vector.broadcast %cst_11 : f32 to vector<8x128xf32>
    %29 = arith.addf %28, %27 : vector<8x128xf32>
    %30 = arith.divf %28, %29 : vector<8x128xf32>
    %31 = arith.mulf %22, %4 : vector<8x128xf32>
    %32 = arith.mulf %16, %24 : vector<8x128xf32>
    %33 = arith.addf %31, %32 : vector<8x128xf32>
    %34 = math.tanh %33 : vector<8x128xf32>
    %35 = arith.mulf %30, %34 : vector<8x128xf32>
    %36 = arith.index_cast %c0_i32_4 : i32 to index
    %c0_12 = arith.constant 0 : index
    %c0_13 = arith.constant 0 : index
    %37 = vector.load %arg3[%36, %c0_12, %c0_13] : memref<8x8x128xf32, #tpu.memory_space<vmem>>, vector<1x8x128xf32>
    %38 = vector.shape_cast %37 : vector<1x8x128xf32> to vector<8x128xf32>
    %39 = vector.shape_cast %35 : vector<8x128xf32> to vector<1x8x128xf32>
    tpu.vector_store %arg3[%36, %c0_12, %c0_13], %39 {strides = array<i32>} : memref<8x8x128xf32, #tpu.memory_space<vmem>>, vector<1x8x128xf32>,
    %c1_i32 = arith.constant 1 : i32
    %40 = arith.index_cast %c1_i32 : i32 to index
    %c0_14 = arith.constant 0 : index
    %c0_15 = arith.constant 0 : index
    %41 = vector.load %arg1[%40, %c0_14, %c0_15] : memref<8x8x512xf32, #tpu.memory_space<vmem>>, vector<1x8x512xf32>
    %42 = vector.shape_cast %41 : vector<1x8x512xf32> to vector<8x512xf32>
    %c0_16 = arith.constant 0 : index
    %c0_17 = arith.constant 0 : index
    %43 = vector.load %arg2[%c0_16, %c0_17] : memref<128x512xf32, #tpu.memory_space<vmem>>, vector<128x512xf32>
    %cst_18 = arith.constant dense<0.000000e+00> : vector<8x512xf32>
    %44 = tpu.matmul %35, %43, %cst_18 {dimension_numbers = #tpu.dot_dimension_numbers<[1], [0], [0], [1], [0, 0, 1, 1], [], []>} : vector<8x128xf32>, vector<128x512xf32>, vector<8x512xf32> -> vector<8x512xf32>
    %45 = arith.addf %42, %44 : vector<8x512xf32>
    %46 = vector.extract_strided_slice %45 {offsets = [0, 0], sizes = [8, 128], strides = [1, 1]} : vector<8x512xf32> to vector<8x128xf32>
    %47 = arith.negf %46 : vector<8x128xf32>
    %48 = math.exp %47 : vector<8x128xf32>
    %cst_19 = arith.constant 1.000000e+00 : f32
    %49 = vector.broadcast %cst_19 : f32 to vector<8x128xf32>
    %50 = arith.addf %49, %48 : vector<8x128xf32>
    %51 = arith.divf %49, %50 : vector<8x128xf32>
    %52 = vector.extract_strided_slice %45 {offsets = [0, 128], sizes = [8, 128], strides = [1, 1]} : vector<8x512xf32> to vector<8x128xf32>
    %53 = arith.negf %52 : vector<8x128xf32>
    %54 = math.exp %53 : vector<8x128xf32>
    %cst_20 = arith.constant 1.000000e+00 : f32
    %55 = vector.broadcast %cst_20 : f32 to vector<8x128xf32>
    %56 = arith.addf %55, %54 : vector<8x128xf32>
    %57 = arith.divf %55, %56 : vector<8x128xf32>
    %58 = vector.extract_strided_slice %45 {offsets = [0, 256], sizes = [8, 128], strides = [1, 1]} : vector<8x512xf32> to vector<8x128xf32>
    %59 = math.tanh %58 : vector<8x128xf32>
    %60 = vector.extract_strided_slice %45 {offsets = [0, 384], sizes = [8, 128], strides = [1, 1]} : vector<8x512xf32> to vector<8x128xf32>
    %61 = arith.negf %60 : vector<8x128xf32>
    %62 = math.exp %61 : vector<8x128xf32>
    %cst_21 = arith.constant 1.000000e+00 : f32
    %63 = vector.broadcast %cst_21 : f32 to vector<8x128xf32>
    %64 = arith.addf %63, %62 : vector<8x128xf32>
    %65 = arith.divf %63, %64 : vector<8x128xf32>
    %66 = arith.mulf %57, %33 : vector<8x128xf32>
    %67 = arith.mulf %51, %59 : vector<8x128xf32>
    %68 = arith.addf %66, %67 : vector<8x128xf32>
    %69 = math.tanh %68 : vector<8x128xf32>
    %70 = arith.mulf %65, %69 : vector<8x128xf32>
    %71 = arith.index_cast %c1_i32 : i32 to index
    %c0_22 = arith.constant 0 : index
    %c0_23 = arith.constant 0 : index
    %72 = vector.load %arg3[%71, %c0_22, %c0_23] : memref<8x8x128xf32, #tpu.memory_space<vmem>>, vector<1x8x128xf32>
    %73 = vector.shape_cast %72 : vector<1x8x128xf32> to vector<8x128xf32>
    %74 = vector.shape_cast %70 : vector<8x128xf32> to vector<1x8x128xf32>
    tpu.vector_store %arg3[%71, %c0_22, %c0_23], %74 {strides = array<i32>} : memref<8x8x128xf32, #tpu.memory_space<vmem>>, vector<1x8x128xf32>,
    %c2_i32 = arith.constant 2 : i32
    %75 = arith.index_cast %c2_i32 : i32 to index
    %c0_24 = arith.constant 0 : index
    %c0_25 = arith.constant 0 : index
    %76 = vector.load %arg1[%75, %c0_24, %c0_25] : memref<8x8x512xf32, #tpu.memory_space<vmem>>, vector<1x8x512xf32>
    %77 = vector.shape_cast %76 : vector<1x8x512xf32> to vector<8x512xf32>
    %c0_26 = arith.constant 0 : index
    %c0_27 = arith.constant 0 : index
    %78 = vector.load %arg2[%c0_26, %c0_27] : memref<128x512xf32, #tpu.memory_space<vmem>>, vector<128x512xf32>
    %cst_28 = arith.constant dense<0.000000e+00> : vector<8x512xf32>
    %79 = tpu.matmul %70, %78, %cst_28 {dimension_numbers = #tpu.dot_dimension_numbers<[1], [0], [0], [1], [0, 0, 1, 1], [], []>} : vector<8x128xf32>, vector<128x512xf32>, vector<8x512xf32> -> vector<8x512xf32>
    %80 = arith.addf %77, %79 : vector<8x512xf32>
    %81 = vector.extract_strided_slice %80 {offsets = [0, 0], sizes = [8, 128], strides = [1, 1]} : vector<8x512xf32> to vector<8x128xf32>
    %82 = arith.negf %81 : vector<8x128xf32>
    %83 = math.exp %82 : vector<8x128xf32>
    %cst_29 = arith.constant 1.000000e+00 : f32
    %84 = vector.broadcast %cst_29 : f32 to vector<8x128xf32>
    %85 = arith.addf %84, %83 : vector<8x128xf32>
    %86 = arith.divf %84, %85 : vector<8x128xf32>
    %87 = vector.extract_strided_slice %80 {offsets = [0, 128], sizes = [8, 128], strides = [1, 1]} : vector<8x512xf32> to vector<8x128xf32>
    %88 = arith.negf %87 : vector<8x128xf32>
    %89 = math.exp %88 : vector<8x128xf32>
    %cst_30 = arith.constant 1.000000e+00 : f32
    %90 = vector.broadcast %cst_30 : f32 to vector<8x128xf32>
    %91 = arith.addf %90, %89 : vector<8x128xf32>
    %92 = arith.divf %90, %91 : vector<8x128xf32>
    %93 = vector.extract_strided_slice %80 {offsets = [0, 256], sizes = [8, 128], strides = [1, 1]} : vector<8x512xf32> to vector<8x128xf32>
    %94 = math.tanh %93 : vector<8x128xf32>
    %95 = vector.extract_strided_slice %80 {offsets = [0, 384], sizes = [8, 128], strides = [1, 1]} : vector<8x512xf32> to vector<8x128xf32>
    %96 = arith.negf %95 : vector<8x128xf32>
    %97 = math.exp %96 : vector<8x128xf32>
    %cst_31 = arith.constant 1.000000e+00 : f32
    %98 = vector.broadcast %cst_31 : f32 to vector<8x128xf32>
    %99 = arith.addf %98, %97 : vector<8x128xf32>
    %100 = arith.divf %98, %99 : vector<8x128xf32>
    %101 = arith.mulf %92, %68 : vector<8x128xf32>
    %102 = arith.mulf %86, %94 : vector<8x128xf32>
    %103 = arith.addf %101, %102 : vector<8x128xf32>
    %104 = math.tanh %103 : vector<8x128xf32>
    %105 = arith.mulf %100, %104 : vector<8x128xf32>
    %106 = arith.index_cast %c2_i32 : i32 to index
    %c0_32 = arith.constant 0 : index
    %c0_33 = arith.constant 0 : index
    %107 = vector.load %arg3[%106, %c0_32, %c0_33] : memref<8x8x128xf32, #tpu.memory_space<vmem>>, vector<1x8x128xf32>
    %108 = vector.shape_cast %107 : vector<1x8x128xf32> to vector<8x128xf32>
    %109 = vector.shape_cast %105 : vector<8x128xf32> to vector<1x8x128xf32>
    tpu.vector_store %arg3[%106, %c0_32, %c0_33], %109 {strides = array<i32>} : memref<8x8x128xf32, #tpu.memory_space<vmem>>, vector<1x8x128xf32>,
    %c3_i32 = arith.constant 3 : i32
    %110 = arith.index_cast %c3_i32 : i32 to index
    %c0_34 = arith.constant 0 : index
    %c0_35 = arith.constant 0 : index
    %111 = vector.load %arg1[%110, %c0_34, %c0_35] : memref<8x8x512xf32, #tpu.memory_space<vmem>>, vector<1x8x512xf32>
    %112 = vector.shape_cast %111 : vector<1x8x512xf32> to vector<8x512xf32>
    %c0_36 = arith.constant 0 : index
    %c0_37 = arith.constant 0 : index
    %113 = vector.load %arg2[%c0_36, %c0_37] : memref<128x512xf32, #tpu.memory_space<vmem>>, vector<128x512xf32>
    %cst_38 = arith.constant dense<0.000000e+00> : vector<8x512xf32>
    %114 = tpu.matmul %105, %113, %cst_38 {dimension_numbers = #tpu.dot_dimension_numbers<[1], [0], [0], [1], [0, 0, 1, 1], [], []>} : vector<8x128xf32>, vector<128x512xf32>, vector<8x512xf32> -> vector<8x512xf32>
    %115 = arith.addf %112, %114 : vector<8x512xf32>
    %116 = vector.extract_strided_slice %115 {offsets = [0, 0], sizes = [8, 128], strides = [1, 1]} : vector<8x512xf32> to vector<8x128xf32>
    %117 = arith.negf %116 : vector<8x128xf32>
    %118 = math.exp %117 : vector<8x128xf32>
    %cst_39 = arith.constant 1.000000e+00 : f32
    %119 = vector.broadcast %cst_39 : f32 to vector<8x128xf32>
    %120 = arith.addf %119, %118 : vector<8x128xf32>
    %121 = arith.divf %119, %120 : vector<8x128xf32>
    %122 = vector.extract_strided_slice %115 {offsets = [0, 128], sizes = [8, 128], strides = [1, 1]} : vector<8x512xf32> to vector<8x128xf32>
    %123 = arith.negf %122 : vector<8x128xf32>
    %124 = math.exp %123 : vector<8x128xf32>
    %cst_40 = arith.constant 1.000000e+00 : f32
    %125 = vector.broadcast %cst_40 : f32 to vector<8x128xf32>
    %126 = arith.addf %125, %124 : vector<8x128xf32>
    %127 = arith.divf %125, %126 : vector<8x128xf32>
    %128 = vector.extract_strided_slice %115 {offsets = [0, 256], sizes = [8, 128], strides = [1, 1]} : vector<8x512xf32> to vector<8x128xf32>
    %129 = math.tanh %128 : vector<8x128xf32>
    %130 = vector.extract_strided_slice %115 {offsets = [0, 384], sizes = [8, 128], strides = [1, 1]} : vector<8x512xf32> to vector<8x128xf32>
    %131 = arith.negf %130 : vector<8x128xf32>
    %132 = math.exp %131 : vector<8x128xf32>
    %cst_41 = arith.constant 1.000000e+00 : f32
    %133 = vector.broadcast %cst_41 : f32 to vector<8x128xf32>
    %134 = arith.addf %133, %132 : vector<8x128xf32>
    %135 = arith.divf %133, %134 : vector<8x128xf32>
    %136 = arith.mulf %127, %103 : vector<8x128xf32>
    %137 = arith.mulf %121, %129 : vector<8x128xf32>
    %138 = arith.addf %136, %137 : vector<8x128xf32>
    %139 = math.tanh %138 : vector<8x128xf32>
    %140 = arith.mulf %135, %139 : vector<8x128xf32>
    %141 = arith.index_cast %c3_i32 : i32 to index
    %c0_42 = arith.constant 0 : index
    %c0_43 = arith.constant 0 : index
    %142 = vector.load %arg3[%141, %c0_42, %c0_43] : memref<8x8x128xf32, #tpu.memory_space<vmem>>, vector<1x8x128xf32>
    %143 = vector.shape_cast %142 : vector<1x8x128xf32> to vector<8x128xf32>
    %144 = vector.shape_cast %140 : vector<8x128xf32> to vector<1x8x128xf32>
    tpu.vector_store %arg3[%141, %c0_42, %c0_43], %144 {strides = array<i32>} : memref<8x8x128xf32, #tpu.memory_space<vmem>>, vector<1x8x128xf32>,
    %c4_i32 = arith.constant 4 : i32
    %145 = arith.index_cast %c4_i32 : i32 to index
    %c0_44 = arith.constant 0 : index
    %c0_45 = arith.constant 0 : index
    %146 = vector.load %arg1[%145, %c0_44, %c0_45] : memref<8x8x512xf32, #tpu.memory_space<vmem>>, vector<1x8x512xf32>
    %147 = vector.shape_cast %146 : vector<1x8x512xf32> to vector<8x512xf32>
    %c0_46 = arith.constant 0 : index
    %c0_47 = arith.constant 0 : index
    %148 = vector.load %arg2[%c0_46, %c0_47] : memref<128x512xf32, #tpu.memory_space<vmem>>, vector<128x512xf32>
    %cst_48 = arith.constant dense<0.000000e+00> : vector<8x512xf32>
    %149 = tpu.matmul %140, %148, %cst_48 {dimension_numbers = #tpu.dot_dimension_numbers<[1], [0], [0], [1], [0, 0, 1, 1], [], []>} : vector<8x128xf32>, vector<128x512xf32>, vector<8x512xf32> -> vector<8x512xf32>
    %150 = arith.addf %147, %149 : vector<8x512xf32>
    %151 = vector.extract_strided_slice %150 {offsets = [0, 0], sizes = [8, 128], strides = [1, 1]} : vector<8x512xf32> to vector<8x128xf32>
    %152 = arith.negf %151 : vector<8x128xf32>
    %153 = math.exp %152 : vector<8x128xf32>
    %cst_49 = arith.constant 1.000000e+00 : f32
    %154 = vector.broadcast %cst_49 : f32 to vector<8x128xf32>
    %155 = arith.addf %154, %153 : vector<8x128xf32>
    %156 = arith.divf %154, %155 : vector<8x128xf32>
    %157 = vector.extract_strided_slice %150 {offsets = [0, 128], sizes = [8, 128], strides = [1, 1]} : vector<8x512xf32> to vector<8x128xf32>
    %158 = arith.negf %157 : vector<8x128xf32>
    %159 = math.exp %158 : vector<8x128xf32>
    %cst_50 = arith.constant 1.000000e+00 : f32
    %160 = vector.broadcast %cst_50 : f32 to vector<8x128xf32>
    %161 = arith.addf %160, %159 : vector<8x128xf32>
    %162 = arith.divf %160, %161 : vector<8x128xf32>
    %163 = vector.extract_strided_slice %150 {offsets = [0, 256], sizes = [8, 128], strides = [1, 1]} : vector<8x512xf32> to vector<8x128xf32>
    %164 = math.tanh %163 : vector<8x128xf32>
    %165 = vector.extract_strided_slice %150 {offsets = [0, 384], sizes = [8, 128], strides = [1, 1]} : vector<8x512xf32> to vector<8x128xf32>
    %166 = arith.negf %165 : vector<8x128xf32>
    %167 = math.exp %166 : vector<8x128xf32>
    %cst_51 = arith.constant 1.000000e+00 : f32
    %168 = vector.broadcast %cst_51 : f32 to vector<8x128xf32>
    %169 = arith.addf %168, %167 : vector<8x128xf32>
    %170 = arith.divf %168, %169 : vector<8x128xf32>
    %171 = arith.mulf %162, %138 : vector<8x128xf32>
    %172 = arith.mulf %156, %164 : vector<8x128xf32>
    %173 = arith.addf %171, %172 : vector<8x128xf32>
    %174 = math.tanh %173 : vector<8x128xf32>
    %175 = arith.mulf %170, %174 : vector<8x128xf32>
    %176 = arith.index_cast %c4_i32 : i32 to index
    %c0_52 = arith.constant 0 : index
    %c0_53 = arith.constant 0 : index
    %177 = vector.load %arg3[%176, %c0_52, %c0_53] : memref<8x8x128xf32, #tpu.memory_space<vmem>>, vector<1x8x128xf32>
    %178 = vector.shape_cast %177 : vector<1x8x128xf32> to vector<8x128xf32>
    %179 = vector.shape_cast %175 : vector<8x128xf32> to vector<1x8x128xf32>
    tpu.vector_store %arg3[%176, %c0_52, %c0_53], %179 {strides = array<i32>} : memref<8x8x128xf32, #tpu.memory_space<vmem>>, vector<1x8x128xf32>,
    %c5_i32 = arith.constant 5 : i32
    %180 = arith.index_cast %c5_i32 : i32 to index
    %c0_54 = arith.constant 0 : index
    %c0_55 = arith.constant 0 : index
    %181 = vector.load %arg1[%180, %c0_54, %c0_55] : memref<8x8x512xf32, #tpu.memory_space<vmem>>, vector<1x8x512xf32>
    %182 = vector.shape_cast %181 : vector<1x8x512xf32> to vector<8x512xf32>
    %c0_56 = arith.constant 0 : index
    %c0_57 = arith.constant 0 : index
    %183 = vector.load %arg2[%c0_56, %c0_57] : memref<128x512xf32, #tpu.memory_space<vmem>>, vector<128x512xf32>
    %cst_58 = arith.constant dense<0.000000e+00> : vector<8x512xf32>
    %184 = tpu.matmul %175, %183, %cst_58 {dimension_numbers = #tpu.dot_dimension_numbers<[1], [0], [0], [1], [0, 0, 1, 1], [], []>} : vector<8x128xf32>, vector<128x512xf32>, vector<8x512xf32> -> vector<8x512xf32>
    %185 = arith.addf %182, %184 : vector<8x512xf32>
    %186 = vector.extract_strided_slice %185 {offsets = [0, 0], sizes = [8, 128], strides = [1, 1]} : vector<8x512xf32> to vector<8x128xf32>
    %187 = arith.negf %186 : vector<8x128xf32>
    %188 = math.exp %187 : vector<8x128xf32>
    %cst_59 = arith.constant 1.000000e+00 : f32
    %189 = vector.broadcast %cst_59 : f32 to vector<8x128xf32>
    %190 = arith.addf %189, %188 : vector<8x128xf32>
    %191 = arith.divf %189, %190 : vector<8x128xf32>
    %192 = vector.extract_strided_slice %185 {offsets = [0, 128], sizes = [8, 128], strides = [1, 1]} : vector<8x512xf32> to vector<8x128xf32>
    %193 = arith.negf %192 : vector<8x128xf32>
    %194 = math.exp %193 : vector<8x128xf32>
    %cst_60 = arith.constant 1.000000e+00 : f32
    %195 = vector.broadcast %cst_60 : f32 to vector<8x128xf32>
    %196 = arith.addf %195, %194 : vector<8x128xf32>
    %197 = arith.divf %195, %196 : vector<8x128xf32>
    %198 = vector.extract_strided_slice %185 {offsets = [0, 256], sizes = [8, 128], strides = [1, 1]} : vector<8x512xf32> to vector<8x128xf32>
    %199 = math.tanh %198 : vector<8x128xf32>
    %200 = vector.extract_strided_slice %185 {offsets = [0, 384], sizes = [8, 128], strides = [1, 1]} : vector<8x512xf32> to vector<8x128xf32>
    %201 = arith.negf %200 : vector<8x128xf32>
    %202 = math.exp %201 : vector<8x128xf32>
    %cst_61 = arith.constant 1.000000e+00 : f32
    %203 = vector.broadcast %cst_61 : f32 to vector<8x128xf32>
    %204 = arith.addf %203, %202 : vector<8x128xf32>
    %205 = arith.divf %203, %204 : vector<8x128xf32>
    %206 = arith.mulf %197, %173 : vector<8x128xf32>
    %207 = arith.mulf %191, %199 : vector<8x128xf32>
    %208 = arith.addf %206, %207 : vector<8x128xf32>
    %209 = math.tanh %208 : vector<8x128xf32>
    %210 = arith.mulf %205, %209 : vector<8x128xf32>
    %211 = arith.index_cast %c5_i32 : i32 to index
    %c0_62 = arith.constant 0 : index
    %c0_63 = arith.constant 0 : index
    %212 = vector.load %arg3[%211, %c0_62, %c0_63] : memref<8x8x128xf32, #tpu.memory_space<vmem>>, vector<1x8x128xf32>
    %213 = vector.shape_cast %212 : vector<1x8x128xf32> to vector<8x128xf32>
    %214 = vector.shape_cast %210 : vector<8x128xf32> to vector<1x8x128xf32>
    tpu.vector_store %arg3[%211, %c0_62, %c0_63], %214 {strides = array<i32>} : memref<8x8x128xf32, #tpu.memory_space<vmem>>, vector<1x8x128xf32>,
    %c6_i32 = arith.constant 6 : i32
    %215 = arith.index_cast %c6_i32 : i32 to index
    %c0_64 = arith.constant 0 : index
    %c0_65 = arith.constant 0 : index
    %216 = vector.load %arg1[%215, %c0_64, %c0_65] : memref<8x8x512xf32, #tpu.memory_space<vmem>>, vector<1x8x512xf32>
    %217 = vector.shape_cast %216 : vector<1x8x512xf32> to vector<8x512xf32>
    %c0_66 = arith.constant 0 : index
    %c0_67 = arith.constant 0 : index
    %218 = vector.load %arg2[%c0_66, %c0_67] : memref<128x512xf32, #tpu.memory_space<vmem>>, vector<128x512xf32>
    %cst_68 = arith.constant dense<0.000000e+00> : vector<8x512xf32>
    %219 = tpu.matmul %210, %218, %cst_68 {dimension_numbers = #tpu.dot_dimension_numbers<[1], [0], [0], [1], [0, 0, 1, 1], [], []>} : vector<8x128xf32>, vector<128x512xf32>, vector<8x512xf32> -> vector<8x512xf32>
    %220 = arith.addf %217, %219 : vector<8x512xf32>
    %221 = vector.extract_strided_slice %220 {offsets = [0, 0], sizes = [8, 128], strides = [1, 1]} : vector<8x512xf32> to vector<8x128xf32>
    %222 = arith.negf %221 : vector<8x128xf32>
    %223 = math.exp %222 : vector<8x128xf32>
    %cst_69 = arith.constant 1.000000e+00 : f32
    %224 = vector.broadcast %cst_69 : f32 to vector<8x128xf32>
    %225 = arith.addf %224, %223 : vector<8x128xf32>
    %226 = arith.divf %224, %225 : vector<8x128xf32>
    %227 = vector.extract_strided_slice %220 {offsets = [0, 128], sizes = [8, 128], strides = [1, 1]} : vector<8x512xf32> to vector<8x128xf32>
    %228 = arith.negf %227 : vector<8x128xf32>
    %229 = math.exp %228 : vector<8x128xf32>
    %cst_70 = arith.constant 1.000000e+00 : f32
    %230 = vector.broadcast %cst_70 : f32 to vector<8x128xf32>
    %231 = arith.addf %230, %229 : vector<8x128xf32>
    %232 = arith.divf %230, %231 : vector<8x128xf32>
    %233 = vector.extract_strided_slice %220 {offsets = [0, 256], sizes = [8, 128], strides = [1, 1]} : vector<8x512xf32> to vector<8x128xf32>
    %234 = math.tanh %233 : vector<8x128xf32>
    %235 = vector.extract_strided_slice %220 {offsets = [0, 384], sizes = [8, 128], strides = [1, 1]} : vector<8x512xf32> to vector<8x128xf32>
    %236 = arith.negf %235 : vector<8x128xf32>
    %237 = math.exp %236 : vector<8x128xf32>
    %cst_71 = arith.constant 1.000000e+00 : f32
    %238 = vector.broadcast %cst_71 : f32 to vector<8x128xf32>
    %239 = arith.addf %238, %237 : vector<8x128xf32>
    %240 = arith.divf %238, %239 : vector<8x128xf32>
    %241 = arith.mulf %232, %208 : vector<8x128xf32>
    %242 = arith.mulf %226, %234 : vector<8x128xf32>
    %243 = arith.addf %241, %242 : vector<8x128xf32>
    %244 = math.tanh %243 : vector<8x128xf32>
    %245 = arith.mulf %240, %244 : vector<8x128xf32>
    %246 = arith.index_cast %c6_i32 : i32 to index
    %c0_72 = arith.constant 0 : index
    %c0_73 = arith.constant 0 : index
    %247 = vector.load %arg3[%246, %c0_72, %c0_73] : memref<8x8x128xf32, #tpu.memory_space<vmem>>, vector<1x8x128xf32>
    %248 = vector.shape_cast %247 : vector<1x8x128xf32> to vector<8x128xf32>
    %249 = vector.shape_cast %245 : vector<8x128xf32> to vector<1x8x128xf32>
    tpu.vector_store %arg3[%246, %c0_72, %c0_73], %249 {strides = array<i32>} : memref<8x8x128xf32, #tpu.memory_space<vmem>>, vector<1x8x128xf32>,
    %c7_i32 = arith.constant 7 : i32
    %250 = arith.index_cast %c7_i32 : i32 to index
    %c0_74 = arith.constant 0 : index
    %c0_75 = arith.constant 0 : index
    %251 = vector.load %arg1[%250, %c0_74, %c0_75] : memref<8x8x512xf32, #tpu.memory_space<vmem>>, vector<1x8x512xf32>
    %252 = vector.shape_cast %251 : vector<1x8x512xf32> to vector<8x512xf32>
    %c0_76 = arith.constant 0 : index
    %c0_77 = arith.constant 0 : index
    %253 = vector.load %arg2[%c0_76, %c0_77] : memref<128x512xf32, #tpu.memory_space<vmem>>, vector<128x512xf32>
    %cst_78 = arith.constant dense<0.000000e+00> : vector<8x512xf32>
    %254 = tpu.matmul %245, %253, %cst_78 {dimension_numbers = #tpu.dot_dimension_numbers<[1], [0], [0], [1], [0, 0, 1, 1], [], []>} : vector<8x128xf32>, vector<128x512xf32>, vector<8x512xf32> -> vector<8x512xf32>
    %255 = arith.addf %252, %254 : vector<8x512xf32>
    %256 = vector.extract_strided_slice %255 {offsets = [0, 0], sizes = [8, 128], strides = [1, 1]} : vector<8x512xf32> to vector<8x128xf32>
    %257 = arith.negf %256 : vector<8x128xf32>
    %258 = math.exp %257 : vector<8x128xf32>
    %cst_79 = arith.constant 1.000000e+00 : f32
    %259 = vector.broadcast %cst_79 : f32 to vector<8x128xf32>
    %260 = arith.addf %259, %258 : vector<8x128xf32>
    %261 = arith.divf %259, %260 : vector<8x128xf32>
    %262 = vector.extract_strided_slice %255 {offsets = [0, 128], sizes = [8, 128], strides = [1, 1]} : vector<8x512xf32> to vector<8x128xf32>
    %263 = arith.negf %262 : vector<8x128xf32>
    %264 = math.exp %263 : vector<8x128xf32>
    %cst_80 = arith.constant 1.000000e+00 : f32
    %265 = vector.broadcast %cst_80 : f32 to vector<8x128xf32>
    %266 = arith.addf %265, %264 : vector<8x128xf32>
    %267 = arith.divf %265, %266 : vector<8x128xf32>
    %268 = vector.extract_strided_slice %255 {offsets = [0, 256], sizes = [8, 128], strides = [1, 1]} : vector<8x512xf32> to vector<8x128xf32>
    %269 = math.tanh %268 : vector<8x128xf32>
    %270 = vector.extract_strided_slice %255 {offsets = [0, 384], sizes = [8, 128], strides = [1, 1]} : vector<8x512xf32> to vector<8x128xf32>
    %271 = arith.negf %270 : vector<8x128xf32>
    %272 = math.exp %271 : vector<8x128xf32>
    %cst_81 = arith.constant 1.000000e+00 : f32
    %273 = vector.broadcast %cst_81 : f32 to vector<8x128xf32>
    %274 = arith.addf %273, %272 : vector<8x128xf32>
    %275 = arith.divf %273, %274 : vector<8x128xf32>
    %276 = arith.mulf %267, %243 : vector<8x128xf32>
    %277 = arith.mulf %261, %269 : vector<8x128xf32>
    %278 = arith.addf %276, %277 : vector<8x128xf32>
    %279 = math.tanh %278 : vector<8x128xf32>
    %280 = arith.mulf %275, %279 : vector<8x128xf32>
    %281 = arith.index_cast %c7_i32 : i32 to index
    %c0_82 = arith.constant 0 : index
    %c0_83 = arith.constant 0 : index
    %282 = vector.load %arg3[%281, %c0_82, %c0_83] : memref<8x8x128xf32, #tpu.memory_space<vmem>>, vector<1x8x128xf32>
    %283 = vector.shape_cast %282 : vector<1x8x128xf32> to vector<8x128xf32>
    %284 = vector.shape_cast %280 : vector<8x128xf32> to vector<1x8x128xf32>
    tpu.vector_store %arg3[%281, %c0_82, %c0_83], %284 {strides = array<i32>} : memref<8x8x128xf32, #tpu.memory_space<vmem>>, vector<1x8x128xf32>,
    %c8_i32 = arith.constant 8 : i32
    %c0_84 = arith.constant 0 : index
    %c0_85 = arith.constant 0 : index
    %285 = vector.load %arg4[%c0_84, %c0_85] : memref<8x128xf32, #tpu.memory_space<vmem>>, vector<8x128xf32>
    tpu.vector_store %arg4[%c0_84, %c0_85], %280 {strides = array<i32>} : memref<8x128xf32, #tpu.memory_space<vmem>>, vector<8x128xf32>,
    %c0_86 = arith.constant 0 : index
    %c0_87 = arith.constant 0 : index
    %286 = vector.load %arg5[%c0_86, %c0_87] : memref<8x128xf32, #tpu.memory_space<vmem>>, vector<8x128xf32>
    tpu.vector_store %arg5[%c0_86, %c0_87], %278 {strides = array<i32>} : memref<8x128xf32, #tpu.memory_space<vmem>>, vector<8x128xf32>,
    return
  }
  func.func @transform_0(%arg0: i32) -> (i32, i32, i32) {
    %c0_i32 = arith.constant 0 : i32
    %c0_i32_0 = arith.constant 0 : i32
    %c0_i32_1 = arith.constant 0 : i32
    return %arg0, %c0_i32, %c0_i32_0 : i32, i32, i32
  }
  func.func @transform_1(%arg0: i32) -> (i32, i32) {
    %c0_i32 = arith.constant 0 : i32
    %c0_i32_0 = arith.constant 0 : i32
    %c0_i32_1 = arith.constant 0 : i32
    return %c0_i32, %c0_i32_0 : i32, i32
  }
  func.func @transform_2(%arg0: i32) -> (i32, i32, i32) {
    %c0_i32 = arith.constant 0 : i32
    %c0_i32_0 = arith.constant 0 : i32
    %c0_i32_1 = arith.constant 0 : i32
    return %arg0, %c0_i32, %c0_i32_0 : i32, i32, i32
  }
}

module attributes {stable_mosaic.version = 11 : i64} {
  func.func @_final_kernel(%arg0: i32, %arg1: memref<8x8x512xf32, #tpu.memory_space<vmem>>, %arg2: memref<128x512xf32, #tpu.memory_space<vmem>>, %arg3: memref<3x128x4xf32, #tpu.memory_space<vmem>>, %arg4: memref<3x1x4xf32, #tpu.memory_space<vmem>>, %arg5: memref<3x8x4xf32, #tpu.memory_space<vmem>>, %arg6: memref<8x128xf32, #tpu.memory_space<vmem>>, %arg7: memref<8x128xf32, #tpu.memory_space<vmem>>) attributes {dimension_semantics = [#tpu.dimension_semantics<arbitrary>], iteration_bounds = array<i64: 1>, scalar_prefetch = 0 : i64, scratch_operands = 2 : i64, tpu.core_type = #tpu.core_type<tc>, window_params = [{transform_indices = @transform_0, window_bounds = array<i64: 8, 8, 512>}, {pipeline_mode = #tpu.pipeline_mode<synchronous>, transform_indices = @transform_1, window_bounds = array<i64: 128, 512>}, {pipeline_mode = #tpu.pipeline_mode<synchronous>, transform_indices = @transform_2, window_bounds = array<i64: 3, 128, 4>}, {pipeline_mode = #tpu.pipeline_mode<synchronous>, transform_indices = @transform_3, window_bounds = array<i64: 3, 1, 4>}, {pipeline_mode = #tpu.pipeline_mode<synchronous>, transform_indices = @transform_4, window_bounds = array<i64: 3, 8, 4>}]} {
    %c0_i32 = arith.constant 0 : i32
    %0 = arith.cmpi eq, %arg0, %c0_i32 : i32
    %1 = arith.extui %0 : i1 to i32
    %c0_i32_0 = arith.constant 0 : i32
    %2 = arith.cmpi ne, %1, %c0_i32_0 : i32
    scf.if %2 {
      %cst_74 = arith.constant 0.000000e+00 : f32
      %258 = vector.broadcast %cst_74 : f32 to vector<8x128xf32>
      %c0_75 = arith.constant 0 : index
      %c0_76 = arith.constant 0 : index
      %259 = vector.load %arg6[%c0_75, %c0_76] : memref<8x128xf32, #tpu.memory_space<vmem>>, vector<8x128xf32>
      tpu.vector_store %arg6[%c0_75, %c0_76], %258 {strides = array<i32>} : memref<8x128xf32, #tpu.memory_space<vmem>>, vector<8x128xf32>,
      %cst_77 = arith.constant 0.000000e+00 : f32
      %260 = vector.broadcast %cst_77 : f32 to vector<8x128xf32>
      %c0_78 = arith.constant 0 : index
      %c0_79 = arith.constant 0 : index
      %261 = vector.load %arg7[%c0_78, %c0_79] : memref<8x128xf32, #tpu.memory_space<vmem>>, vector<8x128xf32>
      tpu.vector_store %arg7[%c0_78, %c0_79], %260 {strides = array<i32>} : memref<8x128xf32, #tpu.memory_space<vmem>>, vector<8x128xf32>,
    } else {
    }
    %c0 = arith.constant 0 : index
    %c0_1 = arith.constant 0 : index
    %3 = vector.load %arg6[%c0, %c0_1] : memref<8x128xf32, #tpu.memory_space<vmem>>, vector<8x128xf32>
    %c0_2 = arith.constant 0 : index
    %c0_3 = arith.constant 0 : index
    %4 = vector.load %arg7[%c0_2, %c0_3] : memref<8x128xf32, #tpu.memory_space<vmem>>, vector<8x128xf32>
    %c0_i32_4 = arith.constant 0 : i32
    %5 = arith.index_cast %c0_i32_4 : i32 to index
    %c0_5 = arith.constant 0 : index
    %c0_6 = arith.constant 0 : index
    %6 = vector.load %arg1[%5, %c0_5, %c0_6] : memref<8x8x512xf32, #tpu.memory_space<vmem>>, vector<1x8x512xf32>
    %7 = vector.shape_cast %6 : vector<1x8x512xf32> to vector<8x512xf32>
    %c0_7 = arith.constant 0 : index
    %c0_8 = arith.constant 0 : index
    %8 = vector.load %arg2[%c0_7, %c0_8] : memref<128x512xf32, #tpu.memory_space<vmem>>, vector<128x512xf32>
    %cst = arith.constant dense<0.000000e+00> : vector<8x512xf32>
    %9 = tpu.matmul %3, %8, %cst {dimension_numbers = #tpu.dot_dimension_numbers<[1], [0], [0], [1], [0, 0, 1, 1], [], []>} : vector<8x128xf32>, vector<128x512xf32>, vector<8x512xf32> -> vector<8x512xf32>
    %10 = arith.addf %7, %9 : vector<8x512xf32>
    %11 = vector.extract_strided_slice %10 {offsets = [0, 0], sizes = [8, 128], strides = [1, 1]} : vector<8x512xf32> to vector<8x128xf32>
    %12 = arith.negf %11 : vector<8x128xf32>
    %13 = math.exp %12 : vector<8x128xf32>
    %cst_9 = arith.constant 1.000000e+00 : f32
    %14 = vector.broadcast %cst_9 : f32 to vector<8x128xf32>
    %15 = arith.addf %14, %13 : vector<8x128xf32>
    %16 = arith.divf %14, %15 : vector<8x128xf32>
    %17 = vector.extract_strided_slice %10 {offsets = [0, 128], sizes = [8, 128], strides = [1, 1]} : vector<8x512xf32> to vector<8x128xf32>
    %18 = arith.negf %17 : vector<8x128xf32>
    %19 = math.exp %18 : vector<8x128xf32>
    %cst_10 = arith.constant 1.000000e+00 : f32
    %20 = vector.broadcast %cst_10 : f32 to vector<8x128xf32>
    %21 = arith.addf %20, %19 : vector<8x128xf32>
    %22 = arith.divf %20, %21 : vector<8x128xf32>
    %23 = vector.extract_strided_slice %10 {offsets = [0, 256], sizes = [8, 128], strides = [1, 1]} : vector<8x512xf32> to vector<8x128xf32>
    %24 = math.tanh %23 : vector<8x128xf32>
    %25 = vector.extract_strided_slice %10 {offsets = [0, 384], sizes = [8, 128], strides = [1, 1]} : vector<8x512xf32> to vector<8x128xf32>
    %26 = arith.negf %25 : vector<8x128xf32>
    %27 = math.exp %26 : vector<8x128xf32>
    %cst_11 = arith.constant 1.000000e+00 : f32
    %28 = vector.broadcast %cst_11 : f32 to vector<8x128xf32>
    %29 = arith.addf %28, %27 : vector<8x128xf32>
    %30 = arith.divf %28, %29 : vector<8x128xf32>
    %31 = arith.mulf %22, %4 : vector<8x128xf32>
    %32 = arith.mulf %16, %24 : vector<8x128xf32>
    %33 = arith.addf %31, %32 : vector<8x128xf32>
    %34 = math.tanh %33 : vector<8x128xf32>
    %35 = arith.mulf %30, %34 : vector<8x128xf32>
    %c1_i32 = arith.constant 1 : i32
    %36 = arith.index_cast %c1_i32 : i32 to index
    %c0_12 = arith.constant 0 : index
    %c0_13 = arith.constant 0 : index
    %37 = vector.load %arg1[%36, %c0_12, %c0_13] : memref<8x8x512xf32, #tpu.memory_space<vmem>>, vector<1x8x512xf32>
    %38 = vector.shape_cast %37 : vector<1x8x512xf32> to vector<8x512xf32>
    %c0_14 = arith.constant 0 : index
    %c0_15 = arith.constant 0 : index
    %39 = vector.load %arg2[%c0_14, %c0_15] : memref<128x512xf32, #tpu.memory_space<vmem>>, vector<128x512xf32>
    %cst_16 = arith.constant dense<0.000000e+00> : vector<8x512xf32>
    %40 = tpu.matmul %35, %39, %cst_16 {dimension_numbers = #tpu.dot_dimension_numbers<[1], [0], [0], [1], [0, 0, 1, 1], [], []>} : vector<8x128xf32>, vector<128x512xf32>, vector<8x512xf32> -> vector<8x512xf32>
    %41 = arith.addf %38, %40 : vector<8x512xf32>
    %42 = vector.extract_strided_slice %41 {offsets = [0, 0], sizes = [8, 128], strides = [1, 1]} : vector<8x512xf32> to vector<8x128xf32>
    %43 = arith.negf %42 : vector<8x128xf32>
    %44 = math.exp %43 : vector<8x128xf32>
    %cst_17 = arith.constant 1.000000e+00 : f32
    %45 = vector.broadcast %cst_17 : f32 to vector<8x128xf32>
    %46 = arith.addf %45, %44 : vector<8x128xf32>
    %47 = arith.divf %45, %46 : vector<8x128xf32>
    %48 = vector.extract_strided_slice %41 {offsets = [0, 128], sizes = [8, 128], strides = [1, 1]} : vector<8x512xf32> to vector<8x128xf32>
    %49 = arith.negf %48 : vector<8x128xf32>
    %50 = math.exp %49 : vector<8x128xf32>
    %cst_18 = arith.constant 1.000000e+00 : f32
    %51 = vector.broadcast %cst_18 : f32 to vector<8x128xf32>
    %52 = arith.addf %51, %50 : vector<8x128xf32>
    %53 = arith.divf %51, %52 : vector<8x128xf32>
    %54 = vector.extract_strided_slice %41 {offsets = [0, 256], sizes = [8, 128], strides = [1, 1]} : vector<8x512xf32> to vector<8x128xf32>
    %55 = math.tanh %54 : vector<8x128xf32>
    %56 = vector.extract_strided_slice %41 {offsets = [0, 384], sizes = [8, 128], strides = [1, 1]} : vector<8x512xf32> to vector<8x128xf32>
    %57 = arith.negf %56 : vector<8x128xf32>
    %58 = math.exp %57 : vector<8x128xf32>
    %cst_19 = arith.constant 1.000000e+00 : f32
    %59 = vector.broadcast %cst_19 : f32 to vector<8x128xf32>
    %60 = arith.addf %59, %58 : vector<8x128xf32>
    %61 = arith.divf %59, %60 : vector<8x128xf32>
    %62 = arith.mulf %53, %33 : vector<8x128xf32>
    %63 = arith.mulf %47, %55 : vector<8x128xf32>
    %64 = arith.addf %62, %63 : vector<8x128xf32>
    %65 = math.tanh %64 : vector<8x128xf32>
    %66 = arith.mulf %61, %65 : vector<8x128xf32>
    %c2_i32 = arith.constant 2 : i32
    %67 = arith.index_cast %c2_i32 : i32 to index
    %c0_20 = arith.constant 0 : index
    %c0_21 = arith.constant 0 : index
    %68 = vector.load %arg1[%67, %c0_20, %c0_21] : memref<8x8x512xf32, #tpu.memory_space<vmem>>, vector<1x8x512xf32>
    %69 = vector.shape_cast %68 : vector<1x8x512xf32> to vector<8x512xf32>
    %c0_22 = arith.constant 0 : index
    %c0_23 = arith.constant 0 : index
    %70 = vector.load %arg2[%c0_22, %c0_23] : memref<128x512xf32, #tpu.memory_space<vmem>>, vector<128x512xf32>
    %cst_24 = arith.constant dense<0.000000e+00> : vector<8x512xf32>
    %71 = tpu.matmul %66, %70, %cst_24 {dimension_numbers = #tpu.dot_dimension_numbers<[1], [0], [0], [1], [0, 0, 1, 1], [], []>} : vector<8x128xf32>, vector<128x512xf32>, vector<8x512xf32> -> vector<8x512xf32>
    %72 = arith.addf %69, %71 : vector<8x512xf32>
    %73 = vector.extract_strided_slice %72 {offsets = [0, 0], sizes = [8, 128], strides = [1, 1]} : vector<8x512xf32> to vector<8x128xf32>
    %74 = arith.negf %73 : vector<8x128xf32>
    %75 = math.exp %74 : vector<8x128xf32>
    %cst_25 = arith.constant 1.000000e+00 : f32
    %76 = vector.broadcast %cst_25 : f32 to vector<8x128xf32>
    %77 = arith.addf %76, %75 : vector<8x128xf32>
    %78 = arith.divf %76, %77 : vector<8x128xf32>
    %79 = vector.extract_strided_slice %72 {offsets = [0, 128], sizes = [8, 128], strides = [1, 1]} : vector<8x512xf32> to vector<8x128xf32>
    %80 = arith.negf %79 : vector<8x128xf32>
    %81 = math.exp %80 : vector<8x128xf32>
    %cst_26 = arith.constant 1.000000e+00 : f32
    %82 = vector.broadcast %cst_26 : f32 to vector<8x128xf32>
    %83 = arith.addf %82, %81 : vector<8x128xf32>
    %84 = arith.divf %82, %83 : vector<8x128xf32>
    %85 = vector.extract_strided_slice %72 {offsets = [0, 256], sizes = [8, 128], strides = [1, 1]} : vector<8x512xf32> to vector<8x128xf32>
    %86 = math.tanh %85 : vector<8x128xf32>
    %87 = vector.extract_strided_slice %72 {offsets = [0, 384], sizes = [8, 128], strides = [1, 1]} : vector<8x512xf32> to vector<8x128xf32>
    %88 = arith.negf %87 : vector<8x128xf32>
    %89 = math.exp %88 : vector<8x128xf32>
    %cst_27 = arith.constant 1.000000e+00 : f32
    %90 = vector.broadcast %cst_27 : f32 to vector<8x128xf32>
    %91 = arith.addf %90, %89 : vector<8x128xf32>
    %92 = arith.divf %90, %91 : vector<8x128xf32>
    %93 = arith.mulf %84, %64 : vector<8x128xf32>
    %94 = arith.mulf %78, %86 : vector<8x128xf32>
    %95 = arith.addf %93, %94 : vector<8x128xf32>
    %96 = math.tanh %95 : vector<8x128xf32>
    %97 = arith.mulf %92, %96 : vector<8x128xf32>
    %c3_i32 = arith.constant 3 : i32
    %98 = arith.index_cast %c3_i32 : i32 to index
    %c0_28 = arith.constant 0 : index
    %c0_29 = arith.constant 0 : index
    %99 = vector.load %arg1[%98, %c0_28, %c0_29] : memref<8x8x512xf32, #tpu.memory_space<vmem>>, vector<1x8x512xf32>
    %100 = vector.shape_cast %99 : vector<1x8x512xf32> to vector<8x512xf32>
    %c0_30 = arith.constant 0 : index
    %c0_31 = arith.constant 0 : index
    %101 = vector.load %arg2[%c0_30, %c0_31] : memref<128x512xf32, #tpu.memory_space<vmem>>, vector<128x512xf32>
    %cst_32 = arith.constant dense<0.000000e+00> : vector<8x512xf32>
    %102 = tpu.matmul %97, %101, %cst_32 {dimension_numbers = #tpu.dot_dimension_numbers<[1], [0], [0], [1], [0, 0, 1, 1], [], []>} : vector<8x128xf32>, vector<128x512xf32>, vector<8x512xf32> -> vector<8x512xf32>
    %103 = arith.addf %100, %102 : vector<8x512xf32>
    %104 = vector.extract_strided_slice %103 {offsets = [0, 0], sizes = [8, 128], strides = [1, 1]} : vector<8x512xf32> to vector<8x128xf32>
    %105 = arith.negf %104 : vector<8x128xf32>
    %106 = math.exp %105 : vector<8x128xf32>
    %cst_33 = arith.constant 1.000000e+00 : f32
    %107 = vector.broadcast %cst_33 : f32 to vector<8x128xf32>
    %108 = arith.addf %107, %106 : vector<8x128xf32>
    %109 = arith.divf %107, %108 : vector<8x128xf32>
    %110 = vector.extract_strided_slice %103 {offsets = [0, 128], sizes = [8, 128], strides = [1, 1]} : vector<8x512xf32> to vector<8x128xf32>
    %111 = arith.negf %110 : vector<8x128xf32>
    %112 = math.exp %111 : vector<8x128xf32>
    %cst_34 = arith.constant 1.000000e+00 : f32
    %113 = vector.broadcast %cst_34 : f32 to vector<8x128xf32>
    %114 = arith.addf %113, %112 : vector<8x128xf32>
    %115 = arith.divf %113, %114 : vector<8x128xf32>
    %116 = vector.extract_strided_slice %103 {offsets = [0, 256], sizes = [8, 128], strides = [1, 1]} : vector<8x512xf32> to vector<8x128xf32>
    %117 = math.tanh %116 : vector<8x128xf32>
    %118 = vector.extract_strided_slice %103 {offsets = [0, 384], sizes = [8, 128], strides = [1, 1]} : vector<8x512xf32> to vector<8x128xf32>
    %119 = arith.negf %118 : vector<8x128xf32>
    %120 = math.exp %119 : vector<8x128xf32>
    %cst_35 = arith.constant 1.000000e+00 : f32
    %121 = vector.broadcast %cst_35 : f32 to vector<8x128xf32>
    %122 = arith.addf %121, %120 : vector<8x128xf32>
    %123 = arith.divf %121, %122 : vector<8x128xf32>
    %124 = arith.mulf %115, %95 : vector<8x128xf32>
    %125 = arith.mulf %109, %117 : vector<8x128xf32>
    %126 = arith.addf %124, %125 : vector<8x128xf32>
    %127 = math.tanh %126 : vector<8x128xf32>
    %128 = arith.mulf %123, %127 : vector<8x128xf32>
    %c4_i32 = arith.constant 4 : i32
    %129 = arith.index_cast %c4_i32 : i32 to index
    %c0_36 = arith.constant 0 : index
    %c0_37 = arith.constant 0 : index
    %130 = vector.load %arg1[%129, %c0_36, %c0_37] : memref<8x8x512xf32, #tpu.memory_space<vmem>>, vector<1x8x512xf32>
    %131 = vector.shape_cast %130 : vector<1x8x512xf32> to vector<8x512xf32>
    %c0_38 = arith.constant 0 : index
    %c0_39 = arith.constant 0 : index
    %132 = vector.load %arg2[%c0_38, %c0_39] : memref<128x512xf32, #tpu.memory_space<vmem>>, vector<128x512xf32>
    %cst_40 = arith.constant dense<0.000000e+00> : vector<8x512xf32>
    %133 = tpu.matmul %128, %132, %cst_40 {dimension_numbers = #tpu.dot_dimension_numbers<[1], [0], [0], [1], [0, 0, 1, 1], [], []>} : vector<8x128xf32>, vector<128x512xf32>, vector<8x512xf32> -> vector<8x512xf32>
    %134 = arith.addf %131, %133 : vector<8x512xf32>
    %135 = vector.extract_strided_slice %134 {offsets = [0, 0], sizes = [8, 128], strides = [1, 1]} : vector<8x512xf32> to vector<8x128xf32>
    %136 = arith.negf %135 : vector<8x128xf32>
    %137 = math.exp %136 : vector<8x128xf32>
    %cst_41 = arith.constant 1.000000e+00 : f32
    %138 = vector.broadcast %cst_41 : f32 to vector<8x128xf32>
    %139 = arith.addf %138, %137 : vector<8x128xf32>
    %140 = arith.divf %138, %139 : vector<8x128xf32>
    %141 = vector.extract_strided_slice %134 {offsets = [0, 128], sizes = [8, 128], strides = [1, 1]} : vector<8x512xf32> to vector<8x128xf32>
    %142 = arith.negf %141 : vector<8x128xf32>
    %143 = math.exp %142 : vector<8x128xf32>
    %cst_42 = arith.constant 1.000000e+00 : f32
    %144 = vector.broadcast %cst_42 : f32 to vector<8x128xf32>
    %145 = arith.addf %144, %143 : vector<8x128xf32>
    %146 = arith.divf %144, %145 : vector<8x128xf32>
    %147 = vector.extract_strided_slice %134 {offsets = [0, 256], sizes = [8, 128], strides = [1, 1]} : vector<8x512xf32> to vector<8x128xf32>
    %148 = math.tanh %147 : vector<8x128xf32>
    %149 = vector.extract_strided_slice %134 {offsets = [0, 384], sizes = [8, 128], strides = [1, 1]} : vector<8x512xf32> to vector<8x128xf32>
    %150 = arith.negf %149 : vector<8x128xf32>
    %151 = math.exp %150 : vector<8x128xf32>
    %cst_43 = arith.constant 1.000000e+00 : f32
    %152 = vector.broadcast %cst_43 : f32 to vector<8x128xf32>
    %153 = arith.addf %152, %151 : vector<8x128xf32>
    %154 = arith.divf %152, %153 : vector<8x128xf32>
    %155 = arith.mulf %146, %126 : vector<8x128xf32>
    %156 = arith.mulf %140, %148 : vector<8x128xf32>
    %157 = arith.addf %155, %156 : vector<8x128xf32>
    %158 = math.tanh %157 : vector<8x128xf32>
    %159 = arith.mulf %154, %158 : vector<8x128xf32>
    %c5_i32 = arith.constant 5 : i32
    %160 = arith.index_cast %c5_i32 : i32 to index
    %c0_44 = arith.constant 0 : index
    %c0_45 = arith.constant 0 : index
    %161 = vector.load %arg1[%160, %c0_44, %c0_45] : memref<8x8x512xf32, #tpu.memory_space<vmem>>, vector<1x8x512xf32>
    %162 = vector.shape_cast %161 : vector<1x8x512xf32> to vector<8x512xf32>
    %c0_46 = arith.constant 0 : index
    %c0_47 = arith.constant 0 : index
    %163 = vector.load %arg2[%c0_46, %c0_47] : memref<128x512xf32, #tpu.memory_space<vmem>>, vector<128x512xf32>
    %cst_48 = arith.constant dense<0.000000e+00> : vector<8x512xf32>
    %164 = tpu.matmul %159, %163, %cst_48 {dimension_numbers = #tpu.dot_dimension_numbers<[1], [0], [0], [1], [0, 0, 1, 1], [], []>} : vector<8x128xf32>, vector<128x512xf32>, vector<8x512xf32> -> vector<8x512xf32>
    %165 = arith.addf %162, %164 : vector<8x512xf32>
    %166 = vector.extract_strided_slice %165 {offsets = [0, 0], sizes = [8, 128], strides = [1, 1]} : vector<8x512xf32> to vector<8x128xf32>
    %167 = arith.negf %166 : vector<8x128xf32>
    %168 = math.exp %167 : vector<8x128xf32>
    %cst_49 = arith.constant 1.000000e+00 : f32
    %169 = vector.broadcast %cst_49 : f32 to vector<8x128xf32>
    %170 = arith.addf %169, %168 : vector<8x128xf32>
    %171 = arith.divf %169, %170 : vector<8x128xf32>
    %172 = vector.extract_strided_slice %165 {offsets = [0, 128], sizes = [8, 128], strides = [1, 1]} : vector<8x512xf32> to vector<8x128xf32>
    %173 = arith.negf %172 : vector<8x128xf32>
    %174 = math.exp %173 : vector<8x128xf32>
    %cst_50 = arith.constant 1.000000e+00 : f32
    %175 = vector.broadcast %cst_50 : f32 to vector<8x128xf32>
    %176 = arith.addf %175, %174 : vector<8x128xf32>
    %177 = arith.divf %175, %176 : vector<8x128xf32>
    %178 = vector.extract_strided_slice %165 {offsets = [0, 256], sizes = [8, 128], strides = [1, 1]} : vector<8x512xf32> to vector<8x128xf32>
    %179 = math.tanh %178 : vector<8x128xf32>
    %180 = vector.extract_strided_slice %165 {offsets = [0, 384], sizes = [8, 128], strides = [1, 1]} : vector<8x512xf32> to vector<8x128xf32>
    %181 = arith.negf %180 : vector<8x128xf32>
    %182 = math.exp %181 : vector<8x128xf32>
    %cst_51 = arith.constant 1.000000e+00 : f32
    %183 = vector.broadcast %cst_51 : f32 to vector<8x128xf32>
    %184 = arith.addf %183, %182 : vector<8x128xf32>
    %185 = arith.divf %183, %184 : vector<8x128xf32>
    %186 = arith.mulf %177, %157 : vector<8x128xf32>
    %187 = arith.mulf %171, %179 : vector<8x128xf32>
    %188 = arith.addf %186, %187 : vector<8x128xf32>
    %189 = math.tanh %188 : vector<8x128xf32>
    %190 = arith.mulf %185, %189 : vector<8x128xf32>
    %c6_i32 = arith.constant 6 : i32
    %191 = arith.index_cast %c6_i32 : i32 to index
    %c0_52 = arith.constant 0 : index
    %c0_53 = arith.constant 0 : index
    %192 = vector.load %arg1[%191, %c0_52, %c0_53] : memref<8x8x512xf32, #tpu.memory_space<vmem>>, vector<1x8x512xf32>
    %193 = vector.shape_cast %192 : vector<1x8x512xf32> to vector<8x512xf32>
    %c0_54 = arith.constant 0 : index
    %c0_55 = arith.constant 0 : index
    %194 = vector.load %arg2[%c0_54, %c0_55] : memref<128x512xf32, #tpu.memory_space<vmem>>, vector<128x512xf32>
    %cst_56 = arith.constant dense<0.000000e+00> : vector<8x512xf32>
    %195 = tpu.matmul %190, %194, %cst_56 {dimension_numbers = #tpu.dot_dimension_numbers<[1], [0], [0], [1], [0, 0, 1, 1], [], []>} : vector<8x128xf32>, vector<128x512xf32>, vector<8x512xf32> -> vector<8x512xf32>
    %196 = arith.addf %193, %195 : vector<8x512xf32>
    %197 = vector.extract_strided_slice %196 {offsets = [0, 0], sizes = [8, 128], strides = [1, 1]} : vector<8x512xf32> to vector<8x128xf32>
    %198 = arith.negf %197 : vector<8x128xf32>
    %199 = math.exp %198 : vector<8x128xf32>
    %cst_57 = arith.constant 1.000000e+00 : f32
    %200 = vector.broadcast %cst_57 : f32 to vector<8x128xf32>
    %201 = arith.addf %200, %199 : vector<8x128xf32>
    %202 = arith.divf %200, %201 : vector<8x128xf32>
    %203 = vector.extract_strided_slice %196 {offsets = [0, 128], sizes = [8, 128], strides = [1, 1]} : vector<8x512xf32> to vector<8x128xf32>
    %204 = arith.negf %203 : vector<8x128xf32>
    %205 = math.exp %204 : vector<8x128xf32>
    %cst_58 = arith.constant 1.000000e+00 : f32
    %206 = vector.broadcast %cst_58 : f32 to vector<8x128xf32>
    %207 = arith.addf %206, %205 : vector<8x128xf32>
    %208 = arith.divf %206, %207 : vector<8x128xf32>
    %209 = vector.extract_strided_slice %196 {offsets = [0, 256], sizes = [8, 128], strides = [1, 1]} : vector<8x512xf32> to vector<8x128xf32>
    %210 = math.tanh %209 : vector<8x128xf32>
    %211 = vector.extract_strided_slice %196 {offsets = [0, 384], sizes = [8, 128], strides = [1, 1]} : vector<8x512xf32> to vector<8x128xf32>
    %212 = arith.negf %211 : vector<8x128xf32>
    %213 = math.exp %212 : vector<8x128xf32>
    %cst_59 = arith.constant 1.000000e+00 : f32
    %214 = vector.broadcast %cst_59 : f32 to vector<8x128xf32>
    %215 = arith.addf %214, %213 : vector<8x128xf32>
    %216 = arith.divf %214, %215 : vector<8x128xf32>
    %217 = arith.mulf %208, %188 : vector<8x128xf32>
    %218 = arith.mulf %202, %210 : vector<8x128xf32>
    %219 = arith.addf %217, %218 : vector<8x128xf32>
    %220 = math.tanh %219 : vector<8x128xf32>
    %221 = arith.mulf %216, %220 : vector<8x128xf32>
    %c7_i32 = arith.constant 7 : i32
    %222 = arith.index_cast %c7_i32 : i32 to index
    %c0_60 = arith.constant 0 : index
    %c0_61 = arith.constant 0 : index
    %223 = vector.load %arg1[%222, %c0_60, %c0_61] : memref<8x8x512xf32, #tpu.memory_space<vmem>>, vector<1x8x512xf32>
    %224 = vector.shape_cast %223 : vector<1x8x512xf32> to vector<8x512xf32>
    %c0_62 = arith.constant 0 : index
    %c0_63 = arith.constant 0 : index
    %225 = vector.load %arg2[%c0_62, %c0_63] : memref<128x512xf32, #tpu.memory_space<vmem>>, vector<128x512xf32>
    %cst_64 = arith.constant dense<0.000000e+00> : vector<8x512xf32>
    %226 = tpu.matmul %221, %225, %cst_64 {dimension_numbers = #tpu.dot_dimension_numbers<[1], [0], [0], [1], [0, 0, 1, 1], [], []>} : vector<8x128xf32>, vector<128x512xf32>, vector<8x512xf32> -> vector<8x512xf32>
    %227 = arith.addf %224, %226 : vector<8x512xf32>
    %228 = vector.extract_strided_slice %227 {offsets = [0, 0], sizes = [8, 128], strides = [1, 1]} : vector<8x512xf32> to vector<8x128xf32>
    %229 = arith.negf %228 : vector<8x128xf32>
    %230 = math.exp %229 : vector<8x128xf32>
    %cst_65 = arith.constant 1.000000e+00 : f32
    %231 = vector.broadcast %cst_65 : f32 to vector<8x128xf32>
    %232 = arith.addf %231, %230 : vector<8x128xf32>
    %233 = arith.divf %231, %232 : vector<8x128xf32>
    %234 = vector.extract_strided_slice %227 {offsets = [0, 128], sizes = [8, 128], strides = [1, 1]} : vector<8x512xf32> to vector<8x128xf32>
    %235 = arith.negf %234 : vector<8x128xf32>
    %236 = math.exp %235 : vector<8x128xf32>
    %cst_66 = arith.constant 1.000000e+00 : f32
    %237 = vector.broadcast %cst_66 : f32 to vector<8x128xf32>
    %238 = arith.addf %237, %236 : vector<8x128xf32>
    %239 = arith.divf %237, %238 : vector<8x128xf32>
    %240 = vector.extract_strided_slice %227 {offsets = [0, 256], sizes = [8, 128], strides = [1, 1]} : vector<8x512xf32> to vector<8x128xf32>
    %241 = math.tanh %240 : vector<8x128xf32>
    %242 = vector.extract_strided_slice %227 {offsets = [0, 384], sizes = [8, 128], strides = [1, 1]} : vector<8x512xf32> to vector<8x128xf32>
    %243 = arith.negf %242 : vector<8x128xf32>
    %244 = math.exp %243 : vector<8x128xf32>
    %cst_67 = arith.constant 1.000000e+00 : f32
    %245 = vector.broadcast %cst_67 : f32 to vector<8x128xf32>
    %246 = arith.addf %245, %244 : vector<8x128xf32>
    %247 = arith.divf %245, %246 : vector<8x128xf32>
    %248 = arith.mulf %239, %219 : vector<8x128xf32>
    %249 = arith.mulf %233, %241 : vector<8x128xf32>
    %250 = arith.addf %248, %249 : vector<8x128xf32>
    %251 = math.tanh %250 : vector<8x128xf32>
    %252 = arith.mulf %247, %251 : vector<8x128xf32>
    %c8_i32 = arith.constant 8 : i32
    %c0_68 = arith.constant 0 : index
    %c0_69 = arith.constant 0 : index
    %253 = vector.load %arg6[%c0_68, %c0_69] : memref<8x128xf32, #tpu.memory_space<vmem>>, vector<8x128xf32>
    tpu.vector_store %arg6[%c0_68, %c0_69], %252 {strides = array<i32>} : memref<8x128xf32, #tpu.memory_space<vmem>>, vector<8x128xf32>,
    %c0_70 = arith.constant 0 : index
    %c0_71 = arith.constant 0 : index
    %254 = vector.load %arg7[%c0_70, %c0_71] : memref<8x128xf32, #tpu.memory_space<vmem>>, vector<8x128xf32>
    tpu.vector_store %arg7[%c0_70, %c0_71], %250 {strides = array<i32>} : memref<8x128xf32, #tpu.memory_space<vmem>>, vector<8x128xf32>,
    %c0_i32_72 = arith.constant 0 : i32
    %255 = arith.cmpi eq, %arg0, %c0_i32_72 : i32
    %256 = arith.extui %255 : i1 to i32
    %c0_i32_73 = arith.constant 0 : i32
    %257 = arith.cmpi ne, %256, %c0_i32_73 : i32
    scf.if %257 {
      %c0_74 = arith.constant 0 : index
      %c0_75 = arith.constant 0 : index
      %c0_76 = arith.constant 0 : index
      %258 = vector.load %arg3[%c0_74, %c0_75, %c0_76] : memref<3x128x4xf32, #tpu.memory_space<vmem>>, vector<1x128x4xf32>
      %259 = vector.shape_cast %258 : vector<1x128x4xf32> to vector<128x4xf32>
      %cst_77 = arith.constant dense<0.000000e+00> : vector<8x4xf32>
      %260 = tpu.matmul %252, %259, %cst_77 {dimension_numbers = #tpu.dot_dimension_numbers<[1], [0], [0], [1], [0, 0, 1, 1], [], []>} : vector<8x128xf32>, vector<128x4xf32>, vector<8x4xf32> -> vector<8x4xf32>
      %c0_78 = arith.constant 0 : index
      %c0_79 = arith.constant 0 : index
      %c0_80 = arith.constant 0 : index
      %261 = vector.load %arg4[%c0_78, %c0_79, %c0_80] : memref<3x1x4xf32, #tpu.memory_space<vmem>>, vector<1x1x4xf32>
      %262 = vector.shape_cast %261 : vector<1x1x4xf32> to vector<1x4xf32>
      %263 = vector.broadcast %262 : vector<1x4xf32> to vector<8x4xf32>
      %264 = arith.addf %260, %263 : vector<8x4xf32>
      %cst_81 = arith.constant dense<0xFF800000> : vector<8xf32>
      %265 = vector.multi_reduction <maximumf>, %264, %cst_81 [1] : vector<8x4xf32> to vector<8xf32>
      %266 = vector.shape_cast %265 : vector<8xf32> to vector<8x1xf32>
      %267 = vector.broadcast %266 : vector<8x1xf32> to vector<8x4xf32>
      %268 = arith.subf %264, %267 : vector<8x4xf32>
      %269 = math.exp %268 : vector<8x4xf32>
      %cst_82 = arith.constant dense<0.000000e+00> : vector<8xf32>
      %270 = vector.multi_reduction <add>, %269, %cst_82 [1] : vector<8x4xf32> to vector<8xf32>
      %271 = vector.shape_cast %270 : vector<8xf32> to vector<8x1xf32>
      %272 = vector.broadcast %271 : vector<8x1xf32> to vector<8x4xf32>
      %273 = arith.divf %269, %272 : vector<8x4xf32>
      %c0_83 = arith.constant 0 : index
      %c0_84 = arith.constant 0 : index
      %c0_85 = arith.constant 0 : index
      %274 = vector.load %arg5[%c0_83, %c0_84, %c0_85] : memref<3x8x4xf32, #tpu.memory_space<vmem>>, vector<1x8x4xf32>
      %275 = vector.shape_cast %274 : vector<1x8x4xf32> to vector<8x4xf32>
      %276 = vector.shape_cast %273 : vector<8x4xf32> to vector<1x8x4xf32>
      tpu.vector_store %arg5[%c0_83, %c0_84, %c0_85], %276 {strides = array<i32>} : memref<3x8x4xf32, #tpu.memory_space<vmem>>, vector<1x8x4xf32>,
      %c1 = arith.constant 1 : index
      %c0_86 = arith.constant 0 : index
      %c0_87 = arith.constant 0 : index
      %277 = vector.load %arg3[%c1, %c0_86, %c0_87] : memref<3x128x4xf32, #tpu.memory_space<vmem>>, vector<1x128x4xf32>
      %278 = vector.shape_cast %277 : vector<1x128x4xf32> to vector<128x4xf32>
      %cst_88 = arith.constant dense<0.000000e+00> : vector<8x4xf32>
      %279 = tpu.matmul %252, %278, %cst_88 {dimension_numbers = #tpu.dot_dimension_numbers<[1], [0], [0], [1], [0, 0, 1, 1], [], []>} : vector<8x128xf32>, vector<128x4xf32>, vector<8x4xf32> -> vector<8x4xf32>
      %c1_89 = arith.constant 1 : index
      %c0_90 = arith.constant 0 : index
      %c0_91 = arith.constant 0 : index
      %280 = vector.load %arg4[%c1_89, %c0_90, %c0_91] : memref<3x1x4xf32, #tpu.memory_space<vmem>>, vector<1x1x4xf32>
      %281 = vector.shape_cast %280 : vector<1x1x4xf32> to vector<1x4xf32>
      %282 = vector.broadcast %281 : vector<1x4xf32> to vector<8x4xf32>
      %283 = arith.addf %279, %282 : vector<8x4xf32>
      %cst_92 = arith.constant dense<0xFF800000> : vector<8xf32>
      %284 = vector.multi_reduction <maximumf>, %283, %cst_92 [1] : vector<8x4xf32> to vector<8xf32>
      %285 = vector.shape_cast %284 : vector<8xf32> to vector<8x1xf32>
      %286 = vector.broadcast %285 : vector<8x1xf32> to vector<8x4xf32>
      %287 = arith.subf %283, %286 : vector<8x4xf32>
      %288 = math.exp %287 : vector<8x4xf32>
      %cst_93 = arith.constant dense<0.000000e+00> : vector<8xf32>
      %289 = vector.multi_reduction <add>, %288, %cst_93 [1] : vector<8x4xf32> to vector<8xf32>
      %290 = vector.shape_cast %289 : vector<8xf32> to vector<8x1xf32>
      %291 = vector.broadcast %290 : vector<8x1xf32> to vector<8x4xf32>
      %292 = arith.divf %288, %291 : vector<8x4xf32>
      %c1_94 = arith.constant 1 : index
      %c0_95 = arith.constant 0 : index
      %c0_96 = arith.constant 0 : index
      %293 = vector.load %arg5[%c1_94, %c0_95, %c0_96] : memref<3x8x4xf32, #tpu.memory_space<vmem>>, vector<1x8x4xf32>
      %294 = vector.shape_cast %293 : vector<1x8x4xf32> to vector<8x4xf32>
      %295 = vector.shape_cast %292 : vector<8x4xf32> to vector<1x8x4xf32>
      tpu.vector_store %arg5[%c1_94, %c0_95, %c0_96], %295 {strides = array<i32>} : memref<3x8x4xf32, #tpu.memory_space<vmem>>, vector<1x8x4xf32>,
      %c2 = arith.constant 2 : index
      %c0_97 = arith.constant 0 : index
      %c0_98 = arith.constant 0 : index
      %296 = vector.load %arg3[%c2, %c0_97, %c0_98] : memref<3x128x4xf32, #tpu.memory_space<vmem>>, vector<1x128x4xf32>
      %297 = vector.shape_cast %296 : vector<1x128x4xf32> to vector<128x4xf32>
      %cst_99 = arith.constant dense<0.000000e+00> : vector<8x4xf32>
      %298 = tpu.matmul %252, %297, %cst_99 {dimension_numbers = #tpu.dot_dimension_numbers<[1], [0], [0], [1], [0, 0, 1, 1], [], []>} : vector<8x128xf32>, vector<128x4xf32>, vector<8x4xf32> -> vector<8x4xf32>
      %c2_100 = arith.constant 2 : index
      %c0_101 = arith.constant 0 : index
      %c0_102 = arith.constant 0 : index
      %299 = vector.load %arg4[%c2_100, %c0_101, %c0_102] : memref<3x1x4xf32, #tpu.memory_space<vmem>>, vector<1x1x4xf32>
      %300 = vector.shape_cast %299 : vector<1x1x4xf32> to vector<1x4xf32>
      %301 = vector.broadcast %300 : vector<1x4xf32> to vector<8x4xf32>
      %302 = arith.addf %298, %301 : vector<8x4xf32>
      %cst_103 = arith.constant dense<0xFF800000> : vector<8xf32>
      %303 = vector.multi_reduction <maximumf>, %302, %cst_103 [1] : vector<8x4xf32> to vector<8xf32>
      %304 = vector.shape_cast %303 : vector<8xf32> to vector<8x1xf32>
      %305 = vector.broadcast %304 : vector<8x1xf32> to vector<8x4xf32>
      %306 = arith.subf %302, %305 : vector<8x4xf32>
      %307 = math.exp %306 : vector<8x4xf32>
      %cst_104 = arith.constant dense<0.000000e+00> : vector<8xf32>
      %308 = vector.multi_reduction <add>, %307, %cst_104 [1] : vector<8x4xf32> to vector<8xf32>
      %309 = vector.shape_cast %308 : vector<8xf32> to vector<8x1xf32>
      %310 = vector.broadcast %309 : vector<8x1xf32> to vector<8x4xf32>
      %311 = arith.divf %307, %310 : vector<8x4xf32>
      %c2_105 = arith.constant 2 : index
      %c0_106 = arith.constant 0 : index
      %c0_107 = arith.constant 0 : index
      %312 = vector.load %arg5[%c2_105, %c0_106, %c0_107] : memref<3x8x4xf32, #tpu.memory_space<vmem>>, vector<1x8x4xf32>
      %313 = vector.shape_cast %312 : vector<1x8x4xf32> to vector<8x4xf32>
      %314 = vector.shape_cast %311 : vector<8x4xf32> to vector<1x8x4xf32>
      tpu.vector_store %arg5[%c2_105, %c0_106, %c0_107], %314 {strides = array<i32>} : memref<3x8x4xf32, #tpu.memory_space<vmem>>, vector<1x8x4xf32>,
    } else {
    }
    return
  }
  func.func @transform_0(%arg0: i32) -> (i32, i32, i32) {
    %c0_i32 = arith.constant 0 : i32
    %c0_i32_0 = arith.constant 0 : i32
    %c0_i32_1 = arith.constant 0 : i32
    return %arg0, %c0_i32, %c0_i32_0 : i32, i32, i32
  }
  func.func @transform_1(%arg0: i32) -> (i32, i32) {
    %c0_i32 = arith.constant 0 : i32
    %c0_i32_0 = arith.constant 0 : i32
    %c0_i32_1 = arith.constant 0 : i32
    return %c0_i32, %c0_i32_0 : i32, i32
  }
  func.func @transform_2(%arg0: i32) -> (i32, i32, i32) {
    %c0_i32 = arith.constant 0 : i32
    %c0_i32_0 = arith.constant 0 : i32
    %c0_i32_1 = arith.constant 0 : i32
    %c0_i32_2 = arith.constant 0 : i32
    return %c0_i32, %c0_i32_0, %c0_i32_1 : i32, i32, i32
  }
  func.func @transform_3(%arg0: i32) -> (i32, i32, i32) {
    %c0_i32 = arith.constant 0 : i32
    %c0_i32_0 = arith.constant 0 : i32
    %c0_i32_1 = arith.constant 0 : i32
    %c0_i32_2 = arith.constant 0 : i32
    return %c0_i32, %c0_i32_0, %c0_i32_1 : i32, i32, i32
  }
  func.func @transform_4(%arg0: i32) -> (i32, i32, i32) {
    %c0_i32 = arith.constant 0 : i32
    %c0_i32_0 = arith.constant 0 : i32
    %c0_i32_1 = arith.constant 0 : i32
    %c0_i32_2 = arith.constant 0 : i32
    return %c0_i32, %c0_i32_0, %c0_i32_1 : i32, i32, i32
  }
}

</mosaic_0001>

<bundles_post_ra>
// kernel: lstm_model_forward.6
= control target key start
LH: loop header
LB: loop body
LE: loop exit
PB: predicated region body
PF: predicated region fallthrough
CT: control target
= control target key end

     0   :  { %v435_v3 = vmov 0.0   ;;  %s827_s1 = inlined_call_operand.vmem [shape: f32[128,512], index: 1, kind: input, shape index: {}]   ;;  %s828_s0 = inlined_call_operand.vmem [shape: f32[64,128], index: 0, kind: input, shape index: {}]   ;;  %s829_s2 = inlined_call_operand.vmem [shape: f32[1,512], index: 2, kind: input, shape index: {}]   ;;  %s830_s3 = inlined_call_operand.vmem [shape: f32[64,512], index: 3, kind: output, shape index: {}]  }
   0x1   :  { %v23_v0 = vld [vmem:[%s827_s1 + $0x8] sm:$0xff]  ;;  %v25_v2 = vld [vmem:[%s827_s1 + $0x18] sm:$0xff]  ;;  %172 = vmatprep.mubr.f32.mxu0 %v435_v3  ;;  %285 = vmatprep.mubr.f32.mxu1 %v435_v3  ;;  %v22_v6 = vld [vmem:[%s827_s1] sm:$0xff] }
   0x2   :  { %v27_v1 = vld [vmem:[%s827_s1 + $0x28] sm:$0xff]  ;;  %v29_v5 = vld [vmem:[%s827_s1 + $0x38] sm:$0xff]  ;;  %v26_v7 = vld [vmem:[%s827_s1 + $0x20] sm:$0xff] }
   0x3   :  { %v370_v4 = vpack.c.bf16 %v27_v1, %v23_v0  ;;  %v402_v8 = vpack.c.bf16 %v29_v5, %v25_v2  ;;  %v372_v9 = vpack.c.bf16 %v26_v7, %v22_v6  ;;  %v24_v10 = vld [vmem:[%s827_s1 + $0x10] sm:$0xff]  ;;  %v31_v12 = vld [vmem:[%s827_s1 + $0x48] sm:$0xff]  ;;  %v33_v15 = vld [vmem:[%s827_s1 + $0x58] sm:$0xff] }
   0x4   :  { %v28_v11 = vld [vmem:[%s827_s1 + $0x30] sm:$0xff]  ;;  %v35_v14 = vld [vmem:[%s827_s1 + $0x68] sm:$0xff]  ;;  %v37_v16 = vld [vmem:[%s827_s1 + $0x78] sm:$0xff] }
   0x5   :  { %371 = vmatprep.subr.bf16.mxu0 %v370_v4  ;;  %v404_v13 = vpack.c.bf16 %v28_v11, %v24_v10  ;;  %403 = vmatprep.subr.bf16.mxu1 %v402_v8  ;;  %v374_v17 = vpack.c.bf16 %v35_v14, %v31_v12  ;;  %v406_v18 = vpack.c.bf16 %v37_v16, %v33_v15  ;;  %v30_v19 = vld [vmem:[%s827_s1 + $0x40] sm:$0xff]  ;;  %v32_v21 = vld [vmem:[%s827_s1 + $0x50] sm:$0xff]  ;;  %v39_v24 = vld [vmem:[%s827_s1 + $0x88] sm:$0xff] }
   0x6   :  { %373 = vmatpush1.bf16.msra.mxu0 %v372_v9  ;;  %v34_v20 = vld [vmem:[%s827_s1 + $0x60] sm:$0xff]  ;;  %v36_v23 = vld [vmem:[%s827_s1 + $0x70] sm:$0xff]  ;;  %v43_v25 = vld [vmem:[%s827_s1 + $0xa8] sm:$0xff] }
   0x7   :  { %405 = vmatpush1.bf16.msra.mxu1 %v404_v13  ;;  %v376_v22 = vpack.c.bf16 %v34_v20, %v30_v19  ;;  %375 = vmatprep.subr.bf16.mxu0 %v374_v17  ;;  %v408_v26 = vpack.c.bf16 %v36_v23, %v32_v21  ;;  %v378_v27 = vpack.c.bf16 %v43_v25, %v39_v24  ;;  %v41_v28 = vld [vmem:[%s827_s1 + $0x98] sm:$0xff]  ;;  %v38_v30 = vld [vmem:[%s827_s1 + $0x80] sm:$0xff]  ;;  %v40_v33 = vld [vmem:[%s827_s1 + $0x90] sm:$0xff] }
   0x8   :  { %407 = vmatprep.subr.bf16.mxu1 %v406_v18  ;;  %v45_v29 = vld [vmem:[%s827_s1 + $0xb8] sm:$0xff]  ;;  %v42_v32 = vld [vmem:[%s827_s1 + $0xa0] sm:$0xff]  ;;  %v44_v34 = vld [vmem:[%s827_s1 + $0xb0] sm:$0xff] }
   0x9   :  { %v410_v31 = vpack.c.bf16 %v45_v29, %v41_v28  ;;  %v380_v35 = vpack.c.bf16 %v42_v32, %v38_v30  ;;  %v47_v36 = vld [vmem:[%s827_s1 + $0xc8] sm:$0xff]  ;;  %v49_v38 = vld [vmem:[%s827_s1 + $0xd8] sm:$0xff]  ;;  %v412_v39 = vpack.c.bf16 %v44_v34, %v40_v33  ;;  %v46_v42 = vld [vmem:[%s827_s1 + $0xc0] sm:$0xff] }
   0xa   :  { %377 = vmatpush1.bf16.msra.mxu0 %v376_v22  ;;  %v51_v37 = vld [vmem:[%s827_s1 + $0xe8] sm:$0xff]  ;;  %v53_v41 = vld [vmem:[%s827_s1 + $0xf8] sm:$0xff]  ;;  %v50_v43 = vld [vmem:[%s827_s1 + $0xe0] sm:$0xff] }
   0xb   :  { %409 = vmatpush1.bf16.msra.mxu1 %v408_v26  ;;  %379 = vmatprep.subr.bf16.mxu0 %v378_v27  ;;  %v382_v40 = vpack.c.bf16 %v51_v37, %v47_v36  ;;  %v414_v44 = vpack.c.bf16 %v53_v41, %v49_v38  ;;  %v48_v45 = vld [vmem:[%s827_s1 + $0xd0] sm:$0xff]  ;;  %v55_v47 = vld [vmem:[%s827_s1 + $0x108] sm:$0xff]  ;;  %v57_v49 = vld [vmem:[%s827_s1 + $0x118] sm:$0xff]  ;;  %v384_v51 = vpack.c.bf16 %v50_v43, %v46_v42  ;;  %v88_v42 = vlaneseq }
   0xc   :  { %411 = vmatprep.subr.bf16.mxu1 %v410_v31  ;;  %v52_v46 = vld [vmem:[%s827_s1 + $0xf0] sm:$0xff]  ;;  %v59_v48 = vld [vmem:[%s827_s1 + $0x128] sm:$0xff]  ;;  %v61_v50 = vld [vmem:[%s827_s1 + $0x138] sm:$0xff] }
   0xd   :  { %v416_v52 = vpack.c.bf16 %v52_v46, %v48_v45  ;;  %v386_v53 = vpack.c.bf16 %v59_v48, %v55_v47  ;;  %v54_v54 = vld [vmem:[%s827_s1 + $0x100] sm:$0xff]  ;;  %v56_v56 = vld [vmem:[%s827_s1 + $0x110] sm:$0xff]  ;;  %v418_v57 = vpack.c.bf16 %v61_v50, %v57_v49  ;;  %v63_v59 = vld [vmem:[%s827_s1 + $0x148] sm:$0xff]  ;;  %v89_v43 = vshrl.u32 %v88_v42, 7 }
   0xe   :  { %381 = vmatpush1.bf16.msra.mxu0 %v380_v35  ;;  %v58_v55 = vld [vmem:[%s827_s1 + $0x120] sm:$0xff]  ;;  %v60_v58 = vld [vmem:[%s827_s1 + $0x130] sm:$0xff]  ;;  %v67_v60 = vld [vmem:[%s827_s1 + $0x168] sm:$0xff] }
   0xf   :  { %413 = vmatpush1.bf16.msra.mxu1 %v412_v39  ;;  %383 = vmatprep.subr.bf16.mxu0 %v382_v40  ;;  %v65_v61 = vld [vmem:[%s827_s1 + $0x158] sm:$0xff]  ;;  %v388_v63 = vpack.c.bf16 %v58_v55, %v54_v54  ;;  %v420_v0 = vpack.c.bf16 %v60_v58, %v56_v56  ;;  %v390_v1 = vpack.c.bf16 %v67_v60, %v63_v59  ;;  %v62_v2 = vld [vmem:[%s827_s1 + $0x140] sm:$0xff]  ;;  %v64_v5 = vld [vmem:[%s827_s1 + $0x150] sm:$0xff]  ;;  %v98_v46 = vsub.s32 2, %v89_v43 }
  0x10   :  { %415 = vmatprep.subr.bf16.mxu1 %v414_v44  ;;  %v69_v62 = vld [vmem:[%s827_s1 + $0x178] sm:$0xff]  ;;  %v66_v4 = vld [vmem:[%s827_s1 + $0x160] sm:$0xff]  ;;  %v68_v7 = vld [vmem:[%s827_s1 + $0x170] sm:$0xff]  ;;  %v90_v44 = vsub.s32 0, %v89_v43  ;;  %v94_v47 = vsub.s32 1, %v89_v43  ;;  %v102_v48 = vsub.s32 3, %v89_v43 }
  0x11   :  { %v422_v6 = vpack.c.bf16 %v69_v62, %v65_v61  ;;  %v71_v8 = vld [vmem:[%s827_s1 + $0x188] sm:$0xff]  ;;  %v73_v10 = vld [vmem:[%s827_s1 + $0x198] sm:$0xff]  ;;  %v392_v12 = vpack.c.bf16 %v66_v4, %v62_v2  ;;  %v424_v13 = vpack.c.bf16 %v68_v7, %v64_v5  ;;  %v70_v15 = vld [vmem:[%s827_s1 + $0x180] sm:$0xff] }
  0x12   :  { %385 = vmatpush1.bf16.msra.mxu0 %v384_v51  ;;  %v75_v9 = vld [vmem:[%s827_s1 + $0x1a8] sm:$0xff]  ;;  %v77_v11 = vld [vmem:[%s827_s1 + $0x1b8] sm:$0xff]  ;;  %v74_v16 = vld [vmem:[%s827_s1 + $0x1a0] sm:$0xff] }
  0x13   :  { %417 = vmatpush1.bf16.msra.mxu1 %v416_v52  ;;  %387 = vmatprep.subr.bf16.mxu0 %v386_v53  ;;  %v394_v14 = vpack.c.bf16 %v75_v9, %v71_v8  ;;  %v72_v17 = vld [vmem:[%s827_s1 + $0x190] sm:$0xff]  ;;  %v426_v18 = vpack.c.bf16 %v77_v11, %v73_v10  ;;  %v79_v20 = vld [vmem:[%s827_s1 + $0x1c8] sm:$0xff]  ;;  %v81_v22 = vld [vmem:[%s827_s1 + $0x1d8] sm:$0xff]  ;;  %v396_v24 = vpack.c.bf16 %v74_v16, %v70_v15 }
  0x14   :  { %419 = vmatprep.subr.bf16.mxu1 %v418_v57  ;;  %v76_v19 = vld [vmem:[%s827_s1 + $0x1b0] sm:$0xff]  ;;  %v83_v21 = vld [vmem:[%s827_s1 + $0x1e8] sm:$0xff]  ;;  %v85_v23 = vld [vmem:[%s827_s1 + $0x1f8] sm:$0xff] }
  0x15   :  { %v428_v25 = vpack.c.bf16 %v76_v19, %v72_v17  ;;  %v398_v26 = vpack.c.bf16 %v83_v21, %v79_v20  ;;  %v78_v27 = vld [vmem:[%s827_s1 + $0x1c0] sm:$0xff]  ;;  %v430_v29 = vpack.c.bf16 %v85_v23, %v81_v22  ;;  %v80_v30 = vld [vmem:[%s827_s1 + $0x1d0] sm:$0xff]  ;;  %v15_v35 = vld [vmem:[%s828_s0 + $0x8] sm:$0xff] }
  0x16   :  { %389 = vmatpush1.bf16.msra.mxu0 %v388_v63  ;;  %v82_v28 = vld [vmem:[%s827_s1 + $0x1e0] sm:$0xff]  ;;  %v84_v31 = vld [vmem:[%s827_s1 + $0x1f0] sm:$0xff]  ;;  %v17_v37 = vld [vmem:[%s828_s0 + $0x18] sm:$0xff] }
  0x17   :  { %421 = vmatpush1.bf16.msra.mxu1 %v420_v0  ;;  %391 = vmatprep.subr.bf16.mxu0 %v390_v1  ;;  %v400_v32 = vpack.c.bf16 %v82_v28, %v78_v27  ;;  %v432_v33 = vpack.c.bf16 %v84_v31, %v80_v30  ;;  %v14_v34 = vld [vmem:[%s828_s0] sm:$0xff]  ;;  %v16_v36 = vld [vmem:[%s828_s0 + $0x10] sm:$0xff]  ;;  %v19_v39 = vld [vmem:[%s828_s0 + $0x28] sm:$0xff] }
  0x18   :  { %423 = vmatprep.subr.bf16.mxu1 %v422_v6  ;;  %v18_v38 = vld [vmem:[%s828_s0 + $0x20] sm:$0xff]  ;;  %v20_v40 = vld [vmem:[%s828_s0 + $0x30] sm:$0xff]  ;;  %v21_v41 = vld [vmem:[%s828_s0 + $0x38] sm:$0xff] }
  0x19   :  { %v86_v45 = vld [vmem:[%s829_s2] sm:$0xf] }
  0x1a   :  { %393 = vmatpush1.bf16.msra.mxu0 %v392_v12  ;;  %v691_v49 = vrot.slane %v86_v45, %v90_v44  ;;  %v693_v50 = vrot.slane %v86_v45, %v98_v46  ;;  %v695_v51 = vrot.slane %v86_v45, %v94_v47  ;;  %v697_v52 = vrot.slane %v86_v45, %v102_v48 }
  0x1b   :  { %425 = vmatpush1.bf16.msra.mxu1 %v424_v13  ;;  %395 = vmatprep.subr.bf16.mxu0 %v394_v14 }
  0x1c   :  { %427 = vmatprep.subr.bf16.mxu1 %v426_v18 }
  0x1e   :  { %397 = vmatpush1.bf16.msra.mxu0 %v396_v24 }
  0x1f   :  { %429 = vmatpush1.bf16.msra.mxu1 %v428_v25  ;;  %399 = vmatprep.subr.bf16.mxu0 %v398_v26 }
  0x20   :  { %431 = vmatprep.subr.bf16.mxu1 %v430_v29 }
  0x22   :  { %401 = vmatpush1.bf16.msra.mxu0 %v400_v32 }
  0x23   :  { %433 = vmatpush1.bf16.msra.mxu1 %v432_v33 }
  0x25   :  { %173 = vmatmul.mubr.f32.vlgmr.msra.gmra.mrb[0].mxu0 %v14_v34 }
  0x26   :  { %286 = vmatmul.mubr.f32.vlgmr.msra.gmra.mrb[0].mxu1 %v14_v34  ;;  %178 = vmatprep.mubr.f32.mxu0 %v435_v3 }
  0x27   :  { %291 = vmatprep.mubr.f32.mxu1 %v435_v3 }
  0x29   :  { %179 = vmatmul.mubr.f32.gmra.mrb[2].mxu0 %v15_v35 }
  0x2a   :  { %292 = vmatmul.mubr.f32.gmra.mrb[2].mxu1 %v15_v35  ;;  %184 = vmatprep.mubr.f32.mxu0 %v435_v3 }
  0x2b   :  { %297 = vmatprep.mubr.f32.mxu1 %v435_v3 }
  0x2d   :  { %185 = vmatmul.mubr.f32.gmra.mrb[4].mxu0 %v16_v36 }
  0x2e   :  { %298 = vmatmul.mubr.f32.gmra.mrb[4].mxu1 %v16_v36  ;;  %190 = vmatprep.mubr.f32.mxu0 %v435_v3 }
  0x2f   :  { %303 = vmatprep.mubr.f32.mxu1 %v435_v3 }
  0x31   :  { %191 = vmatmul.mubr.f32.gmra.mrb[6].mxu0 %v17_v37 }
  0x32   :  { %304 = vmatmul.mubr.f32.gmra.mrb[6].mxu1 %v17_v37  ;;  %196 = vmatprep.mubr.f32.mxu0 %v435_v3 }
  0x33   :  { %309 = vmatprep.mubr.f32.mxu1 %v435_v3 }
  0x35   :  { %197 = vmatmul.mubr.f32.gmra.mrb[8].mxu0 %v18_v38 }
  0x36   :  { %310 = vmatmul.mubr.f32.gmra.mrb[8].mxu1 %v18_v38  ;;  %202 = vmatprep.mubr.f32.mxu0 %v435_v3 }
  0x37   :  { %315 = vmatprep.mubr.f32.mxu1 %v435_v3 }
  0x39   :  { %203 = vmatmul.mubr.f32.gmra.mrb[10].mxu0 %v19_v39 }
  0x3a   :  { %316 = vmatmul.mubr.f32.gmra.mrb[10].mxu1 %v19_v39  ;;  %208 = vmatprep.mubr.f32.mxu0 %v435_v3 }
  0x3b   :  { %321 = vmatprep.mubr.f32.mxu1 %v435_v3 }
  0x3d   :  { %209 = vmatmul.mubr.f32.gmra.mrb[12].mxu0 %v20_v40 }
  0x3e   :  { %322 = vmatmul.mubr.f32.gmra.mrb[12].mxu1 %v20_v40  ;;  %214 = vmatprep.mubr.f32.mxu0 %v435_v3 }
  0x3f   :  { %327 = vmatprep.mubr.f32.mxu1 %v435_v3 }
  0x41   :  { %215 = vmatmul.mubr.f32.gmra.mrb[14].mxu0 %v21_v41 }
  0x42   :  { %328 = vmatmul.mubr.f32.gmra.mrb[14].mxu1 %v21_v41 }
  0xf8   :  { %v174_v3 = vpop.f32.mrb[0].mxu0 }
  0xf9   :  { %v175_v53 = vadd.f32 %v174_v3, %v691_v49  ;;  %v287_v54 = vpop.f32.mrb[0].mxu1  ;;  %v176_v55 = vpop.f32.mrb[1].mxu0 }
  0xfa   :  { %v288_v56 = vadd.f32 %v287_v54, %v693_v50  ;;  %v177_v57 = vadd.f32 %v176_v55, %v695_v51  ;;  %v289_v58 = vpop.f32.mrb[1].mxu1 }
  0xfb   :  { %334 = vst [vmem:[%s830_s3] sm:$0xff] %v175_v53  ;;  %v290_v59 = vadd.f32 %v289_v58, %v697_v52 }
  0xfc   :  { %336 = vst [vmem:[%s830_s3 + $0x10] sm:$0xff] %v288_v56  ;;  %335 = vst [vmem:[%s830_s3 + $0x8] sm:$0xff] %v177_v57  ;;  %v180_v60 = vpop.f32.mrb[2].mxu0 }
  0xfd   :  { %337 = vst [vmem:[%s830_s3 + $0x18] sm:$0xff] %v290_v59  ;;  %v181_v61 = vadd.f32 %v180_v60, %v691_v49  ;;  %v293_v62 = vpop.f32.mrb[2].mxu1  ;;  %v182_v63 = vpop.f32.mrb[3].mxu0 }
  0xfe   :  { %v294_v0 = vadd.f32 %v293_v62, %v693_v50  ;;  %v183_v1 = vadd.f32 %v182_v63, %v695_v51  ;;  %v295_v2 = vpop.f32.mrb[3].mxu1 }
  0xff   :  { %338 = vst [vmem:[%s830_s3 + $0x20] sm:$0xff] %v181_v61  ;;  %v296_v4 = vadd.f32 %v295_v2, %v697_v52 }
 0x100   :  { %340 = vst [vmem:[%s830_s3 + $0x30] sm:$0xff] %v294_v0  ;;  %339 = vst [vmem:[%s830_s3 + $0x28] sm:$0xff] %v183_v1  ;;  %v186_v5 = vpop.f32.mrb[4].mxu0 }
 0x101   :  { %341 = vst [vmem:[%s830_s3 + $0x38] sm:$0xff] %v296_v4  ;;  %v187_v6 = vadd.f32 %v186_v5, %v691_v49  ;;  %v299_v7 = vpop.f32.mrb[4].mxu1  ;;  %v188_v8 = vpop.f32.mrb[5].mxu0 }
 0x102   :  { %v300_v9 = vadd.f32 %v299_v7, %v693_v50  ;;  %v189_v10 = vadd.f32 %v188_v8, %v695_v51  ;;  %v301_v11 = vpop.f32.mrb[5].mxu1 }
 0x103   :  { %342 = vst [vmem:[%s830_s3 + $0x40] sm:$0xff] %v187_v6  ;;  %v302_v12 = vadd.f32 %v301_v11, %v697_v52 }
 0x104   :  { %344 = vst [vmem:[%s830_s3 + $0x50] sm:$0xff] %v300_v9  ;;  %343 = vst [vmem:[%s830_s3 + $0x48] sm:$0xff] %v189_v10  ;;  %v192_v13 = vpop.f32.mrb[6].mxu0 }
 0x105   :  { %345 = vst [vmem:[%s830_s3 + $0x58] sm:$0xff] %v302_v12  ;;  %v193_v14 = vadd.f32 %v192_v13, %v691_v49  ;;  %v305_v15 = vpop.f32.mrb[6].mxu1  ;;  %v194_v16 = vpop.f32.mrb[7].mxu0 }
 0x106   :  { %v306_v17 = vadd.f32 %v305_v15, %v693_v50  ;;  %v195_v18 = vadd.f32 %v194_v16, %v695_v51  ;;  %v307_v19 = vpop.f32.mrb[7].mxu1 }
 0x107   :  { %346 = vst [vmem:[%s830_s3 + $0x60] sm:$0xff] %v193_v14  ;;  %v308_v20 = vadd.f32 %v307_v19, %v697_v52 }
 0x108   :  { %348 = vst [vmem:[%s830_s3 + $0x70] sm:$0xff] %v306_v17  ;;  %347 = vst [vmem:[%s830_s3 + $0x68] sm:$0xff] %v195_v18  ;;  %v198_v21 = vpop.f32.mrb[8].mxu0 }
 0x109   :  { %349 = vst [vmem:[%s830_s3 + $0x78] sm:$0xff] %v308_v20  ;;  %v199_v22 = vadd.f32 %v198_v21, %v691_v49  ;;  %v311_v23 = vpop.f32.mrb[8].mxu1  ;;  %v200_v24 = vpop.f32.mrb[9].mxu0 }
 0x10a   :  { %v312_v25 = vadd.f32 %v311_v23, %v693_v50  ;;  %v201_v26 = vadd.f32 %v200_v24, %v695_v51  ;;  %v313_v27 = vpop.f32.mrb[9].mxu1 }
 0x10b   :  { %350 = vst [vmem:[%s830_s3 + $0x80] sm:$0xff] %v199_v22  ;;  %v314_v28 = vadd.f32 %v313_v27, %v697_v52 }
 0x10c   :  { %352 = vst [vmem:[%s830_s3 + $0x90] sm:$0xff] %v312_v25  ;;  %351 = vst [vmem:[%s830_s3 + $0x88] sm:$0xff] %v201_v26  ;;  %v204_v29 = vpop.f32.mrb[10].mxu0 }
 0x10d   :  { %353 = vst [vmem:[%s830_s3 + $0x98] sm:$0xff] %v314_v28  ;;  %v205_v30 = vadd.f32 %v204_v29, %v691_v49  ;;  %v317_v31 = vpop.f32.mrb[10].mxu1  ;;  %v206_v32 = vpop.f32.mrb[11].mxu0 }
 0x10e   :  { %v318_v33 = vadd.f32 %v317_v31, %v693_v50  ;;  %v207_v34 = vadd.f32 %v206_v32, %v695_v51  ;;  %v319_v35 = vpop.f32.mrb[11].mxu1 }
 0x10f   :  { %354 = vst [vmem:[%s830_s3 + $0xa0] sm:$0xff] %v205_v30  ;;  %v320_v36 = vadd.f32 %v319_v35, %v697_v52 }
 0x110   :  { %356 = vst [vmem:[%s830_s3 + $0xb0] sm:$0xff] %v318_v33  ;;  %355 = vst [vmem:[%s830_s3 + $0xa8] sm:$0xff] %v207_v34  ;;  %v210_v37 = vpop.f32.mrb[12].mxu0 }
 0x111   :  { %357 = vst [vmem:[%s830_s3 + $0xb8] sm:$0xff] %v320_v36  ;;  %v211_v38 = vadd.f32 %v210_v37, %v691_v49  ;;  %v323_v39 = vpop.f32.mrb[12].mxu1  ;;  %v212_v40 = vpop.f32.mrb[13].mxu0 }
 0x112   :  { %v324_v41 = vadd.f32 %v323_v39, %v693_v50  ;;  %v213_v42 = vadd.f32 %v212_v40, %v695_v51  ;;  %v325_v43 = vpop.f32.mrb[13].mxu1 }
 0x113   :  { %358 = vst [vmem:[%s830_s3 + $0xc0] sm:$0xff] %v211_v38  ;;  %v326_v44 = vadd.f32 %v325_v43, %v697_v52 }
 0x114   :  { %360 = vst [vmem:[%s830_s3 + $0xd0] sm:$0xff] %v324_v41  ;;  %359 = vst [vmem:[%s830_s3 + $0xc8] sm:$0xff] %v213_v42  ;;  %v216_v45 = vpop.f32.mrb[14].mxu0 }
 0x115   :  { %361 = vst [vmem:[%s830_s3 + $0xd8] sm:$0xff] %v326_v44  ;;  %v217_v46 = vadd.f32 %v216_v45, %v691_v49  ;;  %v329_v47 = vpop.f32.mrb[14].mxu1  ;;  %v218_v48 = vpop.f32.mrb[15].mxu0 }
 0x116   :  { %v330_v3 = vadd.f32 %v329_v47, %v693_v50  ;;  %v219_v53 = vadd.f32 %v218_v48, %v695_v51  ;;  %v331_v54 = vpop.f32.mrb[15].mxu1 }
 0x117   :  { %362 = vst [vmem:[%s830_s3 + $0xe0] sm:$0xff] %v217_v46  ;;  %v332_v55 = vadd.f32 %v331_v54, %v697_v52 }
 0x118   :  { %364 = vst [vmem:[%s830_s3 + $0xf0] sm:$0xff] %v330_v3  ;;  %363 = vst [vmem:[%s830_s3 + $0xe8] sm:$0xff] %v219_v53 }
 0x119   :  { %365 = vst [vmem:[%s830_s3 + $0xf8] sm:$0xff] %v332_v55 }

// kernel: lstm_model_forward.4
= control target key start
LH: loop header
LB: loop body
LE: loop exit
PB: predicated region body
PF: predicated region fallthrough
CT: control target
= control target key end

     0   :  { %vm75_vm0 = vcmask 1043456   ;;  %v369_v2 = vmov 0.0   ;;  %vm50_vm1 = vcmask 31744   ;;  %v26_v13 = vlaneseq  ;;  %s575_s1 = inlined_call_operand.vmem [shape: f32[4,512], index: 1, kind: input, shape index: {}]   ;;  %s576_s0 = inlined_call_operand.vmem [shape: f32[64,4], index: 0, kind: input, shape index: {}]   ;;  %s577_s2 = inlined_call_operand.vmem [shape: f32[1,512], index: 2, kind: input, shape index: {}]   ;;  %s578_s3 = inlined_call_operand.vmem [shape: f32[64,512], index: 3, kind: output, shape index: {}]  }
   0x1   :  { %v22_v0 = vld [vmem:[%s575_s1] sm:$0xff]  ;;  %v23_v1 = vld [vmem:[%s575_s1 + $0x8] sm:$0xff]  ;;  %148 = vmatprep.mubr.f32.mxu0 %v369_v2  ;;  %261 = vmatprep.mubr.f32.mxu1 %v369_v2  ;;  %v16_v7 = vld [vmem:[%s576_s0 + $0x10] sm:$0xff] }
   0x2   :  { %v48_v3 = vcombine.high %v22_v0, %v22_v0  ;;  %v49_v4 = vcombine.high %v23_v1, %v23_v1  ;;  %v14_v5 = vld [vmem:[%s576_s0] sm:$0xff]  ;;  %v15_v6 = vld [vmem:[%s576_s0 + $0x8] sm:$0xff]  ;;  %v17_v8 = vld [vmem:[%s576_s0 + $0x18] sm:$0xff]  ;;  %v27_v14 = vshrl.u32 %v26_v13, 7 }
   0x3   :  { %v18_v9 = vld [vmem:[%s576_s0 + $0x20] sm:$0xff]  ;;  %v19_v10 = vld [vmem:[%s576_s0 + $0x28] sm:$0xff]  ;;  %v20_v11 = vld [vmem:[%s576_s0 + $0x30] sm:$0xff] }
   0x4   :  { %346 = vmatprep.subr.msk.mxu0 %vm75_vm0, %v48_v3  ;;  %356 = vmatprep.subr.msk.mxu1 %vm75_vm0, %v49_v4  ;;  %v21_v12 = vld [vmem:[%s576_s0 + $0x38] sm:$0xff]  ;;  %v28_v15 = vsub.s32 0, %v27_v14  ;;  %v36_v16 = vsub.s32 2, %v27_v14  ;;  %v24_v17 = vld [vmem:[%s577_s2] sm:$0xf]  ;;  %v32_v18 = vsub.s32 1, %v27_v14 }
   0x5   :  { %347 = vmatpush1.msk.msra.mxu0 %vm75_vm0, %v22_v0  ;;  %357 = vmatpush1.msk.msra.mxu1 %vm75_vm0, %v23_v1  ;;  %v40_v19 = vsub.s32 3, %v27_v14 }
   0x6   :  { %348 = vmatmul.mubr.msk.f32.vlgmr.msra.gmra.mrb[0].mxu0 %vm50_vm1, %v14_v5  ;;  %358 = vmatmul.mubr.msk.f32.vlgmr.msra.gmra.mrb[0].mxu1 %vm50_vm1, %v14_v5  ;;  %v439_v20 = vrot.slane %v24_v17, %v28_v15  ;;  %v441_v21 = vrot.slane %v24_v17, %v36_v16  ;;  %v443_v22 = vrot.slane %v24_v17, %v32_v18 }
   0x7   :  { %154 = vmatprep.mubr.f32.mxu0 %v369_v2  ;;  %267 = vmatprep.mubr.f32.mxu1 %v369_v2  ;;  %v445_v23 = vrot.slane %v24_v17, %v40_v19 }
   0xa   :  { %349 = vmatmul.mubr.msk.f32.gmra.mrb[2].mxu0 %vm50_vm1, %v15_v6  ;;  %359 = vmatmul.mubr.msk.f32.gmra.mrb[2].mxu1 %vm50_vm1, %v15_v6 }
   0xb   :  { %160 = vmatprep.mubr.f32.mxu0 %v369_v2  ;;  %273 = vmatprep.mubr.f32.mxu1 %v369_v2 }
   0xe   :  { %350 = vmatmul.mubr.msk.f32.gmra.mrb[4].mxu0 %vm50_vm1, %v16_v7  ;;  %360 = vmatmul.mubr.msk.f32.gmra.mrb[4].mxu1 %vm50_vm1, %v16_v7 }
   0xf   :  { %166 = vmatprep.mubr.f32.mxu0 %v369_v2  ;;  %279 = vmatprep.mubr.f32.mxu1 %v369_v2 }
  0x12   :  { %351 = vmatmul.mubr.msk.f32.gmra.mrb[6].mxu0 %vm50_vm1, %v17_v8  ;;  %361 = vmatmul.mubr.msk.f32.gmra.mrb[6].mxu1 %vm50_vm1, %v17_v8 }
  0x13   :  { %172 = vmatprep.mubr.f32.mxu0 %v369_v2  ;;  %285 = vmatprep.mubr.f32.mxu1 %v369_v2 }
  0x16   :  { %352 = vmatmul.mubr.msk.f32.gmra.mrb[8].mxu0 %vm50_vm1, %v18_v9  ;;  %362 = vmatmul.mubr.msk.f32.gmra.mrb[8].mxu1 %vm50_vm1, %v18_v9 }
  0x17   :  { %178 = vmatprep.mubr.f32.mxu0 %v369_v2  ;;  %291 = vmatprep.mubr.f32.mxu1 %v369_v2 }
  0x1a   :  { %353 = vmatmul.mubr.msk.f32.gmra.mrb[10].mxu0 %vm50_vm1, %v19_v10  ;;  %363 = vmatmul.mubr.msk.f32.gmra.mrb[10].mxu1 %vm50_vm1, %v19_v10 }
  0x1b   :  { %184 = vmatprep.mubr.f32.mxu0 %v369_v2  ;;  %297 = vmatprep.mubr.f32.mxu1 %v369_v2 }
  0x1e   :  { %354 = vmatmul.mubr.msk.f32.gmra.mrb[12].mxu0 %vm50_vm1, %v20_v11  ;;  %364 = vmatmul.mubr.msk.f32.gmra.mrb[12].mxu1 %vm50_vm1, %v20_v11 }
  0x1f   :  { %190 = vmatprep.mubr.f32.mxu0 %v369_v2  ;;  %303 = vmatprep.mubr.f32.mxu1 %v369_v2 }
  0x22   :  { %355 = vmatmul.mubr.msk.f32.gmra.mrb[14].mxu0 %vm50_vm1, %v21_v12  ;;  %365 = vmatmul.mubr.msk.f32.gmra.mrb[14].mxu1 %vm50_vm1, %v21_v12 }
  0xd9   :  { %v150_v24 = vpop.f32.mrb[0].mxu0  ;;  %v263_v25 = vpop.f32.mrb[0].mxu1 }
  0xda   :  { %v151_v26 = vadd.f32 %v150_v24, %v439_v20  ;;  %v264_v27 = vadd.f32 %v263_v25, %v441_v21  ;;  %v152_v28 = vpop.f32.mrb[1].mxu0  ;;  %v265_v29 = vpop.f32.mrb[1].mxu1 }
  0xdb   :  { %v153_v30 = vadd.f32 %v152_v28, %v443_v22  ;;  %v266_v31 = vadd.f32 %v265_v29, %v445_v23 }
  0xdc   :  { %310 = vst [vmem:[%s578_s3] sm:$0xff] %v151_v26  ;;  %312 = vst [vmem:[%s578_s3 + $0x10] sm:$0xff] %v264_v27 }
  0xdd   :  { %311 = vst [vmem:[%s578_s3 + $0x8] sm:$0xff] %v153_v30  ;;  %313 = vst [vmem:[%s578_s3 + $0x18] sm:$0xff] %v266_v31  ;;  %v156_v32 = vpop.f32.mrb[2].mxu0  ;;  %v269_v33 = vpop.f32.mrb[2].mxu1 }
  0xde   :  { %v157_v34 = vadd.f32 %v156_v32, %v439_v20  ;;  %v270_v35 = vadd.f32 %v269_v33, %v441_v21  ;;  %v158_v36 = vpop.f32.mrb[3].mxu0  ;;  %v271_v37 = vpop.f32.mrb[3].mxu1 }
  0xdf   :  { %v159_v38 = vadd.f32 %v158_v36, %v443_v22  ;;  %v272_v39 = vadd.f32 %v271_v37, %v445_v23 }
  0xe0   :  { %314 = vst [vmem:[%s578_s3 + $0x20] sm:$0xff] %v157_v34  ;;  %316 = vst [vmem:[%s578_s3 + $0x30] sm:$0xff] %v270_v35 }
  0xe1   :  { %315 = vst [vmem:[%s578_s3 + $0x28] sm:$0xff] %v159_v38  ;;  %317 = vst [vmem:[%s578_s3 + $0x38] sm:$0xff] %v272_v39  ;;  %v162_v40 = vpop.f32.mrb[4].mxu0  ;;  %v275_v41 = vpop.f32.mrb[4].mxu1 }
  0xe2   :  { %v163_v42 = vadd.f32 %v162_v40, %v439_v20  ;;  %v276_v43 = vadd.f32 %v275_v41, %v441_v21  ;;  %v164_v44 = vpop.f32.mrb[5].mxu0  ;;  %v277_v45 = vpop.f32.mrb[5].mxu1 }
  0xe3   :  { %v165_v46 = vadd.f32 %v164_v44, %v443_v22  ;;  %v278_v47 = vadd.f32 %v277_v45, %v445_v23 }
  0xe4   :  { %318 = vst [vmem:[%s578_s3 + $0x40] sm:$0xff] %v163_v42  ;;  %320 = vst [vmem:[%s578_s3 + $0x50] sm:$0xff] %v276_v43 }
  0xe5   :  { %319 = vst [vmem:[%s578_s3 + $0x48] sm:$0xff] %v165_v46  ;;  %321 = vst [vmem:[%s578_s3 + $0x58] sm:$0xff] %v278_v47  ;;  %v168_v48 = vpop.f32.mrb[6].mxu0  ;;  %v281_v49 = vpop.f32.mrb[6].mxu1 }
  0xe6   :  { %v169_v50 = vadd.f32 %v168_v48, %v439_v20  ;;  %v282_v51 = vadd.f32 %v281_v49, %v441_v21  ;;  %v170_v52 = vpop.f32.mrb[7].mxu0  ;;  %v283_v53 = vpop.f32.mrb[7].mxu1 }
  0xe7   :  { %v171_v54 = vadd.f32 %v170_v52, %v443_v22  ;;  %v284_v55 = vadd.f32 %v283_v53, %v445_v23 }
  0xe8   :  { %322 = vst [vmem:[%s578_s3 + $0x60] sm:$0xff] %v169_v50  ;;  %324 = vst [vmem:[%s578_s3 + $0x70] sm:$0xff] %v282_v51 }
  0xe9   :  { %323 = vst [vmem:[%s578_s3 + $0x68] sm:$0xff] %v171_v54  ;;  %325 = vst [vmem:[%s578_s3 + $0x78] sm:$0xff] %v284_v55  ;;  %v174_v56 = vpop.f32.mrb[8].mxu0  ;;  %v287_v57 = vpop.f32.mrb[8].mxu1 }
  0xea   :  { %v175_v58 = vadd.f32 %v174_v56, %v439_v20  ;;  %v288_v59 = vadd.f32 %v287_v57, %v441_v21  ;;  %v176_v60 = vpop.f32.mrb[9].mxu0  ;;  %v289_v61 = vpop.f32.mrb[9].mxu1 }
  0xeb   :  { %v177_v62 = vadd.f32 %v176_v60, %v443_v22  ;;  %v290_v63 = vadd.f32 %v289_v61, %v445_v23 }
  0xec   :  { %326 = vst [vmem:[%s578_s3 + $0x80] sm:$0xff] %v175_v58  ;;  %328 = vst [vmem:[%s578_s3 + $0x90] sm:$0xff] %v288_v59 }
  0xed   :  { %327 = vst [vmem:[%s578_s3 + $0x88] sm:$0xff] %v177_v62  ;;  %329 = vst [vmem:[%s578_s3 + $0x98] sm:$0xff] %v290_v63  ;;  %v180_v0 = vpop.f32.mrb[10].mxu0  ;;  %v293_v1 = vpop.f32.mrb[10].mxu1 }
  0xee   :  { %v181_v2 = vadd.f32 %v180_v0, %v439_v20  ;;  %v294_v3 = vadd.f32 %v293_v1, %v441_v21  ;;  %v182_v4 = vpop.f32.mrb[11].mxu0  ;;  %v295_v5 = vpop.f32.mrb[11].mxu1 }
  0xef   :  { %v183_v6 = vadd.f32 %v182_v4, %v443_v22  ;;  %v296_v7 = vadd.f32 %v295_v5, %v445_v23 }
  0xf0   :  { %330 = vst [vmem:[%s578_s3 + $0xa0] sm:$0xff] %v181_v2  ;;  %332 = vst [vmem:[%s578_s3 + $0xb0] sm:$0xff] %v294_v3 }
  0xf1   :  { %331 = vst [vmem:[%s578_s3 + $0xa8] sm:$0xff] %v183_v6  ;;  %333 = vst [vmem:[%s578_s3 + $0xb8] sm:$0xff] %v296_v7  ;;  %v186_v8 = vpop.f32.mrb[12].mxu0  ;;  %v299_v9 = vpop.f32.mrb[12].mxu1 }
  0xf2   :  { %v187_v10 = vadd.f32 %v186_v8, %v439_v20  ;;  %v300_v11 = vadd.f32 %v299_v9, %v441_v21  ;;  %v188_v12 = vpop.f32.mrb[13].mxu0  ;;  %v301_v13 = vpop.f32.mrb[13].mxu1 }
  0xf3   :  { %v189_v14 = vadd.f32 %v188_v12, %v443_v22  ;;  %v302_v15 = vadd.f32 %v301_v13, %v445_v23 }
  0xf4   :  { %334 = vst [vmem:[%s578_s3 + $0xc0] sm:$0xff] %v187_v10  ;;  %336 = vst [vmem:[%s578_s3 + $0xd0] sm:$0xff] %v300_v11 }
  0xf5   :  { %335 = vst [vmem:[%s578_s3 + $0xc8] sm:$0xff] %v189_v14  ;;  %337 = vst [vmem:[%s578_s3 + $0xd8] sm:$0xff] %v302_v15  ;;  %v192_v16 = vpop.f32.mrb[14].mxu0  ;;  %v305_v17 = vpop.f32.mrb[14].mxu1 }
  0xf6   :  { %v193_v18 = vadd.f32 %v192_v16, %v439_v20  ;;  %v306_v19 = vadd.f32 %v305_v17, %v441_v21  ;;  %v194_v24 = vpop.f32.mrb[15].mxu0  ;;  %v307_v25 = vpop.f32.mrb[15].mxu1 }
  0xf7   :  { %v195_v26 = vadd.f32 %v194_v24, %v443_v22  ;;  %v308_v27 = vadd.f32 %v307_v25, %v445_v23 }
  0xf8   :  { %338 = vst [vmem:[%s578_s3 + $0xe0] sm:$0xff] %v193_v18  ;;  %340 = vst [vmem:[%s578_s3 + $0xf0] sm:$0xff] %v306_v19 }
  0xf9   :  { %339 = vst [vmem:[%s578_s3 + $0xe8] sm:$0xff] %v195_v26  ;;  %341 = vst [vmem:[%s578_s3 + $0xf8] sm:$0xff] %v308_v27 }

// kernel: lstm_model_forward.7
= control target key start
LH: loop header
LB: loop body
LE: loop exit
PB: predicated region body
PF: predicated region fallthrough
CT: control target
= control target key end

     0   :  { %v2793_v3 = vmov 0.0   ;;  %vm2795_vm0 = vmmov 0   ;;  %vm1586_vm1 = vcmask 31744   ;;  %s3676_s1 = inlined_call_operand.vmem [shape: f32[128,512], index: 1, kind: input, shape index: {}]   ;;  %s3677_s0 = inlined_call_operand.vmem [shape: f32[8,8,512], index: 0, kind: input, shape index: {}]   ;;  %s3678_s2 = inlined_call_operand.vmem [shape: f32[3,128,4], index: 2, kind: input, shape index: {}]   ;;  %s3679_s3 = inlined_call_operand.vmem [shape: f32[3,1,4], index: 3, kind: input, shape index: {}]   ;;  %s3680_s4 = inlined_call_operand.vmem [shape: f32[3,8,4], index: 4, kind: output, shape index: {}]  }
   0x1   :  { %v30_v0 = vld [vmem:[%s3676_s1 + $0x8] sm:$0xff]  ;;  %v29_v2 = vld [vmem:[%s3676_s1] sm:$0xff]  ;;  %157 = vmatprep.mubr.f32.mxu0 %v2793_v3  ;;  %228 = vmatprep.mubr.f32.mxu1 %v2793_v3  ;;  %v32_v19 = vld [vmem:[%s3676_s1 + $0x18] sm:$0xff] }
   0x2   :  { %v34_v1 = vld [vmem:[%s3676_s1 + $0x28] sm:$0xff]  ;;  %v33_v5 = vld [vmem:[%s3676_s1 + $0x20] sm:$0xff]  ;;  %v36_v20 = vld [vmem:[%s3676_s1 + $0x38] sm:$0xff] }
   0x3   :  { %v2832_v4 = vpack.c.bf16 %v34_v1, %v30_v0  ;;  %v38_v6 = vld [vmem:[%s3676_s1 + $0x48] sm:$0xff]  ;;  %v2843_v8 = vpack.c.bf16 %v33_v5, %v29_v2  ;;  %v37_v10 = vld [vmem:[%s3676_s1 + $0x40] sm:$0xff]  ;;  %v2884_v22 = vpack.c.bf16 %v36_v20, %v32_v19  ;;  %v31_v23 = vld [vmem:[%s3676_s1 + $0x10] sm:$0xff] }
   0x4   :  { %v42_v7 = vld [vmem:[%s3676_s1 + $0x68] sm:$0xff]  ;;  %v41_v11 = vld [vmem:[%s3676_s1 + $0x60] sm:$0xff]  ;;  %v35_v24 = vld [vmem:[%s3676_s1 + $0x30] sm:$0xff] }
   0x5   :  { %v2845_v9 = vpack.c.bf16 %v42_v7, %v38_v6  ;;  %v46_v12 = vld [vmem:[%s3676_s1 + $0x88] sm:$0xff]  ;;  %2067 = vmatprep.subr.bf16.mxu0 %v2832_v4  ;;  %v2861_v14 = vpack.c.bf16 %v41_v11, %v37_v10  ;;  %v45_v15 = vld [vmem:[%s3676_s1 + $0x80] sm:$0xff]  ;;  %v2892_v25 = vpack.c.bf16 %v35_v24, %v31_v23  ;;  %2099 = vmatprep.subr.bf16.mxu1 %v2884_v22  ;;  %v40_v27 = vld [vmem:[%s3676_s1 + $0x58] sm:$0xff] }
   0x6   :  { %v50_v13 = vld [vmem:[%s3676_s1 + $0xa8] sm:$0xff]  ;;  %2069 = vmatpush1.bf16.msra.mxu0 %v2843_v8  ;;  %v49_v16 = vld [vmem:[%s3676_s1 + $0xa0] sm:$0xff]  ;;  %v44_v28 = vld [vmem:[%s3676_s1 + $0x78] sm:$0xff] }
   0x7   :  { %2071 = vmatprep.subr.bf16.mxu0 %v2845_v9  ;;  %v2870_v17 = vpack.c.bf16 %v50_v13, %v46_v12  ;;  %v54_v18 = vld [vmem:[%s3676_s1 + $0xc8] sm:$0xff]  ;;  %v2895_v26 = vpack.c.bf16 %v49_v16, %v45_v15  ;;  %v39_v29 = vld [vmem:[%s3676_s1 + $0x50] sm:$0xff]  ;;  %v53_v31 = vld [vmem:[%s3676_s1 + $0xc0] sm:$0xff]  ;;  %2101 = vmatpush1.bf16.msra.mxu1 %v2892_v25  ;;  %v2917_v33 = vpack.c.bf16 %v44_v28, %v40_v27 }
   0x8   :  { %v58_v21 = vld [vmem:[%s3676_s1 + $0xe8] sm:$0xff]  ;;  %v57_v32 = vld [vmem:[%s3676_s1 + $0xe0] sm:$0xff]  ;;  %v43_v34 = vld [vmem:[%s3676_s1 + $0x70] sm:$0xff] }
   0x9   :  { %v2908_v30 = vpack.c.bf16 %v58_v21, %v54_v18  ;;  %v62_v35 = vld [vmem:[%s3676_s1 + $0x108] sm:$0xff]  ;;  %v2928_v37 = vpack.c.bf16 %v43_v34, %v39_v29  ;;  %v48_v38 = vld [vmem:[%s3676_s1 + $0x98] sm:$0xff]  ;;  %2103 = vmatprep.subr.bf16.mxu1 %v2917_v33  ;;  %v47_v40 = vld [vmem:[%s3676_s1 + $0x90] sm:$0xff]  ;;  %v2944_v42 = vpack.c.bf16 %v57_v32, %v53_v31 }
   0xa   :  { %2073 = vmatpush1.bf16.msra.mxu0 %v2861_v14  ;;  %v66_v36 = vld [vmem:[%s3676_s1 + $0x128] sm:$0xff]  ;;  %v52_v39 = vld [vmem:[%s3676_s1 + $0xb8] sm:$0xff]  ;;  %v51_v41 = vld [vmem:[%s3676_s1 + $0xb0] sm:$0xff] }
   0xb   :  { %2075 = vmatprep.subr.bf16.mxu0 %v2870_v17  ;;  %v61_v43 = vld [vmem:[%s3676_s1 + $0x100] sm:$0xff]  ;;  %v2952_v45 = vpack.c.bf16 %v52_v39, %v48_v38  ;;  %v2955_v46 = vpack.c.bf16 %v66_v36, %v62_v35  ;;  %2105 = vmatpush1.bf16.msra.mxu1 %v2928_v37  ;;  %v70_v47 = vld [vmem:[%s3676_s1 + $0x148] sm:$0xff]  ;;  %v2961_v48 = vpack.c.bf16 %v51_v41, %v47_v40  ;;  %v56_v49 = vld [vmem:[%s3676_s1 + $0xd8] sm:$0xff] }
   0xc   :  { %v65_v44 = vld [vmem:[%s3676_s1 + $0x120] sm:$0xff]  ;;  %v60_v50 = vld [vmem:[%s3676_s1 + $0xf8] sm:$0xff]  ;;  %v74_v51 = vld [vmem:[%s3676_s1 + $0x168] sm:$0xff] }
   0xd   :  { %2107 = vmatprep.subr.bf16.mxu1 %v2952_v45  ;;  %v2973_v52 = vpack.c.bf16 %v60_v50, %v56_v49  ;;  %v55_v53 = vld [vmem:[%s3676_s1 + $0xd0] sm:$0xff]  ;;  %v2982_v55 = vpack.c.bf16 %v65_v44, %v61_v43  ;;  %v64_v56 = vld [vmem:[%s3676_s1 + $0x118] sm:$0xff]  ;;  %v2991_v58 = vpack.c.bf16 %v74_v51, %v70_v47  ;;  %v69_v59 = vld [vmem:[%s3676_s1 + $0x140] sm:$0xff] }
   0xe   :  { %2077 = vmatpush1.bf16.msra.mxu0 %v2895_v26  ;;  %v59_v54 = vld [vmem:[%s3676_s1 + $0xf0] sm:$0xff]  ;;  %v68_v57 = vld [vmem:[%s3676_s1 + $0x138] sm:$0xff]  ;;  %v73_v60 = vld [vmem:[%s3676_s1 + $0x160] sm:$0xff] }
   0xf   :  { %2079 = vmatprep.subr.bf16.mxu0 %v2908_v30  ;;  %2109 = vmatpush1.bf16.msra.mxu1 %v2961_v48  ;;  %v78_v61 = vld [vmem:[%s3676_s1 + $0x188] sm:$0xff]  ;;  %v3003_v62 = vpack.c.bf16 %v59_v54, %v55_v53  ;;  %v3009_v0 = vpack.c.bf16 %v68_v57, %v64_v56  ;;  %v63_v1 = vld [vmem:[%s3676_s1 + $0x110] sm:$0xff]  ;;  %v72_v5 = vld [vmem:[%s3676_s1 + $0x158] sm:$0xff]  ;;  %v3024_v7 = vpack.c.bf16 %v73_v60, %v69_v59 }
  0x10   :  { %v82_v63 = vld [vmem:[%s3676_s1 + $0x1a8] sm:$0xff]  ;;  %2111 = vmatprep.subr.bf16.mxu1 %v2973_v52  ;;  %v67_v2 = vld [vmem:[%s3676_s1 + $0x130] sm:$0xff]  ;;  %v76_v6 = vld [vmem:[%s3676_s1 + $0x178] sm:$0xff] }
  0x11   :  { %v3027_v10 = vpack.c.bf16 %v82_v63, %v78_v61  ;;  %v77_v11 = vld [vmem:[%s3676_s1 + $0x180] sm:$0xff]  ;;  %v86_v13 = vld [vmem:[%s3676_s1 + $0x1c8] sm:$0xff]  ;;  %v3039_v15 = vpack.c.bf16 %v67_v2, %v63_v1  ;;  %v3045_v18 = vpack.c.bf16 %v76_v6, %v72_v5  ;;  %v71_v19 = vld [vmem:[%s3676_s1 + $0x150] sm:$0xff] }
  0x12   :  { %2081 = vmatpush1.bf16.msra.mxu0 %v2944_v42  ;;  %v81_v12 = vld [vmem:[%s3676_s1 + $0x1a0] sm:$0xff]  ;;  %v90_v16 = vld [vmem:[%s3676_s1 + $0x1e8] sm:$0xff]  ;;  %v75_v20 = vld [vmem:[%s3676_s1 + $0x170] sm:$0xff] }
  0x13   :  { %2083 = vmatprep.subr.bf16.mxu0 %v2955_v46  ;;  %2113 = vmatpush1.bf16.msra.mxu1 %v3003_v62  ;;  %v80_v21 = vld [vmem:[%s3676_s1 + $0x198] sm:$0xff]  ;;  %v3060_v24 = vpack.c.bf16 %v81_v12, %v77_v11  ;;  %v3063_v27 = vpack.c.bf16 %v90_v16, %v86_v13  ;;  %v85_v28 = vld [vmem:[%s3676_s1 + $0x1c0] sm:$0xff]  ;;  %v3072_v31 = vpack.c.bf16 %v75_v20, %v71_v19  ;;  %v79_v34 = vld [vmem:[%s3676_s1 + $0x190] sm:$0xff] }
  0x14   :  { %2115 = vmatprep.subr.bf16.mxu1 %v3009_v0  ;;  %v84_v23 = vld [vmem:[%s3676_s1 + $0x1b8] sm:$0xff]  ;;  %v89_v29 = vld [vmem:[%s3676_s1 + $0x1e0] sm:$0xff]  ;;  %v83_v35 = vld [vmem:[%s3676_s1 + $0x1b0] sm:$0xff] }
  0x15   :  { %v3075_v32 = vpack.c.bf16 %v84_v23, %v80_v21  ;;  %v88_v36 = vld [vmem:[%s3676_s1 + $0x1d8] sm:$0xff]  ;;  %v3090_v39 = vpack.c.bf16 %v89_v29, %v85_v28  ;;  %v3094_v40 = vpack.c.bf16 %v83_v35, %v79_v34  ;;  %v87_v43 = vld [vmem:[%s3676_s1 + $0x1d0] sm:$0xff]  ;;  %v25_v49 = vld [vmem:[%s3677_s0] sm:$0xff] }
  0x16   :  { %2085 = vmatpush1.bf16.msra.mxu0 %v2982_v55  ;;  %v92_v38 = vld [vmem:[%s3676_s1 + $0x1f8] sm:$0xff]  ;;  %v91_v44 = vld [vmem:[%s3676_s1 + $0x1f0] sm:$0xff]  ;;  %v26_v50 = vld [vmem:[%s3677_s0 + $0x8] sm:$0xff] }
  0x17   :  { %2087 = vmatprep.subr.bf16.mxu0 %v2991_v58  ;;  %2117 = vmatpush1.bf16.msra.mxu1 %v3039_v15  ;;  %v3097_v41 = vpack.c.bf16 %v92_v38, %v88_v36  ;;  %v3107_v47 = vpack.c.bf16 %v91_v44, %v87_v43  ;;  %v28_v60 = vld [vmem:[%s3677_s0 + $0x18] sm:$0xff]  ;;  %v27_v2 = vld [vmem:[%s3677_s0 + $0x10] sm:$0xff]  ;;  %v1822_v44 = vld [vmem:[%s3677_s0 + $0x20] sm:$0xff] }
  0x18   :  { %2119 = vmatprep.subr.bf16.mxu1 %v3045_v18 }
  0x1a   :  { %2089 = vmatpush1.bf16.msra.mxu0 %v3024_v7 }
  0x1b   :  { %2091 = vmatprep.subr.bf16.mxu0 %v3027_v10  ;;  %2121 = vmatpush1.bf16.msra.mxu1 %v3072_v31 }
  0x1c   :  { %2123 = vmatprep.subr.bf16.mxu1 %v3075_v32 }
  0x1e   :  { %2093 = vmatpush1.bf16.msra.mxu0 %v3060_v24 }
  0x1f   :  { %2095 = vmatprep.subr.bf16.mxu0 %v3063_v27  ;;  %2125 = vmatpush1.bf16.msra.mxu1 %v3094_v40 }
  0x20   :  { %2127 = vmatprep.subr.bf16.mxu1 %v3097_v41 }
  0x22   :  { %2097 = vmatpush1.bf16.msra.mxu0 %v3090_v39 }
  0x23   :  { %2131 = vmatprep.subr.bf16.mxu0 %v2832_v4  ;;  %2129 = vmatpush1.bf16.msra.mxu1 %v3107_v47 }
  0x24   :  { %2163 = vmatprep.subr.bf16.mxu1 %v2884_v22 }
  0x25   :  { %158 = vmatmul.mubr.f32.vlgmr.msra.gmra.mrb[0].mxu0 %v2793_v3 }
  0x26   :  { %2133 = vmatpush1.bf16.msra.mxu0 %v2843_v8  ;;  %332 = vmatprep.mubr.f32.mxu0 %v2793_v3 }
  0x27   :  { %2135 = vmatprep.subr.bf16.mxu0 %v2845_v9  ;;  %229 = vmatmul.mubr.f32.vlgmr.msra.gmra.mrb[0].mxu1 %v2793_v3 }
  0x28   :  { %2165 = vmatpush1.bf16.msra.mxu1 %v2892_v25  ;;  %403 = vmatprep.mubr.f32.mxu1 %v2793_v3 }
  0x29   :  { %2167 = vmatprep.subr.bf16.mxu1 %v2917_v33 }
  0x2a   :  { %2137 = vmatpush1.bf16.msra.mxu0 %v2861_v14 }
  0x2b   :  { %2139 = vmatprep.subr.bf16.mxu0 %v2870_v17 }
  0x2c   :  { %2169 = vmatpush1.bf16.msra.mxu1 %v2928_v37 }
  0x2d   :  { %2171 = vmatprep.subr.bf16.mxu1 %v2952_v45 }
  0x2e   :  { %2141 = vmatpush1.bf16.msra.mxu0 %v2895_v26 }
  0x2f   :  { %2143 = vmatprep.subr.bf16.mxu0 %v2908_v30 }
  0x30   :  { %2173 = vmatpush1.bf16.msra.mxu1 %v2961_v48 }
  0x31   :  { %2175 = vmatprep.subr.bf16.mxu1 %v2973_v52 }
  0x32   :  { %2145 = vmatpush1.bf16.msra.mxu0 %v2944_v42 }
  0x33   :  { %2147 = vmatprep.subr.bf16.mxu0 %v2955_v46 }
  0x34   :  { %2177 = vmatpush1.bf16.msra.mxu1 %v3003_v62 }
  0x35   :  { %2179 = vmatprep.subr.bf16.mxu1 %v3009_v0 }
  0x36   :  { %2149 = vmatpush1.bf16.msra.mxu0 %v2982_v55 }
  0x37   :  { %2151 = vmatprep.subr.bf16.mxu0 %v2991_v58 }
  0x38   :  { %2181 = vmatpush1.bf16.msra.mxu1 %v3039_v15 }
  0x39   :  { %2183 = vmatprep.subr.bf16.mxu1 %v3045_v18 }
  0x3a   :  { %2153 = vmatpush1.bf16.msra.mxu0 %v3024_v7 }
  0x3b   :  { %2155 = vmatprep.subr.bf16.mxu0 %v3027_v10 }
  0x3c   :  { %2185 = vmatpush1.bf16.msra.mxu1 %v3072_v31 }
  0x3d   :  { %2187 = vmatprep.subr.bf16.mxu1 %v3075_v32 }
  0x3e   :  { %2157 = vmatpush1.bf16.msra.mxu0 %v3060_v24 }
  0x3f   :  { %2159 = vmatprep.subr.bf16.mxu0 %v3063_v27 }
  0x40   :  { %2189 = vmatpush1.bf16.msra.mxu1 %v3094_v40 }
  0x41   :  { %2191 = vmatprep.subr.bf16.mxu1 %v3097_v41 }
  0x42   :  { %2161 = vmatpush1.bf16.msra.mxu0 %v3090_v39 }
  0x43   :  { %2195 = vmatprep.subr.bf16.mxu0 %v2832_v4 }
  0x44   :  { %2193 = vmatpush1.bf16.msra.mxu1 %v3107_v47 }
  0x45   :  { %2227 = vmatprep.subr.bf16.mxu1 %v2884_v22 }
  0xf8   :  { %v159_v51 = vpop.f32.mrb[0].mxu0 }
  0xf9   :  { %v235_v53 = vadd.f32 %v159_v51, %v25_v49  ;;  %v161_v54 = vpop.f32.mrb[1].mxu0  ;;  %v1823_v49 = vld [vmem:[%s3677_s0 + $0x28] sm:$0xff] }
  0xfa   :  { %v236_v56 = vadd.f32 %v161_v54, %v26_v50  ;;  %v230_v61 = vpop.f32.mrb[0].mxu1 }
  0xfb   :  { %v1819_v57 = vmul.f32 -1.442695, %v235_v53  ;;  %v232_v63 = vpop.f32.mrb[1].mxu1  ;;  %v237_v6 = vadd.f32 %v230_v61, %v27_v2  ;;  %v1825_v61 = vld [vmem:[%s3677_s0 + $0x38] sm:$0xff] }
  0xfc   :  { %v1820_v59 = vmul.f32 -1.442695, %v236_v56  ;;  %v238_v1 = vadd.f32 %v232_v63, %v28_v60 }
  0xfd   :  { %2653 = vpow2.f32 %v1819_v57 }
  0xfe   :  { %2655 = vpow2.f32 %v1820_v59  ;;  %v1821_v5 = vmul.f32 -1.442695, %v238_v1  ;;  %v1824_v1 = vld [vmem:[%s3677_s0 + $0x30] sm:$0xff] }
 0x100   :  { %2657 = vpow2.f32 %v1821_v5 }
 0x101   :  { %2659 = vtanh.f32 %v237_v6 }
 0x107   :  { %v2654_v11 = vpop.eup %2653 }
 0x108   :  { %v2656_v12 = vpop.eup %2655  ;;  %v242_v13 = vadd.f32 1.0, %v2654_v11 }
 0x109   :  { %v248_v16 = vadd.f32 1.0, %v2656_v12 }
 0x10a   :  { %2661 = vrcp.f32 %v242_v13  ;;  %v2658_v19 = vpop.eup %2657 }
 0x10b   :  { %2663 = vrcp.f32 %v248_v16  ;;  %v2660_v20 = vpop.eup %2659  ;;  %v255_v23 = vadd.f32 1.0, %v2658_v19 }
 0x10d   :  { %2665 = vrcp.f32 %v255_v23 }
 0x114   :  { %v2662_v21 = vpop.eup %2661 }
 0x115   :  { %v2664_v28 = vpop.eup %2663  ;;  %v259_v29 = vmul.f32 %v2662_v21, %v2660_v20 }
 0x116   :  { %v258_v34 = vmul.f32 0.0, %v2664_v28 }
 0x117   :  { %v2666_v36 = vpop.eup %2665 }
 0x118   :  { %v3161_v35 = vadd.f32 %v259_v29, %v258_v34 }
 0x11a   :  { %2667 = vtanh.f32 %v3161_v35 }
 0x124   :  { %v2668_v38 = vpop.eup %2667 }
 0x125   :  { %v262_v43 = vmul.f32 %v2668_v38, %v2666_v36 }
 0x127   :  { %333 = vmatmul.mubr.f32.vlgmr.msra.gmra.mrb[2].mxu0 %v262_v43  ;;  %404 = vmatmul.mubr.f32.vlgmr.msra.gmra.mrb[2].mxu1 %v262_v43 }
 0x128   :  { %2197 = vmatpush1.bf16.msra.mxu0 %v2843_v8  ;;  %2229 = vmatpush1.bf16.msra.mxu1 %v2892_v25 }
 0x129   :  { %2199 = vmatprep.subr.bf16.mxu0 %v2845_v9  ;;  %2231 = vmatprep.subr.bf16.mxu1 %v2917_v33 }
 0x12a   :  { %507 = vmatprep.mubr.f32.mxu0 %v2793_v3  ;;  %578 = vmatprep.mubr.f32.mxu1 %v2793_v3 }
 0x12c   :  { %2201 = vmatpush1.bf16.msra.mxu0 %v2861_v14  ;;  %2233 = vmatpush1.bf16.msra.mxu1 %v2928_v37 }
 0x12d   :  { %2203 = vmatprep.subr.bf16.mxu0 %v2870_v17  ;;  %2235 = vmatprep.subr.bf16.mxu1 %v2952_v45 }
 0x130   :  { %2205 = vmatpush1.bf16.msra.mxu0 %v2895_v26  ;;  %2237 = vmatpush1.bf16.msra.mxu1 %v2961_v48 }
 0x131   :  { %2207 = vmatprep.subr.bf16.mxu0 %v2908_v30  ;;  %2239 = vmatprep.subr.bf16.mxu1 %v2973_v52 }
 0x134   :  { %2209 = vmatpush1.bf16.msra.mxu0 %v2944_v42  ;;  %2241 = vmatpush1.bf16.msra.mxu1 %v3003_v62 }
 0x135   :  { %2211 = vmatprep.subr.bf16.mxu0 %v2955_v46  ;;  %2243 = vmatprep.subr.bf16.mxu1 %v3009_v0 }
 0x138   :  { %2213 = vmatpush1.bf16.msra.mxu0 %v2982_v55  ;;  %2245 = vmatpush1.bf16.msra.mxu1 %v3039_v15 }
 0x139   :  { %2215 = vmatprep.subr.bf16.mxu0 %v2991_v58  ;;  %2247 = vmatprep.subr.bf16.mxu1 %v3045_v18 }
 0x13c   :  { %2217 = vmatpush1.bf16.msra.mxu0 %v3024_v7  ;;  %2249 = vmatpush1.bf16.msra.mxu1 %v3072_v31 }
 0x13d   :  { %2219 = vmatprep.subr.bf16.mxu0 %v3027_v10  ;;  %2251 = vmatprep.subr.bf16.mxu1 %v3075_v32 }
 0x140   :  { %2221 = vmatpush1.bf16.msra.mxu0 %v3060_v24  ;;  %2253 = vmatpush1.bf16.msra.mxu1 %v3094_v40 }
 0x141   :  { %2223 = vmatprep.subr.bf16.mxu0 %v3063_v27  ;;  %2255 = vmatprep.subr.bf16.mxu1 %v3097_v41 }
 0x144   :  { %2225 = vmatpush1.bf16.msra.mxu0 %v3090_v39  ;;  %2257 = vmatpush1.bf16.msra.mxu1 %v3107_v47 }
 0x145   :  { %2259 = vmatprep.subr.bf16.mxu0 %v2832_v4  ;;  %2291 = vmatprep.subr.bf16.mxu1 %v2884_v22 }
 0x1fa   :  { %v334_v50 = vpop.f32.mrb[2].mxu0  ;;  %v405_v51 = vpop.f32.mrb[2].mxu1 }
 0x1fb   :  { %v410_v53 = vadd.f32 %v1822_v44, %v334_v50  ;;  %v336_v54 = vpop.f32.mrb[3].mxu0  ;;  %v407_v56 = vpop.f32.mrb[3].mxu1  ;;  %v412_v5 = vadd.f32 %v1824_v1, %v405_v51  ;;  %v1830_v44 = vld [vmem:[%s3677_s0 + $0x48] sm:$0xff] }
 0x1fc   :  { %v411_v57 = vadd.f32 %v1823_v49, %v336_v54  ;;  %v413_v63 = vadd.f32 %v1825_v61, %v407_v56 }
 0x1fd   :  { %v1826_v59 = vmul.f32 -1.442695, %v410_v53 }
 0x1fe   :  { %v1827_v60 = vmul.f32 -1.442695, %v411_v57  ;;  %v1828_v2 = vmul.f32 -1.442695, %v413_v63  ;;  %v1831_v63 = vld [vmem:[%s3677_s0 + $0x50] sm:$0xff] }
 0x1ff   :  { %2669 = vpow2.f32 %v1826_v59 }
 0x200   :  { %2671 = vpow2.f32 %v1827_v60  ;;  %v1832_v60 = vld [vmem:[%s3677_s0 + $0x58] sm:$0xff] }
 0x201   :  { %2673 = vpow2.f32 %v1828_v2 }
 0x202   :  { %2675 = vtanh.f32 %v412_v5 }
 0x209   :  { %v2670_v6 = vpop.eup %2669 }
 0x20a   :  { %v2672_v11 = vpop.eup %2671  ;;  %v417_v12 = vadd.f32 1.0, %v2670_v6 }
 0x20b   :  { %v423_v13 = vadd.f32 1.0, %v2672_v11  ;;  %v2674_v16 = vpop.eup %2673 }
 0x20c   :  { %2677 = vrcp.f32 %v417_v12  ;;  %v2676_v19 = vpop.eup %2675  ;;  %v430_v28 = vadd.f32 1.0, %v2674_v16 }
 0x20d   :  { %2679 = vrcp.f32 %v423_v13 }
 0x20e   :  { %2681 = vrcp.f32 %v430_v28 }
 0x216   :  { %v2678_v20 = vpop.eup %2677 }
 0x217   :  { %v2680_v21 = vpop.eup %2679  ;;  %v434_v23 = vmul.f32 %v2678_v20, %v2676_v19 }
 0x218   :  { %v433_v29 = vmul.f32 %v2680_v21, %v3161_v35  ;;  %v2682_v36 = vpop.eup %2681  ;;  %v1829_v35 = vld [vmem:[%s3677_s0 + $0x40] sm:$0xff] }
 0x21a   :  { %v3211_v34 = vadd.f32 %v434_v23, %v433_v29 }
 0x21c   :  { %2683 = vtanh.f32 %v3211_v34 }
 0x226   :  { %v2684_v38 = vpop.eup %2683 }
 0x227   :  { %v437_v43 = vmul.f32 %v2684_v38, %v2682_v36 }
 0x229   :  { %508 = vmatmul.mubr.f32.vlgmr.msra.gmra.mrb[4].mxu0 %v437_v43  ;;  %579 = vmatmul.mubr.f32.vlgmr.msra.gmra.mrb[4].mxu1 %v437_v43 }
 0x22a   :  { %2261 = vmatpush1.bf16.msra.mxu0 %v2843_v8  ;;  %2293 = vmatpush1.bf16.msra.mxu1 %v2892_v25 }
 0x22b   :  { %2263 = vmatprep.subr.bf16.mxu0 %v2845_v9  ;;  %2295 = vmatprep.subr.bf16.mxu1 %v2917_v33 }
 0x22c   :  { %682 = vmatprep.mubr.f32.mxu0 %v2793_v3  ;;  %753 = vmatprep.mubr.f32.mxu1 %v2793_v3 }
 0x22e   :  { %2265 = vmatpush1.bf16.msra.mxu0 %v2861_v14  ;;  %2297 = vmatpush1.bf16.msra.mxu1 %v2928_v37 }
 0x22f   :  { %2267 = vmatprep.subr.bf16.mxu0 %v2870_v17  ;;  %2299 = vmatprep.subr.bf16.mxu1 %v2952_v45 }
 0x232   :  { %2269 = vmatpush1.bf16.msra.mxu0 %v2895_v26  ;;  %2301 = vmatpush1.bf16.msra.mxu1 %v2961_v48 }
 0x233   :  { %2271 = vmatprep.subr.bf16.mxu0 %v2908_v30  ;;  %2303 = vmatprep.subr.bf16.mxu1 %v2973_v52 }
 0x236   :  { %2273 = vmatpush1.bf16.msra.mxu0 %v2944_v42  ;;  %2305 = vmatpush1.bf16.msra.mxu1 %v3003_v62 }
 0x237   :  { %2275 = vmatprep.subr.bf16.mxu0 %v2955_v46  ;;  %2307 = vmatprep.subr.bf16.mxu1 %v3009_v0 }
 0x23a   :  { %2277 = vmatpush1.bf16.msra.mxu0 %v2982_v55  ;;  %2309 = vmatpush1.bf16.msra.mxu1 %v3039_v15 }
 0x23b   :  { %2279 = vmatprep.subr.bf16.mxu0 %v2991_v58  ;;  %2311 = vmatprep.subr.bf16.mxu1 %v3045_v18 }
 0x23e   :  { %2281 = vmatpush1.bf16.msra.mxu0 %v3024_v7  ;;  %2313 = vmatpush1.bf16.msra.mxu1 %v3072_v31 }
 0x23f   :  { %2283 = vmatprep.subr.bf16.mxu0 %v3027_v10  ;;  %2315 = vmatprep.subr.bf16.mxu1 %v3075_v32 }
 0x242   :  { %2285 = vmatpush1.bf16.msra.mxu0 %v3060_v24  ;;  %2317 = vmatpush1.bf16.msra.mxu1 %v3094_v40 }
 0x243   :  { %2287 = vmatprep.subr.bf16.mxu0 %v3063_v27  ;;  %2319 = vmatprep.subr.bf16.mxu1 %v3097_v41 }
 0x246   :  { %2289 = vmatpush1.bf16.msra.mxu0 %v3090_v39  ;;  %2321 = vmatpush1.bf16.msra.mxu1 %v3107_v47 }
 0x247   :  { %2323 = vmatprep.subr.bf16.mxu0 %v2832_v4  ;;  %2355 = vmatprep.subr.bf16.mxu1 %v2884_v22 }
 0x2fc   :  { %v509_v49 = vpop.f32.mrb[4].mxu0  ;;  %v580_v50 = vpop.f32.mrb[4].mxu1 }
 0x2fd   :  { %v585_v51 = vadd.f32 %v1829_v35, %v509_v49  ;;  %v511_v53 = vpop.f32.mrb[5].mxu0  ;;  %v582_v54 = vpop.f32.mrb[5].mxu1  ;;  %v587_v2 = vadd.f32 %v1831_v63, %v580_v50  ;;  %v1837_v35 = vld [vmem:[%s3677_s0 + $0x68] sm:$0xff] }
 0x2fe   :  { %v586_v56 = vadd.f32 %v1830_v44, %v511_v53  ;;  %v588_v61 = vadd.f32 %v1832_v60, %v582_v54 }
 0x2ff   :  { %v1833_v57 = vmul.f32 -1.442695, %v585_v51 }
 0x300   :  { %v1834_v59 = vmul.f32 -1.442695, %v586_v56  ;;  %v1835_v1 = vmul.f32 -1.442695, %v588_v61  ;;  %v1838_v61 = vld [vmem:[%s3677_s0 + $0x70] sm:$0xff] }
 0x301   :  { %2685 = vpow2.f32 %v1833_v57 }
 0x302   :  { %2687 = vpow2.f32 %v1834_v59  ;;  %v1839_v59 = vld [vmem:[%s3677_s0 + $0x78] sm:$0xff] }
 0x303   :  { %2689 = vpow2.f32 %v1835_v1 }
 0x304   :  { %2691 = vtanh.f32 %v587_v2 }
 0x30b   :  { %v2686_v5 = vpop.eup %2685 }
 0x30c   :  { %v2688_v6 = vpop.eup %2687  ;;  %v592_v11 = vadd.f32 1.0, %v2686_v5 }
 0x30d   :  { %v598_v12 = vadd.f32 1.0, %v2688_v6  ;;  %v2690_v13 = vpop.eup %2689 }
 0x30e   :  { %2693 = vrcp.f32 %v592_v11  ;;  %v2692_v16 = vpop.eup %2691  ;;  %v605_v23 = vadd.f32 1.0, %v2690_v13 }
 0x30f   :  { %2695 = vrcp.f32 %v598_v12 }
 0x310   :  { %2697 = vrcp.f32 %v605_v23 }
 0x318   :  { %v2694_v19 = vpop.eup %2693 }
 0x319   :  { %v2696_v20 = vpop.eup %2695  ;;  %v609_v21 = vmul.f32 %v2694_v19, %v2692_v16 }
 0x31a   :  { %v608_v28 = vmul.f32 %v2696_v20, %v3211_v34  ;;  %v2698_v36 = vpop.eup %2697  ;;  %v1836_v34 = vld [vmem:[%s3677_s0 + $0x60] sm:$0xff] }
 0x31c   :  { %v3261_v29 = vadd.f32 %v609_v21, %v608_v28 }
 0x31e   :  { %2699 = vtanh.f32 %v3261_v29 }
 0x328   :  { %v2700_v38 = vpop.eup %2699 }
 0x329   :  { %v612_v43 = vmul.f32 %v2700_v38, %v2698_v36 }
 0x32b   :  { %683 = vmatmul.mubr.f32.vlgmr.msra.gmra.mrb[6].mxu0 %v612_v43  ;;  %754 = vmatmul.mubr.f32.vlgmr.msra.gmra.mrb[6].mxu1 %v612_v43 }
 0x32c   :  { %2325 = vmatpush1.bf16.msra.mxu0 %v2843_v8  ;;  %2357 = vmatpush1.bf16.msra.mxu1 %v2892_v25 }
 0x32d   :  { %2327 = vmatprep.subr.bf16.mxu0 %v2845_v9  ;;  %2359 = vmatprep.subr.bf16.mxu1 %v2917_v33 }
 0x32e   :  { %857 = vmatprep.mubr.f32.mxu0 %v2793_v3  ;;  %928 = vmatprep.mubr.f32.mxu1 %v2793_v3 }
 0x330   :  { %2329 = vmatpush1.bf16.msra.mxu0 %v2861_v14  ;;  %2361 = vmatpush1.bf16.msra.mxu1 %v2928_v37 }
 0x331   :  { %2331 = vmatprep.subr.bf16.mxu0 %v2870_v17  ;;  %2363 = vmatprep.subr.bf16.mxu1 %v2952_v45 }
 0x334   :  { %2333 = vmatpush1.bf16.msra.mxu0 %v2895_v26  ;;  %2365 = vmatpush1.bf16.msra.mxu1 %v2961_v48 }
 0x335   :  { %2335 = vmatprep.subr.bf16.mxu0 %v2908_v30  ;;  %2367 = vmatprep.subr.bf16.mxu1 %v2973_v52 }
 0x338   :  { %2337 = vmatpush1.bf16.msra.mxu0 %v2944_v42  ;;  %2369 = vmatpush1.bf16.msra.mxu1 %v3003_v62 }
 0x339   :  { %2339 = vmatprep.subr.bf16.mxu0 %v2955_v46  ;;  %2371 = vmatprep.subr.bf16.mxu1 %v3009_v0 }
 0x33c   :  { %2341 = vmatpush1.bf16.msra.mxu0 %v2982_v55  ;;  %2373 = vmatpush1.bf16.msra.mxu1 %v3039_v15 }
 0x33d   :  { %2343 = vmatprep.subr.bf16.mxu0 %v2991_v58  ;;  %2375 = vmatprep.subr.bf16.mxu1 %v3045_v18 }
 0x340   :  { %2345 = vmatpush1.bf16.msra.mxu0 %v3024_v7  ;;  %2377 = vmatpush1.bf16.msra.mxu1 %v3072_v31 }
 0x341   :  { %2347 = vmatprep.subr.bf16.mxu0 %v3027_v10  ;;  %2379 = vmatprep.subr.bf16.mxu1 %v3075_v32 }
 0x344   :  { %2349 = vmatpush1.bf16.msra.mxu0 %v3060_v24  ;;  %2381 = vmatpush1.bf16.msra.mxu1 %v3094_v40 }
 0x345   :  { %2351 = vmatprep.subr.bf16.mxu0 %v3063_v27  ;;  %2383 = vmatprep.subr.bf16.mxu1 %v3097_v41 }
 0x348   :  { %2353 = vmatpush1.bf16.msra.mxu0 %v3090_v39  ;;  %2385 = vmatpush1.bf16.msra.mxu1 %v3107_v47 }
 0x349   :  { %2387 = vmatprep.subr.bf16.mxu0 %v2832_v4  ;;  %2419 = vmatprep.subr.bf16.mxu1 %v2884_v22 }
 0x3fe   :  { %v684_v44 = vpop.f32.mrb[6].mxu0  ;;  %v755_v49 = vpop.f32.mrb[6].mxu1 }
 0x3ff   :  { %v760_v50 = vadd.f32 %v1836_v34, %v684_v44  ;;  %v686_v51 = vpop.f32.mrb[7].mxu0  ;;  %v757_v53 = vpop.f32.mrb[7].mxu1  ;;  %v762_v1 = vadd.f32 %v1838_v61, %v755_v49  ;;  %v1844_v34 = vld [vmem:[%s3677_s0 + $0x88] sm:$0xff] }
 0x400   :  { %v761_v54 = vadd.f32 %v1837_v35, %v686_v51  ;;  %v763_v60 = vadd.f32 %v1839_v59, %v757_v53 }
 0x401   :  { %v1840_v56 = vmul.f32 -1.442695, %v760_v50 }
 0x402   :  { %v1841_v57 = vmul.f32 -1.442695, %v761_v54  ;;  %v1842_v63 = vmul.f32 -1.442695, %v763_v60  ;;  %v1845_v60 = vld [vmem:[%s3677_s0 + $0x90] sm:$0xff] }
 0x403   :  { %2701 = vpow2.f32 %v1840_v56 }
 0x404   :  { %2703 = vpow2.f32 %v1841_v57  ;;  %v1846_v57 = vld [vmem:[%s3677_s0 + $0x98] sm:$0xff] }
 0x405   :  { %2705 = vpow2.f32 %v1842_v63 }
 0x406   :  { %2707 = vtanh.f32 %v762_v1 }
 0x40d   :  { %v2702_v2 = vpop.eup %2701 }
 0x40e   :  { %v2704_v5 = vpop.eup %2703  ;;  %v767_v6 = vadd.f32 1.0, %v2702_v2 }
 0x40f   :  { %v773_v11 = vadd.f32 1.0, %v2704_v5  ;;  %v2706_v12 = vpop.eup %2705 }
 0x410   :  { %2709 = vrcp.f32 %v767_v6  ;;  %v2708_v13 = vpop.eup %2707  ;;  %v780_v21 = vadd.f32 1.0, %v2706_v12 }
 0x411   :  { %2711 = vrcp.f32 %v773_v11 }
 0x412   :  { %2713 = vrcp.f32 %v780_v21 }
 0x41a   :  { %v2710_v16 = vpop.eup %2709 }
 0x41b   :  { %v2712_v19 = vpop.eup %2711  ;;  %v784_v20 = vmul.f32 %v2710_v16, %v2708_v13 }
 0x41c   :  { %v783_v23 = vmul.f32 %v2712_v19, %v3261_v29  ;;  %v2714_v36 = vpop.eup %2713  ;;  %v1843_v29 = vld [vmem:[%s3677_s0 + $0x80] sm:$0xff] }
 0x41e   :  { %v3311_v28 = vadd.f32 %v784_v20, %v783_v23 }
 0x420   :  { %2715 = vtanh.f32 %v3311_v28 }
 0x42a   :  { %v2716_v38 = vpop.eup %2715 }
 0x42b   :  { %v787_v43 = vmul.f32 %v2716_v38, %v2714_v36 }
 0x42d   :  { %858 = vmatmul.mubr.f32.vlgmr.msra.gmra.mrb[8].mxu0 %v787_v43  ;;  %929 = vmatmul.mubr.f32.vlgmr.msra.gmra.mrb[8].mxu1 %v787_v43 }
 0x42e   :  { %2389 = vmatpush1.bf16.msra.mxu0 %v2843_v8  ;;  %2421 = vmatpush1.bf16.msra.mxu1 %v2892_v25 }
 0x42f   :  { %2391 = vmatprep.subr.bf16.mxu0 %v2845_v9  ;;  %2423 = vmatprep.subr.bf16.mxu1 %v2917_v33 }
 0x430   :  { %1032 = vmatprep.mubr.f32.mxu0 %v2793_v3  ;;  %1103 = vmatprep.mubr.f32.mxu1 %v2793_v3 }
 0x432   :  { %2393 = vmatpush1.bf16.msra.mxu0 %v2861_v14  ;;  %2425 = vmatpush1.bf16.msra.mxu1 %v2928_v37 }
 0x433   :  { %2395 = vmatprep.subr.bf16.mxu0 %v2870_v17  ;;  %2427 = vmatprep.subr.bf16.mxu1 %v2952_v45 }
 0x436   :  { %2397 = vmatpush1.bf16.msra.mxu0 %v2895_v26  ;;  %2429 = vmatpush1.bf16.msra.mxu1 %v2961_v48 }
 0x437   :  { %2399 = vmatprep.subr.bf16.mxu0 %v2908_v30  ;;  %2431 = vmatprep.subr.bf16.mxu1 %v2973_v52 }
 0x43a   :  { %2401 = vmatpush1.bf16.msra.mxu0 %v2944_v42  ;;  %2433 = vmatpush1.bf16.msra.mxu1 %v3003_v62 }
 0x43b   :  { %2403 = vmatprep.subr.bf16.mxu0 %v2955_v46  ;;  %2435 = vmatprep.subr.bf16.mxu1 %v3009_v0 }
 0x43e   :  { %2405 = vmatpush1.bf16.msra.mxu0 %v2982_v55  ;;  %2437 = vmatpush1.bf16.msra.mxu1 %v3039_v15 }
 0x43f   :  { %2407 = vmatprep.subr.bf16.mxu0 %v2991_v58  ;;  %2439 = vmatprep.subr.bf16.mxu1 %v3045_v18 }
 0x442   :  { %2409 = vmatpush1.bf16.msra.mxu0 %v3024_v7  ;;  %2441 = vmatpush1.bf16.msra.mxu1 %v3072_v31 }
 0x443   :  { %2411 = vmatprep.subr.bf16.mxu0 %v3027_v10  ;;  %2443 = vmatprep.subr.bf16.mxu1 %v3075_v32 }
 0x446   :  { %2413 = vmatpush1.bf16.msra.mxu0 %v3060_v24  ;;  %2445 = vmatpush1.bf16.msra.mxu1 %v3094_v40 }
 0x447   :  { %2415 = vmatprep.subr.bf16.mxu0 %v3063_v27  ;;  %2447 = vmatprep.subr.bf16.mxu1 %v3097_v41 }
 0x44a   :  { %2417 = vmatpush1.bf16.msra.mxu0 %v3090_v39  ;;  %2449 = vmatpush1.bf16.msra.mxu1 %v3107_v47 }
 0x44b   :  { %2451 = vmatprep.subr.bf16.mxu0 %v2832_v4  ;;  %2483 = vmatprep.subr.bf16.mxu1 %v2884_v22 }
 0x500   :  { %v859_v35 = vpop.f32.mrb[8].mxu0  ;;  %v930_v44 = vpop.f32.mrb[8].mxu1 }
 0x501   :  { %v935_v49 = vadd.f32 %v1843_v29, %v859_v35  ;;  %v861_v50 = vpop.f32.mrb[9].mxu0  ;;  %v932_v51 = vpop.f32.mrb[9].mxu1  ;;  %v937_v63 = vadd.f32 %v1845_v60, %v930_v44  ;;  %v1851_v29 = vld [vmem:[%s3677_s0 + $0xa8] sm:$0xff] }
 0x502   :  { %v936_v53 = vadd.f32 %v1844_v34, %v861_v50  ;;  %v938_v59 = vadd.f32 %v1846_v57, %v932_v51 }
 0x503   :  { %v1847_v54 = vmul.f32 -1.442695, %v935_v49 }
 0x504   :  { %v1848_v56 = vmul.f32 -1.442695, %v936_v53  ;;  %v1849_v61 = vmul.f32 -1.442695, %v938_v59 }
 0x505   :  { %2717 = vpow2.f32 %v1847_v54 }
 0x506   :  { %2719 = vpow2.f32 %v1848_v56  ;;  %v1852_v56 = vld [vmem:[%s3677_s0 + $0xb0] sm:$0xff] }
 0x507   :  { %2721 = vpow2.f32 %v1849_v61 }
 0x508   :  { %2723 = vtanh.f32 %v937_v63 }
 0x50f   :  { %v2718_v1 = vpop.eup %2717 }
 0x510   :  { %v2720_v2 = vpop.eup %2719  ;;  %v942_v5 = vadd.f32 1.0, %v2718_v1 }
 0x511   :  { %v948_v6 = vadd.f32 1.0, %v2720_v2  ;;  %v2722_v11 = vpop.eup %2721 }
 0x512   :  { %2725 = vrcp.f32 %v942_v5  ;;  %v2724_v12 = vpop.eup %2723  ;;  %v955_v20 = vadd.f32 1.0, %v2722_v11 }
 0x513   :  { %2727 = vrcp.f32 %v948_v6 }
 0x514   :  { %2729 = vrcp.f32 %v955_v20 }
 0x51c   :  { %v2726_v13 = vpop.eup %2725 }
 0x51d   :  { %v2728_v16 = vpop.eup %2727  ;;  %v959_v19 = vmul.f32 %v2726_v13, %v2724_v12 }
 0x51e   :  { %v958_v21 = vmul.f32 %v2728_v16, %v3311_v28  ;;  %v2730_v36 = vpop.eup %2729  ;;  %v1850_v28 = vld [vmem:[%s3677_s0 + $0xa0] sm:$0xff] }
 0x520   :  { %v3361_v23 = vadd.f32 %v959_v19, %v958_v21 }
 0x522   :  { %2731 = vtanh.f32 %v3361_v23 }
 0x52c   :  { %v2732_v38 = vpop.eup %2731 }
 0x52d   :  { %v962_v43 = vmul.f32 %v2732_v38, %v2730_v36  ;;  %v1494_v38 = vld [vmem:[%s3678_s2 + $0x8] sm:$0xff] }
 0x52f   :  { %1033 = vmatmul.mubr.f32.vlgmr.msra.gmra.mrb[10].mxu0 %v962_v43  ;;  %1104 = vmatmul.mubr.f32.vlgmr.msra.gmra.mrb[10].mxu1 %v962_v43 }
 0x530   :  { %2453 = vmatpush1.bf16.msra.mxu0 %v2843_v8  ;;  %2485 = vmatpush1.bf16.msra.mxu1 %v2892_v25 }
 0x531   :  { %2455 = vmatprep.subr.bf16.mxu0 %v2845_v9  ;;  %2487 = vmatprep.subr.bf16.mxu1 %v2917_v33 }
 0x532   :  { %1207 = vmatprep.mubr.f32.mxu0 %v2793_v3  ;;  %1278 = vmatprep.mubr.f32.mxu1 %v2793_v3 }
 0x534   :  { %2457 = vmatpush1.bf16.msra.mxu0 %v2861_v14  ;;  %2489 = vmatpush1.bf16.msra.mxu1 %v2928_v37 }
 0x535   :  { %2459 = vmatprep.subr.bf16.mxu0 %v2870_v17  ;;  %2491 = vmatprep.subr.bf16.mxu1 %v2952_v45 }
 0x538   :  { %2461 = vmatpush1.bf16.msra.mxu0 %v2895_v26  ;;  %2493 = vmatpush1.bf16.msra.mxu1 %v2961_v48 }
 0x539   :  { %2463 = vmatprep.subr.bf16.mxu0 %v2908_v30  ;;  %2495 = vmatprep.subr.bf16.mxu1 %v2973_v52 }
 0x53c   :  { %2465 = vmatpush1.bf16.msra.mxu0 %v2944_v42  ;;  %2497 = vmatpush1.bf16.msra.mxu1 %v3003_v62 }
 0x53d   :  { %2467 = vmatprep.subr.bf16.mxu0 %v2955_v46  ;;  %2499 = vmatprep.subr.bf16.mxu1 %v3009_v0 }
 0x540   :  { %2469 = vmatpush1.bf16.msra.mxu0 %v2982_v55  ;;  %2501 = vmatpush1.bf16.msra.mxu1 %v3039_v15 }
 0x541   :  { %2471 = vmatprep.subr.bf16.mxu0 %v2991_v58  ;;  %2503 = vmatprep.subr.bf16.mxu1 %v3045_v18 }
 0x544   :  { %2473 = vmatpush1.bf16.msra.mxu0 %v3024_v7  ;;  %2505 = vmatpush1.bf16.msra.mxu1 %v3072_v31 }
 0x545   :  { %2475 = vmatprep.subr.bf16.mxu0 %v3027_v10  ;;  %2507 = vmatprep.subr.bf16.mxu1 %v3075_v32 }
 0x548   :  { %2477 = vmatpush1.bf16.msra.mxu0 %v3060_v24  ;;  %2509 = vmatpush1.bf16.msra.mxu1 %v3094_v40 }
 0x549   :  { %2479 = vmatprep.subr.bf16.mxu0 %v3063_v27  ;;  %2511 = vmatprep.subr.bf16.mxu1 %v3097_v41 }
 0x54c   :  { %2481 = vmatpush1.bf16.msra.mxu0 %v3090_v39  ;;  %2513 = vmatpush1.bf16.msra.mxu1 %v3107_v47 }
 0x54d   :  { %2515 = vmatprep.subr.bf16.mxu0 %v2832_v4  ;;  %2547 = vmatprep.subr.bf16.mxu1 %v2884_v22  ;;  %v1853_v4 = vld [vmem:[%s3677_s0 + $0xb8] sm:$0xff] }
 0x602   :  { %v1034_v34 = vpop.f32.mrb[10].mxu0  ;;  %v1105_v35 = vpop.f32.mrb[10].mxu1 }
 0x603   :  { %v1110_v44 = vadd.f32 %v1850_v28, %v1034_v34  ;;  %v1036_v49 = vpop.f32.mrb[11].mxu0  ;;  %v1107_v50 = vpop.f32.mrb[11].mxu1  ;;  %v1112_v59 = vadd.f32 %v1852_v56, %v1105_v35  ;;  %v1872_v28 = vld [vmem:[%s3678_s2 + $0x80] sm:$0xff]  ;;  %v2794_v34 = vmov 0.0|0.0  }
 0x604   :  { %v1111_v51 = vadd.f32 %v1851_v29, %v1036_v49  ;;  %v1113_v22 = vadd.f32 %v1853_v4, %v1107_v50  ;;  %v1873_v29 = vld [vmem:[%s3678_s2 + $0x88] sm:$0xff]  ;;  %v1496_v49 = vld [vmem:[%s3678_s2 + $0x18] sm:$0xff]  ;;  %v1497_v4 = vld [vmem:[%s3678_s2 + $0x20] sm:$0xff] }
 0x605   :  { %v1854_v53 = vmul.f32 -1.442695, %v1110_v44  ;;  %v2603_v35 = vpack.c.bf16 %v1873_v29, %v1872_v28  ;;  %v1495_v44 = vld [vmem:[%s3678_s2 + $0x10] sm:$0xff] }
 0x606   :  { %v1855_v54 = vmul.f32 -1.442695, %v1111_v51  ;;  %v1856_v57 = vmul.f32 -1.442695, %v1113_v22  ;;  %v2582_v50 = vpack.c.bf16 %v1496_v49, %v1495_v44  ;;  %v1874_v51 = vld [vmem:[%s3678_s2 + $0x90] sm:$0xff]  ;;  %v1498_v22 = vld [vmem:[%s3678_s2 + $0x28] sm:$0xff] }
 0x607   :  { %2733 = vpow2.f32 %v1854_v53  ;;  %v1875_v53 = vld [vmem:[%s3678_s2 + $0x98] sm:$0xff]  ;;  %v2585_v56 = vpack.c.bf16 %v1498_v22, %v1497_v4 }
 0x608   :  { %2735 = vpow2.f32 %v1855_v54  ;;  %v2606_v54 = vpack.c.bf16 %v1875_v53, %v1874_v51 }
 0x609   :  { %2737 = vpow2.f32 %v1856_v57  ;;  %v1876_v57 = vld [vmem:[%s3678_s2 + $0xa0] sm:$0xff] }
 0x60a   :  { %2739 = vtanh.f32 %v1112_v59  ;;  %v1877_v59 = vld [vmem:[%s3678_s2 + $0xa8] sm:$0xff] }
 0x611   :  { %v2734_v60 = vpop.eup %2733 }
 0x612   :  { %v2736_v61 = vpop.eup %2735  ;;  %v1117_v63 = vadd.f32 1.0, %v2734_v60  ;;  %v2609_v60 = vpack.c.bf16 %v1877_v59, %v1876_v57  ;;  %v1892_v57 = vld [vmem:[%s3678_s2 + $0x108] sm:$0xff] }
 0x613   :  { %v1123_v1 = vadd.f32 1.0, %v2736_v61  ;;  %v2738_v2 = vpop.eup %2737  ;;  %v1499_v61 = vld [vmem:[%s3678_s2 + $0x30] sm:$0xff] }
 0x614   :  { %2741 = vrcp.f32 %v1117_v63  ;;  %v2740_v5 = vpop.eup %2739  ;;  %v1130_v13 = vadd.f32 1.0, %v2738_v2  ;;  %v1500_v63 = vld [vmem:[%s3678_s2 + $0x38] sm:$0xff]  ;;  %v1878_v2 = vld [vmem:[%s3678_s2 + $0xb0] sm:$0xff] }
 0x615   :  { %2743 = vrcp.f32 %v1123_v1  ;;  %v2588_v1 = vpack.c.bf16 %v1500_v63, %v1499_v61 }
 0x616   :  { %2745 = vrcp.f32 %v1130_v13 }
 0x61e   :  { %v2742_v6 = vpop.eup %2741 }
 0x61f   :  { %v2744_v11 = vpop.eup %2743  ;;  %v1134_v12 = vmul.f32 %v2742_v6, %v2740_v5  ;;  %v1879_v5 = vld [vmem:[%s3678_s2 + $0xb8] sm:$0xff] }
 0x620   :  { %v1133_v16 = vmul.f32 %v2744_v11, %v3361_v23  ;;  %v2746_v20 = vpop.eup %2745  ;;  %v1493_v23 = vld [vmem:[%s3678_s2] sm:$0xff]  ;;  %v2612_v6 = vpack.c.bf16 %v1879_v5, %v1878_v2 }
 0x621   :  { %v2579_v43 = vpack.c.bf16 %v1494_v38, %v1493_v23  ;;  %v1501_v11 = vld [vmem:[%s3678_s2 + $0x40] sm:$0xff] }
 0x622   :  { %v3411_v19 = vadd.f32 %v1134_v12, %v1133_v16  ;;  %v1502_v12 = vld [vmem:[%s3678_s2 + $0x48] sm:$0xff]  ;;  %v1880_v16 = vld [vmem:[%s3678_s2 + $0xc0] sm:$0xff] }
 0x623   :  { %v2591_v13 = vpack.c.bf16 %v1502_v12, %v1501_v11  ;;  %v1895_v5 = vld [vmem:[%s3678_s2 + $0x120] sm:$0xff]  ;;  %v1897_v12 = vld [vmem:[%s3678_s2 + $0x130] sm:$0xff] }
 0x624   :  { %2747 = vtanh.f32 %v3411_v19 }
 0x62e   :  { %v2748_v21 = vpop.eup %2747 }
 0x62f   :  { %v1137_v36 = vmul.f32 %v2748_v21, %v2746_v20  ;;  %v1503_v21 = vld [vmem:[%s3678_s2 + $0x50] sm:$0xff] }
 0x631   :  { %1208 = vmatmul.mubr.f32.vlgmr.msra.gmra.mrb[12].mxu0 %v1137_v36  ;;  %1279 = vmatmul.mubr.f32.vlgmr.msra.gmra.mrb[12].mxu1 %v1137_v36  ;;  %v1504_v36 = vld [vmem:[%s3678_s2 + $0x58] sm:$0xff] }
 0x632   :  { %2517 = vmatpush1.bf16.msra.mxu0 %v2843_v8  ;;  %2549 = vmatpush1.bf16.msra.mxu1 %v2892_v25  ;;  %v1857_v8 = vld [vmem:[%s3677_s0 + $0xc0] sm:$0xff] }
 0x633   :  { %2519 = vmatprep.subr.bf16.mxu0 %v2845_v9  ;;  %2551 = vmatprep.subr.bf16.mxu1 %v2917_v33  ;;  %v1858_v9 = vld [vmem:[%s3677_s0 + $0xc8] sm:$0xff] }
 0x634   :  { %1382 = vmatprep.mubr.f32.mxu0 %v2793_v3  ;;  %1453 = vmatprep.mubr.f32.mxu1 %v2793_v3 }
 0x636   :  { %2521 = vmatpush1.bf16.msra.mxu0 %v2861_v14  ;;  %2553 = vmatpush1.bf16.msra.mxu1 %v2928_v37 }
 0x637   :  { %2523 = vmatprep.subr.bf16.mxu0 %v2870_v17  ;;  %2555 = vmatprep.subr.bf16.mxu1 %v2952_v45  ;;  %v1860_v45 = vld [vmem:[%s3677_s0 + $0xd8] sm:$0xff] }
 0x63a   :  { %2525 = vmatpush1.bf16.msra.mxu0 %v2895_v26  ;;  %2557 = vmatpush1.bf16.msra.mxu1 %v2961_v48  ;;  %v1859_v48 = vld [vmem:[%s3677_s0 + $0xd0] sm:$0xff] }
 0x63b   :  { %2527 = vmatprep.subr.bf16.mxu0 %v2908_v30  ;;  %2559 = vmatprep.subr.bf16.mxu1 %v2973_v52 }
 0x63e   :  { %2529 = vmatpush1.bf16.msra.mxu0 %v2944_v42  ;;  %2561 = vmatpush1.bf16.msra.mxu1 %v3003_v62 }
 0x63f   :  { %2531 = vmatprep.subr.bf16.mxu0 %v2955_v46  ;;  %2563 = vmatprep.subr.bf16.mxu1 %v3009_v0 }
 0x642   :  { %2533 = vmatpush1.bf16.msra.mxu0 %v2982_v55  ;;  %2565 = vmatpush1.bf16.msra.mxu1 %v3039_v15 }
 0x643   :  { %2535 = vmatprep.subr.bf16.mxu0 %v2991_v58  ;;  %2567 = vmatprep.subr.bf16.mxu1 %v3045_v18 }
 0x646   :  { %2537 = vmatpush1.bf16.msra.mxu0 %v3024_v7  ;;  %2569 = vmatpush1.bf16.msra.mxu1 %v3072_v31 }
 0x647   :  { %2539 = vmatprep.subr.bf16.mxu0 %v3027_v10  ;;  %2571 = vmatprep.subr.bf16.mxu1 %v3075_v32 }
 0x64a   :  { %2541 = vmatpush1.bf16.msra.mxu0 %v3060_v24  ;;  %2573 = vmatpush1.bf16.msra.mxu1 %v3094_v40 }
 0x64b   :  { %2543 = vmatprep.subr.bf16.mxu0 %v3063_v27  ;;  %2575 = vmatprep.subr.bf16.mxu1 %v3097_v41 }
 0x64e   :  { %2545 = vmatpush1.bf16.msra.mxu0 %v3090_v39  ;;  %2577 = vmatpush1.bf16.msra.mxu1 %v3107_v47 }
 0x64f   :  { %2578 = vmatprep.subr.bf16.mxu0 %v2794_v34  ;;  %2602 = vmatprep.subr.bf16.mxu1 %v2794_v34 }
 0x704   :  { %v1209_v14 = vpop.f32.mrb[12].mxu0  ;;  %v1280_v17 = vpop.f32.mrb[12].mxu1 }
 0x705   :  { %v1285_v25 = vadd.f32 %v1857_v8, %v1209_v14  ;;  %v1211_v26 = vpop.f32.mrb[13].mxu0  ;;  %v1282_v30 = vpop.f32.mrb[13].mxu1  ;;  %v1287_v55 = vadd.f32 %v1859_v48, %v1280_v17  ;;  %v2594_v8 = vpack.c.bf16 %v1504_v36, %v1503_v21  ;;  %v1883_v14 = vld [vmem:[%s3678_s2 + $0xd8] sm:$0xff]  ;;  %v1505_v17 = vld [vmem:[%s3678_s2 + $0x60] sm:$0xff]  ;;  %v1886_v48 = vld [vmem:[%s3678_s2 + $0xf0] sm:$0xff] }
 0x706   :  { %v1286_v33 = vadd.f32 %v1858_v9, %v1211_v26  ;;  %v1288_v46 = vadd.f32 %v1860_v45, %v1282_v30  ;;  %v1882_v9 = vld [vmem:[%s3678_s2 + $0xd0] sm:$0xff]  ;;  %v1506_v26 = vld [vmem:[%s3678_s2 + $0x68] sm:$0xff]  ;;  %v1884_v30 = vld [vmem:[%s3678_s2 + $0xe0] sm:$0xff] }
 0x707   :  { %v1861_v37 = vmul.f32 -1.442695, %v1285_v25  ;;  %v2618_v25 = vpack.c.bf16 %v1883_v14, %v1882_v9  ;;  %v1507_v45 = vld [vmem:[%s3678_s2 + $0x70] sm:$0xff]  ;;  %v1902_v36 = vld [vmem:[%s3678_s2 + $0x158] sm:$0xff]  ;;  %v1903_v9 = vld [vmem:[%s3678_s2 + $0x160] sm:$0xff] }
 0x708   :  { %v1862_v42 = vmul.f32 -1.442695, %v1286_v33  ;;  %v1863_v52 = vmul.f32 -1.442695, %v1288_v46  ;;  %v1885_v33 = vld [vmem:[%s3678_s2 + $0xe8] sm:$0xff]  ;;  %v1508_v46 = vld [vmem:[%s3678_s2 + $0x78] sm:$0xff] }
 0x709   :  { %2749 = vpow2.f32 %v1861_v37  ;;  %v2597_v37 = vpack.c.bf16 %v1506_v26, %v1505_v17  ;;  %v1901_v21 = vld [vmem:[%s3678_s2 + $0x150] sm:$0xff]  ;;  %v1904_v14 = vld [vmem:[%s3678_s2 + $0x168] sm:$0xff]  ;;  %v1906_v26 = vld [vmem:[%s3678_s2 + $0x178] sm:$0xff] }
 0x70a   :  { %2751 = vpow2.f32 %v1862_v42  ;;  %v2621_v42 = vpack.c.bf16 %v1885_v33, %v1884_v30  ;;  %v2645_v17 = vpack.c.bf16 %v1904_v14, %v1903_v9  ;;  %v1871_v33 = vld [vmem:[%s3679_s3] ss:$0 sm:$0xff] }
 0x70b   :  { %2753 = vpow2.f32 %v1863_v52  ;;  %v1887_v52 = vld [vmem:[%s3678_s2 + $0xf8] sm:$0xff] }
 0x70c   :  { %2755 = vtanh.f32 %v1287_v55  ;;  %v2600_v55 = vpack.c.bf16 %v1508_v46, %v1507_v45 }
 0x713   :  { %v2750_v58 = vpop.eup %2749 }
 0x714   :  { %v2752_v62 = vpop.eup %2751  ;;  %v1292_v0 = vadd.f32 1.0, %v2750_v58  ;;  %v2624_v58 = vpack.c.bf16 %v1887_v52, %v1886_v48 }
 0x715   :  { %v1298_v7 = vadd.f32 1.0, %v2752_v62  ;;  %v2754_v10 = vpop.eup %2753  ;;  %v1864_v62 = vld [vmem:[%s3677_s0 + $0xe0] sm:$0xff] }
 0x716   :  { %2757 = vrcp.f32 %v1292_v0  ;;  %v2756_v15 = vpop.eup %2755  ;;  %v1305_v31 = vadd.f32 1.0, %v2754_v10  ;;  %v1865_v0 = vld [vmem:[%s3677_s0 + $0xe8] sm:$0xff] }
 0x717   :  { %2759 = vrcp.f32 %v1298_v7 }
 0x718   :  { %2761 = vrcp.f32 %v1305_v31 }
 0x720   :  { %v2758_v18 = vpop.eup %2757 }
 0x721   :  { %v2760_v24 = vpop.eup %2759  ;;  %v1309_v27 = vmul.f32 %v2758_v18, %v2756_v15 }
 0x722   :  { %v1308_v32 = vmul.f32 %v2760_v24, %v3411_v19  ;;  %v2762_v40 = vpop.eup %2761  ;;  %v1881_v19 = vld [vmem:[%s3678_s2 + $0xc8] sm:$0xff] }
 0x723   :  { %v2615_v20 = vpack.c.bf16 %v1881_v19, %v1880_v16  ;;  %v1899_v16 = vld [vmem:[%s3678_s2 + $0x140] sm:$0xff]  ;;  %v1900_v19 = vld [vmem:[%s3678_s2 + $0x148] sm:$0xff] }
 0x724   :  { %v3459_v39 = vadd.f32 %v1309_v27, %v1308_v32 }
 0x726   :  { %2763 = vtanh.f32 %v3459_v39 }
 0x730   :  { %v2764_v41 = vpop.eup %2763 }
 0x731   :  { %v1312_v47 = vmul.f32 %v2764_v41, %v2762_v40  ;;  %v1867_v40 = vld [vmem:[%s3677_s0 + $0xf8] sm:$0xff] }
 0x733   :  { %1383 = vmatmul.mubr.f32.vlgmr.msra.gmra.mrb[14].mxu0 %v1312_v47  ;;  %1454 = vmatmul.mubr.f32.vlgmr.msra.gmra.mrb[14].mxu1 %v1312_v47  ;;  %v1866_v47 = vld [vmem:[%s3677_s0 + $0xf0] sm:$0xff] }
 0x734   :  { %2580 = vmatpush3.bf16.msra.mxu0 %v2579_v43  ;;  %2604 = vmatpush3.bf16.msra.mxu1 %v2603_v35 }
 0x735   :  { %2581 = vmatprep.subr.bf16.mxu0 %v2794_v34  ;;  %2605 = vmatprep.subr.bf16.mxu1 %v2794_v34 }
 0x736   :  { %1993 = vmatprep.mubr.msk.f32.mxu0 %vm2795_vm0, %v2793_v3  ;;  %2028 = vmatprep.mubr.msk.f32.mxu1 %vm2795_vm0, %v2793_v3 }
 0x738   :  { %2583 = vmatpush3.bf16.msra.mxu0 %v2582_v50  ;;  %2607 = vmatpush3.bf16.msra.mxu1 %v2606_v54 }
 0x739   :  { %2584 = vmatprep.subr.bf16.mxu0 %v2794_v34  ;;  %2608 = vmatprep.subr.bf16.mxu1 %v2794_v34 }
 0x73c   :  { %2586 = vmatpush3.bf16.msra.mxu0 %v2585_v56  ;;  %2610 = vmatpush3.bf16.msra.mxu1 %v2609_v60  ;;  %v1891_v56 = vld [vmem:[%s3678_s2 + $0x100] sm:$0xff] }
 0x73d   :  { %2587 = vmatprep.subr.bf16.mxu0 %v2794_v34  ;;  %2611 = vmatprep.subr.bf16.mxu1 %v2794_v34  ;;  %v2627_v61 = vpack.c.bf16 %v1892_v57, %v1891_v56 }
 0x740   :  { %2589 = vmatpush3.bf16.msra.mxu0 %v2588_v1  ;;  %2613 = vmatpush3.bf16.msra.mxu1 %v2612_v6  ;;  %v1893_v1 = vld [vmem:[%s3678_s2 + $0x110] sm:$0xff]  ;;  %v1896_v6 = vld [vmem:[%s3678_s2 + $0x128] sm:$0xff] }
 0x741   :  { %2590 = vmatprep.subr.bf16.mxu0 %v2794_v34  ;;  %2614 = vmatprep.subr.bf16.mxu1 %v2794_v34  ;;  %v2633_v11 = vpack.c.bf16 %v1896_v6, %v1895_v5 }
 0x744   :  { %2592 = vmatpush3.bf16.msra.mxu0 %v2591_v13  ;;  %2616 = vmatpush3.bf16.msra.mxu1 %v2615_v20  ;;  %v2639_v20 = vpack.c.bf16 %v1900_v19, %v1899_v16 }
 0x745   :  { %2593 = vmatprep.subr.bf16.mxu0 %v2794_v34  ;;  %2617 = vmatprep.subr.bf16.mxu1 %v2794_v34 }
 0x748   :  { %2595 = vmatpush3.bf16.msra.mxu0 %v2594_v8  ;;  %2619 = vmatpush3.bf16.msra.mxu1 %v2618_v25  ;;  %v2642_v8 = vpack.c.bf16 %v1902_v36, %v1901_v21  ;;  %v1905_v25 = vld [vmem:[%s3678_s2 + $0x170] sm:$0xff] }
 0x749   :  { %2596 = vmatprep.subr.bf16.mxu0 %v2794_v34  ;;  %2620 = vmatprep.subr.bf16.mxu1 %v2794_v34  ;;  %v2648_v30 = vpack.c.bf16 %v1906_v26, %v1905_v25 }
 0x74c   :  { %2598 = vmatpush3.bf16.msra.mxu0 %v2597_v37  ;;  %2622 = vmatpush3.bf16.msra.mxu1 %v2621_v42  ;;  %v1889_v42 = vld [vmem:[%s3679_s3 + $0x1] ss:$0 sm:$0xff] }
 0x74d   :  { %2599 = vmatprep.subr.bf16.mxu0 %v2794_v34  ;;  %2623 = vmatprep.subr.bf16.mxu1 %v2794_v34 }
 0x750   :  { %2601 = vmatpush3.bf16.msra.mxu0 %v2600_v55  ;;  %2625 = vmatpush3.bf16.msra.mxu1 %v2624_v58 }
 0x751   :  { %2626 = vmatprep.subr.bf16.mxu0 %v2794_v34 }
 0x806   :  { %v1384_v7 = vpop.f32.mrb[14].mxu0  ;;  %v1455_v10 = vpop.f32.mrb[14].mxu1 }
 0x807   :  { %v1460_v15 = vadd.f32 %v1864_v62, %v1384_v7  ;;  %v1386_v18 = vpop.f32.mrb[15].mxu0  ;;  %v1457_v24 = vpop.f32.mrb[15].mxu1  ;;  %v1462_v38 = vadd.f32 %v1866_v47, %v1455_v10  ;;  %v1908_v62 = vld [vmem:[%s3679_s3 + $0x2] ss:$0 sm:$0xff] }
 0x808   :  { %v1461_v27 = vadd.f32 %v1865_v0, %v1386_v18  ;;  %v1463_v41 = vadd.f32 %v1867_v40, %v1457_v24 }
 0x809   :  { %v1868_v31 = vmul.f32 -1.442695, %v1460_v15 }
 0x80a   :  { %v1869_v32 = vmul.f32 -1.442695, %v1461_v27  ;;  %v1870_v23 = vmul.f32 -1.442695, %v1463_v41 }
 0x80b   :  { %2765 = vpow2.f32 %v1868_v31 }
 0x80c   :  { %2767 = vpow2.f32 %v1869_v32 }
 0x80d   :  { %2769 = vpow2.f32 %v1870_v23 }
 0x80e   :  { %2771 = vtanh.f32 %v1462_v38 }
 0x815   :  { %v2766_v43 = vpop.eup %2765 }
 0x816   :  { %v2768_v28 = vpop.eup %2767  ;;  %v1467_v29 = vadd.f32 1.0, %v2766_v43 }
 0x817   :  { %v1473_v35 = vadd.f32 1.0, %v2768_v28  ;;  %v2770_v44 = vpop.eup %2769 }
 0x818   :  { %2773 = vrcp.f32 %v1467_v29  ;;  %v2772_v49 = vpop.eup %2771  ;;  %v1480_v54 = vadd.f32 1.0, %v2770_v44 }
 0x819   :  { %2775 = vrcp.f32 %v1473_v35 }
 0x81a   :  { %2777 = vrcp.f32 %v1480_v54 }
 0x822   :  { %v2774_v50 = vpop.eup %2773 }
 0x823   :  { %v2776_v51 = vpop.eup %2775  ;;  %v1484_v53 = vmul.f32 %v2774_v50, %v2772_v49 }
 0x824   :  { %v1483_v4 = vmul.f32 %v2776_v51, %v3459_v39  ;;  %v2778_v59 = vpop.eup %2777  ;;  %v1894_v39 = vld [vmem:[%s3678_s2 + $0x118] sm:$0xff] }
 0x825   :  { %v2630_v2 = vpack.c.bf16 %v1894_v39, %v1893_v1 }
 0x826   :  { %v1485_v22 = vadd.f32 %v1484_v53, %v1483_v4 }
 0x828   :  { %2779 = vtanh.f32 %v1485_v22 }
 0x832   :  { %v2780_v60 = vpop.eup %2779 }
 0x833   :  { %v1487_v63 = vmul.f32 %v2780_v60, %v2778_v59 }
 0x835   :  { %1994 = vmatmul.mubr.f32.vlgmr.msra.gmra.mrb[16].mxu0 %v1487_v63  ;;  %2029 = vmatmul.mubr.f32.vlgmr.msra.gmra.mrb[16].mxu1 %v1487_v63 }
 0x836   :  { %2628 = vmatpush3.bf16.msra.mxu0 %v2627_v61  ;;  %2063 = vmatprep.mubr.msk.f32.mxu0 %vm2795_vm0, %v2793_v3  ;;  %v1898_v3 = vld [vmem:[%s3678_s2 + $0x138] sm:$0xff] }
 0x837   :  { %2629 = vmatprep.subr.bf16.mxu0 %v2794_v34  ;;  %v2636_v13 = vpack.c.bf16 %v1898_v3, %v1897_v12 }
 0x83a   :  { %2631 = vmatpush3.bf16.msra.mxu0 %v2630_v2 }
 0x83b   :  { %2632 = vmatprep.subr.bf16.mxu0 %v2794_v34 }
 0x83e   :  { %2634 = vmatpush3.bf16.msra.mxu0 %v2633_v11 }
 0x83f   :  { %2635 = vmatprep.subr.bf16.mxu0 %v2794_v34 }
 0x842   :  { %2637 = vmatpush3.bf16.msra.mxu0 %v2636_v13 }
 0x843   :  { %2638 = vmatprep.subr.bf16.mxu0 %v2794_v34 }
 0x846   :  { %2640 = vmatpush3.bf16.msra.mxu0 %v2639_v20 }
 0x847   :  { %2641 = vmatprep.subr.bf16.mxu0 %v2794_v34 }
 0x84a   :  { %2643 = vmatpush3.bf16.msra.mxu0 %v2642_v8 }
 0x84b   :  { %2644 = vmatprep.subr.bf16.mxu0 %v2794_v34 }
 0x84e   :  { %2646 = vmatpush3.bf16.msra.mxu0 %v2645_v17 }
 0x84f   :  { %2647 = vmatprep.subr.bf16.mxu0 %v2794_v34 }
 0x852   :  { %2649 = vmatpush3.bf16.msra.mxu0 %v2648_v30 }
 0x855   :  { %2064 = vmatmul.mubr.f32.vlgmr.msra.gmra.mrb[18].mxu0 %v1487_v63 }
 0x908   :  { %v1582_v37 = vpop.f32.mrb[16].mxu0  ;;  %v1690_v45 = vpop.f32.mrb[16].mxu1 }
 0x909   :  { %v1583_v46 = vadd.f32 %v1871_v33, %v1582_v37  ;;  %v1995_v48 = vpop.f32.mrb[17].mxu0  ;;  %v2030_v52 = vpop.f32.mrb[17].mxu1  ;;  %v1691_v55 = vadd.f32 %v1889_v42, %v1690_v45 }
 0x90b   :  { %v1587_v58 = vsel %vm1586_vm1, %v1583_v46, -inf  ;;  %v1694_v34 = vsel %vm1586_vm1, %v1691_v55, -inf }
 0x90c   :  { %1588 = vmax.xlane.f32.xlu0 %v1587_v58 }
 0x910   :  { %1695 = vmax.xlane.f32.xlu0 %v1694_v34 }
 0x928   :  { %v1798_v0 = vpop.f32.mrb[18].mxu0 }
 0x929   :  { %v1799_v7 = vadd.f32 %v1908_v62, %v1798_v0  ;;  %v2065_v10 = vpop.f32.mrb[19].mxu0 }
 0x92b   :  { %v1802_v15 = vsel %vm1586_vm1, %v1799_v7, -inf }
 0x92c   :  { %1803 = vmax.xlane.f32.xlu1 %v1802_v15 }
 0x999   :  { %v1589_v18 = vpop.xlane.xlu0 %1588 }
 0x99a   :  { %v1590_v24 = vsub.f32 %v1583_v46, %v1589_v18 }
 0x99c   :  { %v1591_v27 = vmul.f32 1.442695, %v1590_v24 }
 0x99d   :  { %v1696_v31 = vpop.xlane.xlu0 %1695 }
 0x99e   :  { %2781 = vpow2.f32 %v1591_v27  ;;  %v1697_v32 = vsub.f32 %v1691_v55, %v1696_v31 }
 0x9a0   :  { %v1698_v40 = vmul.f32 1.442695, %v1697_v32 }
 0x9a2   :  { %2783 = vpow2.f32 %v1698_v40 }
 0x9a8   :  { %v2782_v41 = vpop.eup %2781 }
 0x9a9   :  { %v1593_v47 = vsel %vm1586_vm1, %v2782_v41, 0.0 }
 0x9aa   :  { %1594 = vadd.xlane.f32.xlu1 %v1593_v47 }
 0x9ac   :  { %v2784_v23 = vpop.eup %2783 }
 0x9ad   :  { %v1700_v38 = vsel %vm1586_vm1, %v2784_v23, 0.0 }
 0x9ae   :  { %1701 = vadd.xlane.f32.xlu0 %v1700_v38 }
 0x9b9   :  { %v1804_v43 = vpop.xlane.xlu1 %1803 }
 0x9ba   :  { %v1805_v28 = vsub.f32 %v1799_v7, %v1804_v43 }
 0x9bc   :  { %v1806_v29 = vmul.f32 1.442695, %v1805_v28 }
 0x9be   :  { %2785 = vpow2.f32 %v1806_v29 }
 0x9c8   :  { %v2786_v35 = vpop.eup %2785 }
 0x9c9   :  { %v1808_v44 = vsel %vm1586_vm1, %v2786_v35, 0.0 }
 0x9ca   :  { %1809 = vadd.xlane.f32.xlu1 %v1808_v44 }
 0xa37   :  { %v1595_v49 = vpop.xlane.xlu1 %1594 }
 0xa38   :  { %2787 = vrcp.f32 %v1595_v49 }
 0xa3b   :  { %v1702_v50 = vpop.xlane.xlu0 %1701 }
 0xa3c   :  { %2789 = vrcp.f32 %v1702_v50 }
 0xa42   :  { %v2788_v51 = vpop.eup %2787 }
 0xa43   :  { %v1597_v53 = vmul.f32 %v2788_v51, %v2782_v41 }
 0xa45   :  { %1598 = vst.msk [vmem:[%s3680_s4] sm:$0xff] %vm1586_vm1, %v1597_v53 }
 0xa46   :  { %v2790_v54 = vpop.eup %2789 }
 0xa47   :  { %v1704_v4 = vmul.f32 %v2790_v54, %v2784_v23 }
 0xa49   :  { %1890 = vst.msk [vmem:[%s3680_s4 + $0x8] sm:$0xff] %vm1586_vm1, %v1704_v4 }
 0xa57   :  { %v1810_v22 = vpop.xlane.xlu1 %1809 }
 0xa58   :  { %2791 = vrcp.f32 %v1810_v22 }
 0xa62   :  { %v2792_v56 = vpop.eup %2791 }
 0xa63   :  { %v1812_v57 = vmul.f32 %v2792_v56, %v2786_v35 }
 0xa65   :  { %1909 = vst.msk [vmem:[%s3680_s4 + $0x10] sm:$0xff] %vm1586_vm1, %v1812_v57 }

// kernel: lstm_model_forward.5
= control target key start
LH: loop header
LB: loop body
LE: loop exit
PB: predicated region body
PF: predicated region fallthrough
CT: control target
= control target key end

     0   :  { %v2651_v3 = vmov 0.0   ;;  %s3647_s1 = inlined_call_operand.vmem [shape: f32[128,512], index: 1, kind: input, shape index: {}]   ;;  %s3648_s0 = inlined_call_operand.vmem [shape: f32[8,8,512], index: 0, kind: input, shape index: {}]   ;;  %s3649_s2 = inlined_call_operand.vmem [shape: f32[8,8,128], index: 2, kind: output, shape index: {}]  }
   0x1   :  { %v24_v0 = vld [vmem:[%s3647_s1 + $0x8] sm:$0xff]  ;;  %v23_v2 = vld [vmem:[%s3647_s1] sm:$0xff]  ;;  %151 = vmatprep.mubr.f32.mxu0 %v2651_v3  ;;  %222 = vmatprep.mubr.f32.mxu1 %v2651_v3  ;;  %v26_v19 = vld [vmem:[%s3647_s1 + $0x18] sm:$0xff] }
   0x2   :  { %v28_v1 = vld [vmem:[%s3647_s1 + $0x28] sm:$0xff]  ;;  %v27_v5 = vld [vmem:[%s3647_s1 + $0x20] sm:$0xff]  ;;  %v30_v20 = vld [vmem:[%s3647_s1 + $0x38] sm:$0xff] }
   0x3   :  { %v2678_v4 = vpack.c.bf16 %v28_v1, %v24_v0  ;;  %v32_v6 = vld [vmem:[%s3647_s1 + $0x48] sm:$0xff]  ;;  %v2689_v8 = vpack.c.bf16 %v27_v5, %v23_v2  ;;  %v31_v10 = vld [vmem:[%s3647_s1 + $0x40] sm:$0xff]  ;;  %v2730_v22 = vpack.c.bf16 %v30_v20, %v26_v19  ;;  %v25_v23 = vld [vmem:[%s3647_s1 + $0x10] sm:$0xff] }
   0x4   :  { %v36_v7 = vld [vmem:[%s3647_s1 + $0x68] sm:$0xff]  ;;  %v35_v11 = vld [vmem:[%s3647_s1 + $0x60] sm:$0xff]  ;;  %v29_v24 = vld [vmem:[%s3647_s1 + $0x30] sm:$0xff] }
   0x5   :  { %v2691_v9 = vpack.c.bf16 %v36_v7, %v32_v6  ;;  %v40_v12 = vld [vmem:[%s3647_s1 + $0x88] sm:$0xff]  ;;  %2011 = vmatprep.subr.bf16.mxu0 %v2678_v4  ;;  %v2707_v14 = vpack.c.bf16 %v35_v11, %v31_v10  ;;  %v39_v15 = vld [vmem:[%s3647_s1 + $0x80] sm:$0xff]  ;;  %v2738_v25 = vpack.c.bf16 %v29_v24, %v25_v23  ;;  %2043 = vmatprep.subr.bf16.mxu1 %v2730_v22  ;;  %v34_v27 = vld [vmem:[%s3647_s1 + $0x58] sm:$0xff] }
   0x6   :  { %v44_v13 = vld [vmem:[%s3647_s1 + $0xa8] sm:$0xff]  ;;  %2013 = vmatpush1.bf16.msra.mxu0 %v2689_v8  ;;  %v43_v16 = vld [vmem:[%s3647_s1 + $0xa0] sm:$0xff]  ;;  %v38_v28 = vld [vmem:[%s3647_s1 + $0x78] sm:$0xff] }
   0x7   :  { %2015 = vmatprep.subr.bf16.mxu0 %v2691_v9  ;;  %v2716_v17 = vpack.c.bf16 %v44_v13, %v40_v12  ;;  %v48_v18 = vld [vmem:[%s3647_s1 + $0xc8] sm:$0xff]  ;;  %v2741_v26 = vpack.c.bf16 %v43_v16, %v39_v15  ;;  %v33_v29 = vld [vmem:[%s3647_s1 + $0x50] sm:$0xff]  ;;  %v47_v31 = vld [vmem:[%s3647_s1 + $0xc0] sm:$0xff]  ;;  %2045 = vmatpush1.bf16.msra.mxu1 %v2738_v25  ;;  %v2763_v33 = vpack.c.bf16 %v38_v28, %v34_v27 }
   0x8   :  { %v52_v21 = vld [vmem:[%s3647_s1 + $0xe8] sm:$0xff]  ;;  %v51_v32 = vld [vmem:[%s3647_s1 + $0xe0] sm:$0xff]  ;;  %v37_v34 = vld [vmem:[%s3647_s1 + $0x70] sm:$0xff] }
   0x9   :  { %v2754_v30 = vpack.c.bf16 %v52_v21, %v48_v18  ;;  %v56_v35 = vld [vmem:[%s3647_s1 + $0x108] sm:$0xff]  ;;  %v2774_v37 = vpack.c.bf16 %v37_v34, %v33_v29  ;;  %v42_v38 = vld [vmem:[%s3647_s1 + $0x98] sm:$0xff]  ;;  %2047 = vmatprep.subr.bf16.mxu1 %v2763_v33  ;;  %v41_v40 = vld [vmem:[%s3647_s1 + $0x90] sm:$0xff]  ;;  %v2790_v42 = vpack.c.bf16 %v51_v32, %v47_v31 }
   0xa   :  { %2017 = vmatpush1.bf16.msra.mxu0 %v2707_v14  ;;  %v60_v36 = vld [vmem:[%s3647_s1 + $0x128] sm:$0xff]  ;;  %v46_v39 = vld [vmem:[%s3647_s1 + $0xb8] sm:$0xff]  ;;  %v45_v41 = vld [vmem:[%s3647_s1 + $0xb0] sm:$0xff] }
   0xb   :  { %2019 = vmatprep.subr.bf16.mxu0 %v2716_v17  ;;  %v55_v43 = vld [vmem:[%s3647_s1 + $0x100] sm:$0xff]  ;;  %v2798_v45 = vpack.c.bf16 %v46_v39, %v42_v38  ;;  %v2801_v46 = vpack.c.bf16 %v60_v36, %v56_v35  ;;  %2049 = vmatpush1.bf16.msra.mxu1 %v2774_v37  ;;  %v64_v47 = vld [vmem:[%s3647_s1 + $0x148] sm:$0xff]  ;;  %v2807_v48 = vpack.c.bf16 %v45_v41, %v41_v40  ;;  %v50_v49 = vld [vmem:[%s3647_s1 + $0xd8] sm:$0xff] }
   0xc   :  { %v59_v44 = vld [vmem:[%s3647_s1 + $0x120] sm:$0xff]  ;;  %v54_v50 = vld [vmem:[%s3647_s1 + $0xf8] sm:$0xff]  ;;  %v68_v51 = vld [vmem:[%s3647_s1 + $0x168] sm:$0xff] }
   0xd   :  { %2051 = vmatprep.subr.bf16.mxu1 %v2798_v45  ;;  %v2819_v52 = vpack.c.bf16 %v54_v50, %v50_v49  ;;  %v49_v53 = vld [vmem:[%s3647_s1 + $0xd0] sm:$0xff]  ;;  %v2828_v55 = vpack.c.bf16 %v59_v44, %v55_v43  ;;  %v58_v56 = vld [vmem:[%s3647_s1 + $0x118] sm:$0xff]  ;;  %v2837_v58 = vpack.c.bf16 %v68_v51, %v64_v47  ;;  %v63_v59 = vld [vmem:[%s3647_s1 + $0x140] sm:$0xff] }
   0xe   :  { %2021 = vmatpush1.bf16.msra.mxu0 %v2741_v26  ;;  %v53_v54 = vld [vmem:[%s3647_s1 + $0xf0] sm:$0xff]  ;;  %v62_v57 = vld [vmem:[%s3647_s1 + $0x138] sm:$0xff]  ;;  %v67_v60 = vld [vmem:[%s3647_s1 + $0x160] sm:$0xff] }
   0xf   :  { %2023 = vmatprep.subr.bf16.mxu0 %v2754_v30  ;;  %2053 = vmatpush1.bf16.msra.mxu1 %v2807_v48  ;;  %v72_v61 = vld [vmem:[%s3647_s1 + $0x188] sm:$0xff]  ;;  %v2849_v62 = vpack.c.bf16 %v53_v54, %v49_v53  ;;  %v2855_v0 = vpack.c.bf16 %v62_v57, %v58_v56  ;;  %v57_v1 = vld [vmem:[%s3647_s1 + $0x110] sm:$0xff]  ;;  %v66_v5 = vld [vmem:[%s3647_s1 + $0x158] sm:$0xff]  ;;  %v2870_v7 = vpack.c.bf16 %v67_v60, %v63_v59 }
  0x10   :  { %v76_v63 = vld [vmem:[%s3647_s1 + $0x1a8] sm:$0xff]  ;;  %2055 = vmatprep.subr.bf16.mxu1 %v2819_v52  ;;  %v61_v2 = vld [vmem:[%s3647_s1 + $0x130] sm:$0xff]  ;;  %v70_v6 = vld [vmem:[%s3647_s1 + $0x178] sm:$0xff] }
  0x11   :  { %v2873_v10 = vpack.c.bf16 %v76_v63, %v72_v61  ;;  %v71_v11 = vld [vmem:[%s3647_s1 + $0x180] sm:$0xff]  ;;  %v80_v13 = vld [vmem:[%s3647_s1 + $0x1c8] sm:$0xff]  ;;  %v2885_v15 = vpack.c.bf16 %v61_v2, %v57_v1  ;;  %v2891_v18 = vpack.c.bf16 %v70_v6, %v66_v5  ;;  %v65_v19 = vld [vmem:[%s3647_s1 + $0x150] sm:$0xff] }
  0x12   :  { %2025 = vmatpush1.bf16.msra.mxu0 %v2790_v42  ;;  %v75_v12 = vld [vmem:[%s3647_s1 + $0x1a0] sm:$0xff]  ;;  %v84_v16 = vld [vmem:[%s3647_s1 + $0x1e8] sm:$0xff]  ;;  %v69_v20 = vld [vmem:[%s3647_s1 + $0x170] sm:$0xff] }
  0x13   :  { %2027 = vmatprep.subr.bf16.mxu0 %v2801_v46  ;;  %2057 = vmatpush1.bf16.msra.mxu1 %v2849_v62  ;;  %v74_v21 = vld [vmem:[%s3647_s1 + $0x198] sm:$0xff]  ;;  %v2906_v24 = vpack.c.bf16 %v75_v12, %v71_v11  ;;  %v2909_v27 = vpack.c.bf16 %v84_v16, %v80_v13  ;;  %v79_v28 = vld [vmem:[%s3647_s1 + $0x1c0] sm:$0xff]  ;;  %v2918_v31 = vpack.c.bf16 %v69_v20, %v65_v19  ;;  %v73_v34 = vld [vmem:[%s3647_s1 + $0x190] sm:$0xff] }
  0x14   :  { %2059 = vmatprep.subr.bf16.mxu1 %v2855_v0  ;;  %v78_v23 = vld [vmem:[%s3647_s1 + $0x1b8] sm:$0xff]  ;;  %v83_v29 = vld [vmem:[%s3647_s1 + $0x1e0] sm:$0xff]  ;;  %v77_v35 = vld [vmem:[%s3647_s1 + $0x1b0] sm:$0xff] }
  0x15   :  { %v2921_v32 = vpack.c.bf16 %v78_v23, %v74_v21  ;;  %v82_v36 = vld [vmem:[%s3647_s1 + $0x1d8] sm:$0xff]  ;;  %v2936_v39 = vpack.c.bf16 %v83_v29, %v79_v28  ;;  %v2940_v40 = vpack.c.bf16 %v77_v35, %v73_v34  ;;  %v81_v43 = vld [vmem:[%s3647_s1 + $0x1d0] sm:$0xff]  ;;  %v19_v49 = vld [vmem:[%s3648_s0] sm:$0xff] }
  0x16   :  { %2029 = vmatpush1.bf16.msra.mxu0 %v2828_v55  ;;  %v86_v38 = vld [vmem:[%s3647_s1 + $0x1f8] sm:$0xff]  ;;  %v85_v44 = vld [vmem:[%s3647_s1 + $0x1f0] sm:$0xff]  ;;  %v20_v50 = vld [vmem:[%s3648_s0 + $0x8] sm:$0xff] }
  0x17   :  { %2031 = vmatprep.subr.bf16.mxu0 %v2837_v58  ;;  %2061 = vmatpush1.bf16.msra.mxu1 %v2885_v15  ;;  %v2943_v41 = vpack.c.bf16 %v86_v38, %v82_v36  ;;  %v2953_v47 = vpack.c.bf16 %v85_v44, %v81_v43  ;;  %v22_v60 = vld [vmem:[%s3648_s0 + $0x18] sm:$0xff]  ;;  %v21_v2 = vld [vmem:[%s3648_s0 + $0x10] sm:$0xff] }
  0x18   :  { %2063 = vmatprep.subr.bf16.mxu1 %v2891_v18  ;;  %v1956_v44 = vld [vmem:[%s3648_s0 + $0x30] sm:$0xff] }
  0x1a   :  { %2033 = vmatpush1.bf16.msra.mxu0 %v2870_v7 }
  0x1b   :  { %2035 = vmatprep.subr.bf16.mxu0 %v2873_v10  ;;  %2065 = vmatpush1.bf16.msra.mxu1 %v2918_v31 }
  0x1c   :  { %2067 = vmatprep.subr.bf16.mxu1 %v2921_v32 }
  0x1e   :  { %2037 = vmatpush1.bf16.msra.mxu0 %v2906_v24 }
  0x1f   :  { %2039 = vmatprep.subr.bf16.mxu0 %v2909_v27  ;;  %2069 = vmatpush1.bf16.msra.mxu1 %v2940_v40 }
  0x20   :  { %2071 = vmatprep.subr.bf16.mxu1 %v2943_v41 }
  0x22   :  { %2041 = vmatpush1.bf16.msra.mxu0 %v2936_v39 }
  0x23   :  { %2075 = vmatprep.subr.bf16.mxu0 %v2678_v4  ;;  %2073 = vmatpush1.bf16.msra.mxu1 %v2953_v47 }
  0x24   :  { %2107 = vmatprep.subr.bf16.mxu1 %v2730_v22 }
  0x25   :  { %152 = vmatmul.mubr.f32.vlgmr.msra.gmra.mrb[0].mxu0 %v2651_v3 }
  0x26   :  { %2077 = vmatpush1.bf16.msra.mxu0 %v2689_v8  ;;  %391 = vmatprep.mubr.f32.mxu0 %v2651_v3 }
  0x27   :  { %2079 = vmatprep.subr.bf16.mxu0 %v2691_v9  ;;  %223 = vmatmul.mubr.f32.vlgmr.msra.gmra.mrb[0].mxu1 %v2651_v3 }
  0x28   :  { %2109 = vmatpush1.bf16.msra.mxu1 %v2738_v25  ;;  %462 = vmatprep.mubr.f32.mxu1 %v2651_v3 }
  0x29   :  { %2111 = vmatprep.subr.bf16.mxu1 %v2763_v33 }
  0x2a   :  { %2081 = vmatpush1.bf16.msra.mxu0 %v2707_v14 }
  0x2b   :  { %2083 = vmatprep.subr.bf16.mxu0 %v2716_v17 }
  0x2c   :  { %2113 = vmatpush1.bf16.msra.mxu1 %v2774_v37 }
  0x2d   :  { %2115 = vmatprep.subr.bf16.mxu1 %v2798_v45 }
  0x2e   :  { %2085 = vmatpush1.bf16.msra.mxu0 %v2741_v26 }
  0x2f   :  { %2087 = vmatprep.subr.bf16.mxu0 %v2754_v30 }
  0x30   :  { %2117 = vmatpush1.bf16.msra.mxu1 %v2807_v48 }
  0x31   :  { %2119 = vmatprep.subr.bf16.mxu1 %v2819_v52 }
  0x32   :  { %2089 = vmatpush1.bf16.msra.mxu0 %v2790_v42 }
  0x33   :  { %2091 = vmatprep.subr.bf16.mxu0 %v2801_v46 }
  0x34   :  { %2121 = vmatpush1.bf16.msra.mxu1 %v2849_v62 }
  0x35   :  { %2123 = vmatprep.subr.bf16.mxu1 %v2855_v0 }
  0x36   :  { %2093 = vmatpush1.bf16.msra.mxu0 %v2828_v55 }
  0x37   :  { %2095 = vmatprep.subr.bf16.mxu0 %v2837_v58 }
  0x38   :  { %2125 = vmatpush1.bf16.msra.mxu1 %v2885_v15 }
  0x39   :  { %2127 = vmatprep.subr.bf16.mxu1 %v2891_v18 }
  0x3a   :  { %2097 = vmatpush1.bf16.msra.mxu0 %v2870_v7 }
  0x3b   :  { %2099 = vmatprep.subr.bf16.mxu0 %v2873_v10 }
  0x3c   :  { %2129 = vmatpush1.bf16.msra.mxu1 %v2918_v31 }
  0x3d   :  { %2131 = vmatprep.subr.bf16.mxu1 %v2921_v32 }
  0x3e   :  { %2101 = vmatpush1.bf16.msra.mxu0 %v2906_v24 }
  0x3f   :  { %2103 = vmatprep.subr.bf16.mxu0 %v2909_v27 }
  0x40   :  { %2133 = vmatpush1.bf16.msra.mxu1 %v2940_v40 }
  0x41   :  { %2135 = vmatprep.subr.bf16.mxu1 %v2943_v41 }
  0x42   :  { %2105 = vmatpush1.bf16.msra.mxu0 %v2936_v39 }
  0x43   :  { %2139 = vmatprep.subr.bf16.mxu0 %v2678_v4 }
  0x44   :  { %2137 = vmatpush1.bf16.msra.mxu1 %v2953_v47 }
  0x45   :  { %2171 = vmatprep.subr.bf16.mxu1 %v2730_v22 }
  0xf8   :  { %v153_v51 = vpop.f32.mrb[0].mxu0 }
  0xf9   :  { %v229_v53 = vadd.f32 %v153_v51, %v19_v49  ;;  %v155_v54 = vpop.f32.mrb[1].mxu0 }
  0xfa   :  { %v230_v56 = vadd.f32 %v155_v54, %v20_v50  ;;  %v224_v61 = vpop.f32.mrb[0].mxu1 }
  0xfb   :  { %v1951_v57 = vmul.f32 -1.442695, %v229_v53  ;;  %v226_v63 = vpop.f32.mrb[1].mxu1  ;;  %v231_v6 = vadd.f32 %v224_v61, %v21_v2 }
  0xfc   :  { %v1952_v59 = vmul.f32 -1.442695, %v230_v56  ;;  %v232_v1 = vadd.f32 %v226_v63, %v22_v60 }
  0xfd   :  { %2523 = vpow2.f32 %v1951_v57 }
  0xfe   :  { %2525 = vpow2.f32 %v1952_v59  ;;  %v1953_v5 = vmul.f32 -1.442695, %v232_v1 }
 0x100   :  { %2527 = vpow2.f32 %v1953_v5 }
 0x101   :  { %2529 = vtanh.f32 %v231_v6 }
 0x107   :  { %v2524_v11 = vpop.eup %2523 }
 0x108   :  { %v2526_v12 = vpop.eup %2525  ;;  %v236_v13 = vadd.f32 1.0, %v2524_v11 }
 0x109   :  { %v242_v16 = vadd.f32 1.0, %v2526_v12 }
 0x10a   :  { %2531 = vrcp.f32 %v236_v13  ;;  %v2528_v19 = vpop.eup %2527 }
 0x10b   :  { %2533 = vrcp.f32 %v242_v16  ;;  %v2530_v20 = vpop.eup %2529  ;;  %v249_v23 = vadd.f32 1.0, %v2528_v19  ;;  %v793_v16 = vld [vmem:[%s3647_s1 + $0x180] sm:$0xff] }
 0x10c   :  { %v797_v19 = vld [vmem:[%s3647_s1 + $0x1a0] sm:$0xff] }
 0x10d   :  { %2535 = vrcp.f32 %v249_v23  ;;  %v3162_v23 = vpack.c.bf16 %v797_v19, %v793_v16  ;;  %v994_v16 = vld [vmem:[%s3647_s1 + $0x40] sm:$0xff] }
 0x10e   :  { %v998_v19 = vld [vmem:[%s3647_s1 + $0x60] sm:$0xff] }
 0x114   :  { %v2532_v21 = vpop.eup %2531 }
 0x115   :  { %v2534_v28 = vpop.eup %2533  ;;  %v253_v29 = vmul.f32 %v2532_v21, %v2530_v20  ;;  %v802_v20 = vld [vmem:[%s3647_s1 + $0x1c8] sm:$0xff] }
 0x116   :  { %v252_v34 = vmul.f32 0.0, %v2534_v28  ;;  %v806_v21 = vld [vmem:[%s3647_s1 + $0x1e8] sm:$0xff] }
 0x117   :  { %v2536_v36 = vpop.eup %2535  ;;  %v3165_v28 = vpack.c.bf16 %v806_v21, %v802_v20  ;;  %v3257_v21 = vpack.c.bf16 %v998_v19, %v994_v16  ;;  %v1048_v16 = vld [vmem:[%s3647_s1 + $0x1f0] sm:$0xff] }
 0x118   :  { %v3007_v35 = vadd.f32 %v253_v29, %v252_v34  ;;  %v801_v29 = vld [vmem:[%s3647_s1 + $0x1c0] sm:$0xff] }
 0x119   :  { %v805_v34 = vld [vmem:[%s3647_s1 + $0x1e0] sm:$0xff] }
 0x11a   :  { %2537 = vtanh.f32 %v3007_v35 }
 0x124   :  { %v2538_v38 = vpop.eup %2537 }
 0x125   :  { %v256_v43 = vmul.f32 %v2538_v38, %v2536_v36  ;;  %v1962_v36 = vld [vmem:[%s3648_s0 + $0x40] sm:$0xff]  ;;  %v1963_v38 = vld [vmem:[%s3648_s0 + $0x48] sm:$0xff] }
 0x127   :  { %257 = vst [vmem:[%s3649_s2] sm:$0xff] %v256_v43  ;;  %392 = vmatmul.mubr.f32.vlgmr.msra.gmra.mrb[2].mxu0 %v256_v43  ;;  %463 = vmatmul.mubr.f32.vlgmr.msra.gmra.mrb[2].mxu1 %v256_v43 }
 0x128   :  { %2141 = vmatpush1.bf16.msra.mxu0 %v2689_v8  ;;  %2173 = vmatpush1.bf16.msra.mxu1 %v2738_v25 }
 0x129   :  { %2143 = vmatprep.subr.bf16.mxu0 %v2691_v9  ;;  %2175 = vmatprep.subr.bf16.mxu1 %v2763_v33 }
 0x12a   :  { %632 = vmatprep.mubr.f32.mxu0 %v2651_v3  ;;  %703 = vmatprep.mubr.f32.mxu1 %v2651_v3 }
 0x12c   :  { %2145 = vmatpush1.bf16.msra.mxu0 %v2707_v14  ;;  %2177 = vmatpush1.bf16.msra.mxu1 %v2774_v37 }
 0x12d   :  { %2147 = vmatprep.subr.bf16.mxu0 %v2716_v17  ;;  %2179 = vmatprep.subr.bf16.mxu1 %v2798_v45 }
 0x130   :  { %2149 = vmatpush1.bf16.msra.mxu0 %v2741_v26  ;;  %2181 = vmatpush1.bf16.msra.mxu1 %v2807_v48 }
 0x131   :  { %2151 = vmatprep.subr.bf16.mxu0 %v2754_v30  ;;  %2183 = vmatprep.subr.bf16.mxu1 %v2819_v52  ;;  %v1954_v30 = vld [vmem:[%s3648_s0 + $0x20] sm:$0xff] }
 0x134   :  { %2153 = vmatpush1.bf16.msra.mxu0 %v2790_v42  ;;  %2185 = vmatpush1.bf16.msra.mxu1 %v2849_v62  ;;  %v1955_v42 = vld [vmem:[%s3648_s0 + $0x28] sm:$0xff] }
 0x135   :  { %2155 = vmatprep.subr.bf16.mxu0 %v2801_v46  ;;  %2187 = vmatprep.subr.bf16.mxu1 %v2855_v0 }
 0x138   :  { %2157 = vmatpush1.bf16.msra.mxu0 %v2828_v55  ;;  %2189 = vmatpush1.bf16.msra.mxu1 %v2885_v15 }
 0x139   :  { %2159 = vmatprep.subr.bf16.mxu0 %v2837_v58  ;;  %2191 = vmatprep.subr.bf16.mxu1 %v2891_v18 }
 0x13c   :  { %2161 = vmatpush1.bf16.msra.mxu0 %v2870_v7  ;;  %2193 = vmatpush1.bf16.msra.mxu1 %v2918_v31 }
 0x13d   :  { %2163 = vmatprep.subr.bf16.mxu0 %v2873_v10  ;;  %2195 = vmatprep.subr.bf16.mxu1 %v2921_v32 }
 0x140   :  { %2165 = vmatpush1.bf16.msra.mxu0 %v2906_v24  ;;  %2197 = vmatpush1.bf16.msra.mxu1 %v2940_v40 }
 0x141   :  { %2167 = vmatprep.subr.bf16.mxu0 %v2909_v27  ;;  %2199 = vmatprep.subr.bf16.mxu1 %v2943_v41 }
 0x144   :  { %2169 = vmatpush1.bf16.msra.mxu0 %v2936_v39  ;;  %2201 = vmatpush1.bf16.msra.mxu1 %v2953_v47 }
 0x145   :  { %2203 = vmatprep.subr.bf16.mxu0 %v2678_v4  ;;  %2235 = vmatprep.subr.bf16.mxu1 %v2730_v22  ;;  %v1957_v4 = vld [vmem:[%s3648_s0 + $0x38] sm:$0xff] }
 0x1fa   :  { %v393_v46 = vpop.f32.mrb[2].mxu0  ;;  %v464_v55 = vpop.f32.mrb[2].mxu1 }
 0x1fb   :  { %v469_v58 = vadd.f32 %v1954_v30, %v393_v46  ;;  %v395_v7 = vpop.f32.mrb[3].mxu0  ;;  %v466_v10 = vpop.f32.mrb[3].mxu1  ;;  %v471_v50 = vadd.f32 %v1956_v44, %v464_v55 }
 0x1fc   :  { %v470_v24 = vadd.f32 %v1955_v42, %v395_v7  ;;  %v472_v22 = vadd.f32 %v1957_v4, %v466_v10 }
 0x1fd   :  { %v1958_v27 = vmul.f32 -1.442695, %v469_v58 }
 0x1fe   :  { %v1959_v39 = vmul.f32 -1.442695, %v470_v24  ;;  %v1960_v49 = vmul.f32 -1.442695, %v472_v22  ;;  %v1965_v24 = vld [vmem:[%s3648_s0 + $0x58] sm:$0xff] }
 0x1ff   :  { %2539 = vpow2.f32 %v1958_v27 }
 0x200   :  { %2541 = vpow2.f32 %v1959_v39  ;;  %v1964_v39 = vld [vmem:[%s3648_s0 + $0x50] sm:$0xff] }
 0x201   :  { %2543 = vpow2.f32 %v1960_v49 }
 0x202   :  { %2545 = vtanh.f32 %v471_v50 }
 0x209   :  { %v2540_v51 = vpop.eup %2539 }
 0x20a   :  { %v2542_v53 = vpop.eup %2541  ;;  %v476_v54 = vadd.f32 1.0, %v2540_v51 }
 0x20b   :  { %v482_v56 = vadd.f32 1.0, %v2542_v53  ;;  %v2544_v57 = vpop.eup %2543 }
 0x20c   :  { %2547 = vrcp.f32 %v476_v54  ;;  %v2546_v59 = vpop.eup %2545  ;;  %v489_v1 = vadd.f32 1.0, %v2544_v57 }
 0x20d   :  { %2549 = vrcp.f32 %v482_v56 }
 0x20e   :  { %2551 = vrcp.f32 %v489_v1 }
 0x216   :  { %v2548_v60 = vpop.eup %2547 }
 0x217   :  { %v2550_v61 = vpop.eup %2549  ;;  %v493_v63 = vmul.f32 %v2548_v60, %v2546_v59 }
 0x218   :  { %v492_v2 = vmul.f32 %v2550_v61, %v3007_v35  ;;  %v2552_v6 = vpop.eup %2551  ;;  %v3174_v35 = vpack.c.bf16 %v805_v34, %v801_v29  ;;  %v996_v29 = vld [vmem:[%s3647_s1 + $0x50] sm:$0xff] }
 0x219   :  { %v1000_v34 = vld [vmem:[%s3647_s1 + $0x70] sm:$0xff] }
 0x21a   :  { %v3060_v5 = vadd.f32 %v493_v63, %v492_v2 }
 0x21c   :  { %2553 = vtanh.f32 %v3060_v5 }
 0x226   :  { %v2554_v11 = vpop.eup %2553 }
 0x227   :  { %v496_v12 = vmul.f32 %v2554_v11, %v2552_v6  ;;  %v991_v11 = vld [vmem:[%s3647_s1 + $0x28] sm:$0xff] }
 0x229   :  { %1961 = vst [vmem:[%s3649_s2 + $0x8] sm:$0xff] %v496_v12  ;;  %633 = vmatmul.mubr.f32.vlgmr.msra.gmra.mrb[4].mxu0 %v496_v12  ;;  %704 = vmatmul.mubr.f32.vlgmr.msra.gmra.mrb[4].mxu1 %v496_v12  ;;  %v989_v12 = vld [vmem:[%s3647_s1 + $0x18] sm:$0xff] }
 0x22a   :  { %2205 = vmatpush1.bf16.msra.mxu0 %v2689_v8  ;;  %2237 = vmatpush1.bf16.msra.mxu1 %v2738_v25  ;;  %v770_v8 = vld [vmem:[%s3647_s1 + $0xc8] sm:$0xff]  ;;  %v773_v25 = vld [vmem:[%s3647_s1 + $0xe0] sm:$0xff] }
 0x22b   :  { %2207 = vmatprep.subr.bf16.mxu0 %v2691_v9  ;;  %2239 = vmatprep.subr.bf16.mxu1 %v2763_v33  ;;  %v774_v9 = vld [vmem:[%s3647_s1 + $0xe8] sm:$0xff] }
 0x22c   :  { %873 = vmatprep.mubr.f32.mxu0 %v2651_v3  ;;  %944 = vmatprep.mubr.f32.mxu1 %v2651_v3  ;;  %v778_v33 = vld [vmem:[%s3647_s1 + $0x108] sm:$0xff] }
 0x22e   :  { %2209 = vmatpush1.bf16.msra.mxu0 %v2707_v14  ;;  %2241 = vmatpush1.bf16.msra.mxu1 %v2774_v37  ;;  %v3094_v14 = vpack.c.bf16 %v774_v9, %v770_v8  ;;  %v782_v37 = vld [vmem:[%s3647_s1 + $0x128] sm:$0xff]  ;;  %v993_v9 = vld [vmem:[%s3647_s1 + $0x38] sm:$0xff] }
 0x22f   :  { %2211 = vmatprep.subr.bf16.mxu0 %v2716_v17  ;;  %2243 = vmatprep.subr.bf16.mxu1 %v2798_v45  ;;  %v769_v17 = vld [vmem:[%s3647_s1 + $0xc0] sm:$0xff]  ;;  %v3112_v45 = vpack.c.bf16 %v782_v37, %v778_v33  ;;  %v3219_v33 = vpack.c.bf16 %v993_v9, %v989_v12  ;;  %v1041_v12 = vld [vmem:[%s3647_s1 + $0x1b8] sm:$0xff] }
 0x232   :  { %2213 = vmatpush1.bf16.msra.mxu0 %v2741_v26  ;;  %2245 = vmatpush1.bf16.msra.mxu1 %v2807_v48  ;;  %v3102_v26 = vpack.c.bf16 %v773_v25, %v769_v17  ;;  %v777_v48 = vld [vmem:[%s3647_s1 + $0x100] sm:$0xff] }
 0x233   :  { %2247 = vmatprep.subr.bf16.mxu1 %v2819_v52  ;;  %2215 = vmatprep.subr.bf16.mxu0 %v3094_v14  ;;  %v781_v52 = vld [vmem:[%s3647_s1 + $0x120] sm:$0xff] }
 0x234   :  { %v986_v17 = vld [vmem:[%s3647_s1] sm:$0xff] }
 0x235   :  { %v990_v25 = vld [vmem:[%s3647_s1 + $0x20] sm:$0xff] }
 0x236   :  { %2249 = vmatpush1.bf16.msra.mxu1 %v2849_v62  ;;  %2217 = vmatpush1.bf16.msra.mxu0 %v3102_v26  ;;  %v3120_v62 = vpack.c.bf16 %v781_v52, %v777_v48  ;;  %v3221_v37 = vpack.c.bf16 %v990_v25, %v986_v17  ;;  %v988_v48 = vld [vmem:[%s3647_s1 + $0x10] sm:$0xff] }
 0x237   :  { %2251 = vmatprep.subr.bf16.mxu1 %v2855_v0  ;;  %2219 = vmatprep.subr.bf16.mxu0 %v3112_v45  ;;  %v786_v0 = vld [vmem:[%s3647_s1 + $0x148] sm:$0xff]  ;;  %v992_v52 = vld [vmem:[%s3647_s1 + $0x30] sm:$0xff] }
 0x238   :  { %v1036_v25 = vld [vmem:[%s3647_s1 + $0x190] sm:$0xff] }
 0x23a   :  { %2253 = vmatpush1.bf16.msra.mxu1 %v2885_v15  ;;  %v790_v15 = vld [vmem:[%s3647_s1 + $0x168] sm:$0xff]  ;;  %2221 = vmatpush1.bf16.msra.mxu0 %v3120_v62 }
 0x23b   :  { %2255 = vmatprep.subr.bf16.mxu1 %v2891_v18  ;;  %v785_v18 = vld [vmem:[%s3647_s1 + $0x140] sm:$0xff] }
 0x23e   :  { %2257 = vmatpush1.bf16.msra.mxu1 %v2918_v31  ;;  %v3133_v31 = vpack.c.bf16 %v790_v15, %v786_v0  ;;  %v3230_v0 = vpack.c.bf16 %v992_v52, %v988_v48  ;;  %v995_v15 = vld [vmem:[%s3647_s1 + $0x48] sm:$0xff]  ;;  %v1040_v48 = vld [vmem:[%s3647_s1 + $0x1b0] sm:$0xff]  ;;  %v1045_v52 = vld [vmem:[%s3647_s1 + $0x1d8] sm:$0xff] }
 0x23f   :  { %2259 = vmatprep.subr.bf16.mxu1 %v2921_v32  ;;  %v789_v32 = vld [vmem:[%s3647_s1 + $0x160] sm:$0xff] }
 0x240   :  { %2223 = vmatprep.subr.bf16.mxu0 %v3133_v31 }
 0x242   :  { %2261 = vmatpush1.bf16.msra.mxu1 %v2940_v40  ;;  %v794_v40 = vld [vmem:[%s3647_s1 + $0x188] sm:$0xff] }
 0x243   :  { %2263 = vmatprep.subr.bf16.mxu1 %v2943_v41  ;;  %v798_v41 = vld [vmem:[%s3647_s1 + $0x1a8] sm:$0xff] }
 0x244   :  { %v3146_v13 = vpack.c.bf16 %v798_v41, %v794_v40  ;;  %v1001_v41 = vld [vmem:[%s3647_s1 + $0x78] sm:$0xff] }
 0x246   :  { %2265 = vmatpush1.bf16.msra.mxu1 %v2953_v47  ;;  %v3144_v47 = vpack.c.bf16 %v789_v32, %v785_v18  ;;  %v999_v18 = vld [vmem:[%s3647_s1 + $0x68] sm:$0xff]  ;;  %v997_v32 = vld [vmem:[%s3647_s1 + $0x58] sm:$0xff] }
 0x247   :  { %2299 = vmatprep.subr.bf16.mxu1 %v3219_v33  ;;  %v3244_v40 = vpack.c.bf16 %v999_v18, %v995_v15  ;;  %v3255_v20 = vpack.c.bf16 %v1001_v41, %v997_v32  ;;  %v1049_v15 = vld [vmem:[%s3647_s1 + $0x1f8] sm:$0xff]  ;;  %v3388_v18 = vpack.c.bf16 %v1040_v48, %v1036_v25  ;;  %v1044_v41 = vld [vmem:[%s3647_s1 + $0x1d0] sm:$0xff] }
 0x248   :  { %2225 = vmatpush1.bf16.msra.mxu0 %v3144_v47  ;;  %v3391_v32 = vpack.c.bf16 %v1049_v15, %v1045_v52  ;;  %v3402_v19 = vpack.c.bf16 %v1048_v16, %v1044_v41 }
 0x249   :  { %2227 = vmatprep.subr.bf16.mxu0 %v3146_v13 }
 0x24c   :  { %2229 = vmatpush1.bf16.msra.mxu0 %v3162_v23 }
 0x24d   :  { %2231 = vmatprep.subr.bf16.mxu0 %v3165_v28 }
 0x250   :  { %2233 = vmatpush1.bf16.msra.mxu0 %v3174_v35 }
 0x2fc   :  { %v634_v43 = vpop.f32.mrb[4].mxu0  ;;  %v705_v30 = vpop.f32.mrb[4].mxu1 }
 0x2fd   :  { %v710_v42 = vadd.f32 %v1962_v36, %v634_v43  ;;  %v636_v46 = vpop.f32.mrb[5].mxu0  ;;  %v707_v55 = vpop.f32.mrb[5].mxu1  ;;  %v712_v22 = vadd.f32 %v1964_v39, %v705_v30  ;;  %v3266_v36 = vpack.c.bf16 %v1000_v34, %v996_v29  ;;  %v1007_v43 = vld [vmem:[%s3647_s1 + $0xa8] sm:$0xff]  ;;  %v1005_v30 = vld [vmem:[%s3647_s1 + $0x98] sm:$0xff]  ;;  %v1970_v29 = vld [vmem:[%s3648_s0 + $0x60] sm:$0xff] }
 0x2fe   :  { %v711_v58 = vadd.f32 %v1963_v38, %v636_v46  ;;  %v713_v27 = vadd.f32 %v1965_v24, %v707_v55  ;;  %v1003_v38 = vld [vmem:[%s3647_s1 + $0x88] sm:$0xff]  ;;  %v1009_v46 = vld [vmem:[%s3647_s1 + $0xb8] sm:$0xff]  ;;  %v1002_v55 = vld [vmem:[%s3647_s1 + $0x80] sm:$0xff] }
 0x2ff   :  { %v1966_v7 = vmul.f32 -1.442695, %v710_v42  ;;  %v3280_v42 = vpack.c.bf16 %v1007_v43, %v1003_v38  ;;  %v1004_v24 = vld [vmem:[%s3647_s1 + $0x90] sm:$0xff]  ;;  %v1971_v34 = vld [vmem:[%s3648_s0 + $0x68] sm:$0xff] }
 0x300   :  { %v1967_v10 = vmul.f32 -1.442695, %v711_v58  ;;  %v1968_v4 = vmul.f32 -1.442695, %v713_v27  ;;  %v1006_v58 = vld [vmem:[%s3647_s1 + $0xa0] sm:$0xff]  ;;  %v1008_v27 = vld [vmem:[%s3647_s1 + $0xb0] sm:$0xff] }
 0x301   :  { %2555 = vpow2.f32 %v1966_v7  ;;  %v3291_v7 = vpack.c.bf16 %v1009_v46, %v1005_v30  ;;  %v3302_v39 = vpack.c.bf16 %v1008_v27, %v1004_v24 }
 0x302   :  { %2557 = vpow2.f32 %v1967_v10  ;;  %v3293_v10 = vpack.c.bf16 %v1006_v58, %v1002_v55 }
 0x303   :  { %2559 = vpow2.f32 %v1968_v4  ;;  %v1013_v4 = vld [vmem:[%s3647_s1 + $0xd8] sm:$0xff] }
 0x304   :  { %2561 = vtanh.f32 %v712_v22  ;;  %v1017_v22 = vld [vmem:[%s3647_s1 + $0xf8] sm:$0xff] }
 0x30b   :  { %v2556_v44 = vpop.eup %2555 }
 0x30c   :  { %v2558_v49 = vpop.eup %2557  ;;  %v717_v50 = vadd.f32 1.0, %v2556_v44  ;;  %v3314_v44 = vpack.c.bf16 %v1017_v22, %v1013_v4  ;;  %v1973_v4 = vld [vmem:[%s3648_s0 + $0x78] sm:$0xff] }
 0x30d   :  { %v723_v51 = vadd.f32 1.0, %v2558_v49  ;;  %v2560_v53 = vpop.eup %2559  ;;  %v1012_v49 = vld [vmem:[%s3647_s1 + $0xd0] sm:$0xff] }
 0x30e   :  { %2563 = vrcp.f32 %v717_v50  ;;  %v2562_v54 = vpop.eup %2561  ;;  %v730_v60 = vadd.f32 1.0, %v2560_v53  ;;  %v1016_v50 = vld [vmem:[%s3647_s1 + $0xf0] sm:$0xff]  ;;  %v1021_v53 = vld [vmem:[%s3647_s1 + $0x118] sm:$0xff] }
 0x30f   :  { %2565 = vrcp.f32 %v723_v51  ;;  %v3322_v51 = vpack.c.bf16 %v1016_v50, %v1012_v49  ;;  %v1972_v49 = vld [vmem:[%s3648_s0 + $0x70] sm:$0xff] }
 0x310   :  { %2567 = vrcp.f32 %v730_v60 }
 0x318   :  { %v2564_v56 = vpop.eup %2563 }
 0x319   :  { %v2566_v57 = vpop.eup %2565  ;;  %v734_v59 = vmul.f32 %v2564_v56, %v2562_v54  ;;  %v1025_v54 = vld [vmem:[%s3647_s1 + $0x138] sm:$0xff] }
 0x31a   :  { %v733_v61 = vmul.f32 %v2566_v57, %v3060_v5  ;;  %v2568_v1 = vpop.eup %2567  ;;  %v987_v5 = vld [vmem:[%s3647_s1 + $0x8] sm:$0xff]  ;;  %v3334_v56 = vpack.c.bf16 %v1025_v54, %v1021_v53  ;;  %v1020_v57 = vld [vmem:[%s3647_s1 + $0x110] sm:$0xff] }
 0x31b   :  { %v3208_v8 = vpack.c.bf16 %v991_v11, %v987_v5  ;;  %v1032_v5 = vld [vmem:[%s3647_s1 + $0x170] sm:$0xff]  ;;  %v1037_v11 = vld [vmem:[%s3647_s1 + $0x198] sm:$0xff] }
 0x31c   :  { %v3191_v63 = vadd.f32 %v734_v59, %v733_v61  ;;  %v1024_v59 = vld [vmem:[%s3647_s1 + $0x130] sm:$0xff]  ;;  %v1029_v61 = vld [vmem:[%s3647_s1 + $0x158] sm:$0xff]  ;;  %v3371_v17 = vpack.c.bf16 %v1041_v12, %v1037_v11 }
 0x31d   :  { %2267 = vmatprep.subr.bf16.mxu0 %v3208_v8  ;;  %v3342_v60 = vpack.c.bf16 %v1024_v59, %v1020_v57 }
 0x31e   :  { %2569 = vtanh.f32 %v3191_v63 }
 0x328   :  { %v2570_v2 = vpop.eup %2569 }
 0x329   :  { %v737_v6 = vmul.f32 %v2570_v2, %v2568_v1  ;;  %v1033_v1 = vld [vmem:[%s3647_s1 + $0x178] sm:$0xff]  ;;  %v1028_v2 = vld [vmem:[%s3647_s1 + $0x150] sm:$0xff] }
 0x32a   :  { %v3368_v9 = vpack.c.bf16 %v1032_v5, %v1028_v2 }
 0x32b   :  { %1969 = vst [vmem:[%s3649_s2 + $0x10] sm:$0xff] %v737_v6  ;;  %874 = vmatmul.mubr.f32.vlgmr.msra.gmra.mrb[6].mxu0 %v737_v6  ;;  %945 = vmatmul.mubr.f32.vlgmr.msra.gmra.mrb[6].mxu1 %v737_v6  ;;  %v3355_v6 = vpack.c.bf16 %v1033_v1, %v1029_v61 }
 0x32c   :  { %1114 = vmatprep.mubr.f32.mxu0 %v2651_v3  ;;  %1185 = vmatprep.mubr.f32.mxu1 %v2651_v3 }
 0x32d   :  { %2269 = vmatpush1.bf16.msra.mxu0 %v3221_v37  ;;  %2301 = vmatpush1.bf16.msra.mxu1 %v3230_v0 }
 0x32e   :  { %2271 = vmatprep.subr.bf16.mxu0 %v3244_v40  ;;  %2303 = vmatprep.subr.bf16.mxu1 %v3255_v20 }
 0x331   :  { %2273 = vmatpush1.bf16.msra.mxu0 %v3257_v21  ;;  %2305 = vmatpush1.bf16.msra.mxu1 %v3266_v36 }
 0x332   :  { %2275 = vmatprep.subr.bf16.mxu0 %v3280_v42  ;;  %2307 = vmatprep.subr.bf16.mxu1 %v3291_v7 }
 0x335   :  { %2277 = vmatpush1.bf16.msra.mxu0 %v3293_v10  ;;  %2309 = vmatpush1.bf16.msra.mxu1 %v3302_v39 }
 0x336   :  { %2279 = vmatprep.subr.bf16.mxu0 %v3094_v14  ;;  %2311 = vmatprep.subr.bf16.mxu1 %v3314_v44 }
 0x339   :  { %2281 = vmatpush1.bf16.msra.mxu0 %v3102_v26  ;;  %2313 = vmatpush1.bf16.msra.mxu1 %v3322_v51 }
 0x33a   :  { %2283 = vmatprep.subr.bf16.mxu0 %v3112_v45  ;;  %2315 = vmatprep.subr.bf16.mxu1 %v3334_v56 }
 0x33d   :  { %2285 = vmatpush1.bf16.msra.mxu0 %v3120_v62  ;;  %2317 = vmatpush1.bf16.msra.mxu1 %v3342_v60 }
 0x33e   :  { %2287 = vmatprep.subr.bf16.mxu0 %v3133_v31  ;;  %2319 = vmatprep.subr.bf16.mxu1 %v3355_v6 }
 0x341   :  { %2289 = vmatpush1.bf16.msra.mxu0 %v3144_v47  ;;  %2321 = vmatpush1.bf16.msra.mxu1 %v3368_v9 }
 0x342   :  { %2291 = vmatprep.subr.bf16.mxu0 %v3146_v13  ;;  %2323 = vmatprep.subr.bf16.mxu1 %v3371_v17 }
 0x345   :  { %2293 = vmatpush1.bf16.msra.mxu0 %v3162_v23  ;;  %2325 = vmatpush1.bf16.msra.mxu1 %v3388_v18 }
 0x346   :  { %2295 = vmatprep.subr.bf16.mxu0 %v3165_v28  ;;  %2327 = vmatprep.subr.bf16.mxu1 %v3391_v32 }
 0x349   :  { %2297 = vmatpush1.bf16.msra.mxu0 %v3174_v35  ;;  %2329 = vmatpush1.bf16.msra.mxu1 %v3402_v19 }
 0x34a   :  { %2331 = vmatprep.subr.bf16.mxu0 %v3208_v8  ;;  %2363 = vmatprep.subr.bf16.mxu1 %v3219_v33 }
 0x3fe   :  { %v875_v38 = vpop.f32.mrb[6].mxu0  ;;  %v946_v43 = vpop.f32.mrb[6].mxu1 }
 0x3ff   :  { %v951_v30 = vadd.f32 %v1970_v29, %v875_v38  ;;  %v877_v46 = vpop.f32.mrb[7].mxu0  ;;  %v948_v55 = vpop.f32.mrb[7].mxu1  ;;  %v953_v53 = vadd.f32 %v1972_v49, %v946_v43  ;;  %v1979_v29 = vld [vmem:[%s3648_s0 + $0x88] sm:$0xff] }
 0x400   :  { %v952_v58 = vadd.f32 %v1971_v34, %v877_v46  ;;  %v954_v22 = vadd.f32 %v1973_v4, %v948_v55 }
 0x401   :  { %v1974_v24 = vmul.f32 -1.442695, %v951_v30 }
 0x402   :  { %v1975_v27 = vmul.f32 -1.442695, %v952_v58  ;;  %v1976_v50 = vmul.f32 -1.442695, %v954_v22  ;;  %v1980_v22 = vld [vmem:[%s3648_s0 + $0x90] sm:$0xff] }
 0x403   :  { %2571 = vpow2.f32 %v1974_v24 }
 0x404   :  { %2573 = vpow2.f32 %v1975_v27  ;;  %v1981_v27 = vld [vmem:[%s3648_s0 + $0x98] sm:$0xff] }
 0x405   :  { %2575 = vpow2.f32 %v1976_v50 }
 0x406   :  { %2577 = vtanh.f32 %v953_v53 }
 0x40d   :  { %v2572_v54 = vpop.eup %2571 }
 0x40e   :  { %v2574_v57 = vpop.eup %2573  ;;  %v958_v59 = vadd.f32 1.0, %v2572_v54 }
 0x40f   :  { %v964_v61 = vadd.f32 1.0, %v2574_v57  ;;  %v2576_v1 = vpop.eup %2575 }
 0x410   :  { %2579 = vrcp.f32 %v958_v59  ;;  %v2578_v2 = vpop.eup %2577  ;;  %v971_v25 = vadd.f32 1.0, %v2576_v1 }
 0x411   :  { %2581 = vrcp.f32 %v964_v61 }
 0x412   :  { %2583 = vrcp.f32 %v971_v25 }
 0x41a   :  { %v2580_v5 = vpop.eup %2579 }
 0x41b   :  { %v2582_v11 = vpop.eup %2581  ;;  %v975_v12 = vmul.f32 %v2580_v5, %v2578_v2 }
 0x41c   :  { %v974_v48 = vmul.f32 %v2582_v11, %v3191_v63  ;;  %v2584_v15 = vpop.eup %2583  ;;  %v1978_v63 = vld [vmem:[%s3648_s0 + $0x80] sm:$0xff] }
 0x41e   :  { %v3422_v52 = vadd.f32 %v975_v12, %v974_v48 }
 0x420   :  { %2585 = vtanh.f32 %v3422_v52 }
 0x42a   :  { %v2586_v41 = vpop.eup %2585 }
 0x42b   :  { %v978_v16 = vmul.f32 %v2586_v41, %v2584_v15 }
 0x42d   :  { %1977 = vst [vmem:[%s3649_s2 + $0x18] sm:$0xff] %v978_v16  ;;  %1115 = vmatmul.mubr.f32.vlgmr.msra.gmra.mrb[8].mxu0 %v978_v16  ;;  %1186 = vmatmul.mubr.f32.vlgmr.msra.gmra.mrb[8].mxu1 %v978_v16 }
 0x42e   :  { %2333 = vmatpush1.bf16.msra.mxu0 %v3221_v37  ;;  %2365 = vmatpush1.bf16.msra.mxu1 %v3230_v0 }
 0x42f   :  { %2335 = vmatprep.subr.bf16.mxu0 %v3244_v40  ;;  %2367 = vmatprep.subr.bf16.mxu1 %v3255_v20 }
 0x430   :  { %1355 = vmatprep.mubr.f32.mxu0 %v2651_v3  ;;  %1426 = vmatprep.mubr.f32.mxu1 %v2651_v3 }
 0x432   :  { %2337 = vmatpush1.bf16.msra.mxu0 %v3257_v21  ;;  %2369 = vmatpush1.bf16.msra.mxu1 %v3266_v36 }
 0x433   :  { %2339 = vmatprep.subr.bf16.mxu0 %v3280_v42  ;;  %2371 = vmatprep.subr.bf16.mxu1 %v3291_v7 }
 0x436   :  { %2341 = vmatpush1.bf16.msra.mxu0 %v3293_v10  ;;  %2373 = vmatpush1.bf16.msra.mxu1 %v3302_v39 }
 0x437   :  { %2343 = vmatprep.subr.bf16.mxu0 %v3094_v14  ;;  %2375 = vmatprep.subr.bf16.mxu1 %v3314_v44 }
 0x43a   :  { %2345 = vmatpush1.bf16.msra.mxu0 %v3102_v26  ;;  %2377 = vmatpush1.bf16.msra.mxu1 %v3322_v51 }
 0x43b   :  { %2347 = vmatprep.subr.bf16.mxu0 %v3112_v45  ;;  %2379 = vmatprep.subr.bf16.mxu1 %v3334_v56 }
 0x43e   :  { %2349 = vmatpush1.bf16.msra.mxu0 %v3120_v62  ;;  %2381 = vmatpush1.bf16.msra.mxu1 %v3342_v60 }
 0x43f   :  { %2351 = vmatprep.subr.bf16.mxu0 %v3133_v31  ;;  %2383 = vmatprep.subr.bf16.mxu1 %v3355_v6 }
 0x442   :  { %2353 = vmatpush1.bf16.msra.mxu0 %v3144_v47  ;;  %2385 = vmatpush1.bf16.msra.mxu1 %v3368_v9 }
 0x443   :  { %2355 = vmatprep.subr.bf16.mxu0 %v3146_v13  ;;  %2387 = vmatprep.subr.bf16.mxu1 %v3371_v17 }
 0x446   :  { %2357 = vmatpush1.bf16.msra.mxu0 %v3162_v23  ;;  %2389 = vmatpush1.bf16.msra.mxu1 %v3388_v18 }
 0x447   :  { %2359 = vmatprep.subr.bf16.mxu0 %v3165_v28  ;;  %2391 = vmatprep.subr.bf16.mxu1 %v3391_v32 }
 0x44a   :  { %2361 = vmatpush1.bf16.msra.mxu0 %v3174_v35  ;;  %2393 = vmatpush1.bf16.msra.mxu1 %v3402_v19 }
 0x44b   :  { %2395 = vmatprep.subr.bf16.mxu0 %v3208_v8  ;;  %2427 = vmatprep.subr.bf16.mxu1 %v3219_v33 }
 0x500   :  { %v1116_v34 = vpop.f32.mrb[8].mxu0  ;;  %v1187_v38 = vpop.f32.mrb[8].mxu1 }
 0x501   :  { %v1192_v43 = vadd.f32 %v1978_v63, %v1116_v34  ;;  %v1118_v30 = vpop.f32.mrb[9].mxu0  ;;  %v1189_v46 = vpop.f32.mrb[9].mxu1  ;;  %v1194_v50 = vadd.f32 %v1980_v22, %v1187_v38 }
 0x502   :  { %v1193_v55 = vadd.f32 %v1979_v29, %v1118_v30  ;;  %v1195_v4 = vadd.f32 %v1981_v27, %v1189_v46 }
 0x503   :  { %v1982_v58 = vmul.f32 -1.442695, %v1192_v43 }
 0x504   :  { %v1983_v24 = vmul.f32 -1.442695, %v1193_v55  ;;  %v1984_v49 = vmul.f32 -1.442695, %v1195_v4 }
 0x505   :  { %2587 = vpow2.f32 %v1982_v58 }
 0x506   :  { %2589 = vpow2.f32 %v1983_v24 }
 0x507   :  { %2591 = vpow2.f32 %v1984_v49 }
 0x508   :  { %2593 = vtanh.f32 %v1194_v50 }
 0x50f   :  { %v2588_v53 = vpop.eup %2587 }
 0x510   :  { %v2590_v54 = vpop.eup %2589  ;;  %v1199_v57 = vadd.f32 1.0, %v2588_v53 }
 0x511   :  { %v1205_v59 = vadd.f32 1.0, %v2590_v54  ;;  %v2592_v61 = vpop.eup %2591 }
 0x512   :  { %2595 = vrcp.f32 %v1199_v57  ;;  %v2594_v1 = vpop.eup %2593  ;;  %v1212_v12 = vadd.f32 1.0, %v2592_v61  ;;  %v1757_v57 = vld [vmem:[%s3647_s1 + $0x180] sm:$0xff]  ;;  %v1766_v61 = vld [vmem:[%s3647_s1 + $0x1c8] sm:$0xff] }
 0x513   :  { %2597 = vrcp.f32 %v1205_v59  ;;  %v1761_v59 = vld [vmem:[%s3647_s1 + $0x1a0] sm:$0xff] }
 0x514   :  { %2599 = vrcp.f32 %v1212_v12  ;;  %v1769_v12 = vld [vmem:[%s3647_s1 + $0x1e0] sm:$0xff] }
 0x51c   :  { %v2596_v2 = vpop.eup %2595 }
 0x51d   :  { %v2598_v5 = vpop.eup %2597  ;;  %v1216_v11 = vmul.f32 %v2596_v2, %v2594_v1  ;;  %v1770_v1 = vld [vmem:[%s3647_s1 + $0x1e8] sm:$0xff]  ;;  %v2484_v2 = vpack.c.bf16 %v1761_v59, %v1757_v57 }
 0x51e   :  { %v1215_v25 = vmul.f32 %v2598_v5, %v3422_v52  ;;  %v2600_v15 = vpop.eup %2599  ;;  %v1988_v52 = vld [vmem:[%s3648_s0 + $0xb0] sm:$0xff]  ;;  %v2486_v5 = vpack.c.bf16 %v1770_v1, %v1766_v61 }
 0x520   :  { %v3475_v48 = vadd.f32 %v1216_v11, %v1215_v25  ;;  %v1765_v11 = vld [vmem:[%s3647_s1 + $0x1c0] sm:$0xff] }
 0x521   :  { %v2488_v25 = vpack.c.bf16 %v1769_v12, %v1765_v11 }
 0x522   :  { %2601 = vtanh.f32 %v3475_v48 }
 0x52c   :  { %v2602_v41 = vpop.eup %2601 }
 0x52d   :  { %v1219_v16 = vmul.f32 %v2602_v41, %v2600_v15  ;;  %v1995_v15 = vld [vmem:[%s3648_s0 + $0xc8] sm:$0xff] }
 0x52f   :  { %1985 = vst [vmem:[%s3649_s2 + $0x20] sm:$0xff] %v1219_v16  ;;  %1356 = vmatmul.mubr.f32.vlgmr.msra.gmra.mrb[10].mxu0 %v1219_v16  ;;  %1427 = vmatmul.mubr.f32.vlgmr.msra.gmra.mrb[10].mxu1 %v1219_v16 }
 0x530   :  { %2397 = vmatpush1.bf16.msra.mxu0 %v3221_v37  ;;  %2429 = vmatpush1.bf16.msra.mxu1 %v3230_v0 }
 0x531   :  { %2399 = vmatprep.subr.bf16.mxu0 %v3244_v40  ;;  %2431 = vmatprep.subr.bf16.mxu1 %v3255_v20 }
 0x532   :  { %1596 = vmatprep.mubr.f32.mxu0 %v2651_v3  ;;  %1667 = vmatprep.mubr.f32.mxu1 %v2651_v3 }
 0x534   :  { %2401 = vmatpush1.bf16.msra.mxu0 %v3257_v21  ;;  %2433 = vmatpush1.bf16.msra.mxu1 %v3266_v36 }
 0x535   :  { %2403 = vmatprep.subr.bf16.mxu0 %v3280_v42  ;;  %2435 = vmatprep.subr.bf16.mxu1 %v3291_v7 }
 0x538   :  { %2405 = vmatpush1.bf16.msra.mxu0 %v3293_v10  ;;  %2437 = vmatpush1.bf16.msra.mxu1 %v3302_v39 }
 0x539   :  { %2407 = vmatprep.subr.bf16.mxu0 %v3094_v14  ;;  %2439 = vmatprep.subr.bf16.mxu1 %v3314_v44  ;;  %v1986_v14 = vld [vmem:[%s3648_s0 + $0xa0] sm:$0xff] }
 0x53c   :  { %2409 = vmatpush1.bf16.msra.mxu0 %v3102_v26  ;;  %2441 = vmatpush1.bf16.msra.mxu1 %v3322_v51  ;;  %v1987_v26 = vld [vmem:[%s3648_s0 + $0xa8] sm:$0xff] }
 0x53d   :  { %2411 = vmatprep.subr.bf16.mxu0 %v3112_v45  ;;  %2443 = vmatprep.subr.bf16.mxu1 %v3334_v56 }
 0x540   :  { %2413 = vmatpush1.bf16.msra.mxu0 %v3120_v62  ;;  %2445 = vmatpush1.bf16.msra.mxu1 %v3342_v60 }
 0x541   :  { %2415 = vmatprep.subr.bf16.mxu0 %v3133_v31  ;;  %2447 = vmatprep.subr.bf16.mxu1 %v3355_v6 }
 0x544   :  { %2417 = vmatpush1.bf16.msra.mxu0 %v3144_v47  ;;  %2449 = vmatpush1.bf16.msra.mxu1 %v3368_v9 }
 0x545   :  { %2419 = vmatprep.subr.bf16.mxu0 %v3146_v13  ;;  %2451 = vmatprep.subr.bf16.mxu1 %v3371_v17 }
 0x548   :  { %2421 = vmatpush1.bf16.msra.mxu0 %v3162_v23  ;;  %2453 = vmatpush1.bf16.msra.mxu1 %v3388_v18 }
 0x549   :  { %2423 = vmatprep.subr.bf16.mxu0 %v3165_v28  ;;  %2455 = vmatprep.subr.bf16.mxu1 %v3391_v32 }
 0x54c   :  { %2425 = vmatpush1.bf16.msra.mxu0 %v3174_v35  ;;  %2457 = vmatpush1.bf16.msra.mxu1 %v3402_v19 }
 0x54d   :  { %2459 = vmatprep.subr.bf16.mxu0 %v3208_v8  ;;  %2491 = vmatprep.subr.bf16.mxu1 %v3219_v33  ;;  %v1989_v8 = vld [vmem:[%s3648_s0 + $0xb8] sm:$0xff] }
 0x602   :  { %v1357_v45 = vpop.f32.mrb[10].mxu0  ;;  %v1428_v62 = vpop.f32.mrb[10].mxu1 }
 0x603   :  { %v1433_v31 = vadd.f32 %v1986_v14, %v1357_v45  ;;  %v1359_v47 = vpop.f32.mrb[11].mxu0  ;;  %v1430_v13 = vpop.f32.mrb[11].mxu1  ;;  %v1435_v29 = vadd.f32 %v1988_v52, %v1428_v62 }
 0x604   :  { %v1434_v23 = vadd.f32 %v1987_v26, %v1359_v47  ;;  %v1436_v33 = vadd.f32 %v1989_v8, %v1430_v13  ;;  %v1997_v13 = vld [vmem:[%s3648_s0 + $0xd8] sm:$0xff] }
 0x605   :  { %v1990_v28 = vmul.f32 -1.442695, %v1433_v31 }
 0x606   :  { %v1991_v35 = vmul.f32 -1.442695, %v1434_v23  ;;  %v1992_v63 = vmul.f32 -1.442695, %v1436_v33 }
 0x607   :  { %2603 = vpow2.f32 %v1990_v28  ;;  %v1996_v28 = vld [vmem:[%s3648_s0 + $0xd0] sm:$0xff] }
 0x608   :  { %2605 = vpow2.f32 %v1991_v35 }
 0x609   :  { %2607 = vpow2.f32 %v1992_v63 }
 0x60a   :  { %2609 = vtanh.f32 %v1435_v29 }
 0x611   :  { %v2604_v34 = vpop.eup %2603 }
 0x612   :  { %v2606_v38 = vpop.eup %2605  ;;  %v1440_v43 = vadd.f32 1.0, %v2604_v34 }
 0x613   :  { %v1446_v30 = vadd.f32 1.0, %v2606_v38  ;;  %v2608_v46 = vpop.eup %2607 }
 0x614   :  { %2611 = vrcp.f32 %v1440_v43  ;;  %v2610_v55 = vpop.eup %2609  ;;  %v1453_v4 = vadd.f32 1.0, %v2608_v46 }
 0x615   :  { %2613 = vrcp.f32 %v1446_v30 }
 0x616   :  { %2615 = vrcp.f32 %v1453_v4 }
 0x61e   :  { %v2612_v58 = vpop.eup %2611 }
 0x61f   :  { %v2614_v24 = vpop.eup %2613  ;;  %v1457_v27 = vmul.f32 %v2612_v58, %v2610_v55 }
 0x620   :  { %v1456_v22 = vmul.f32 %v2614_v24, %v3475_v48  ;;  %v2616_v50 = vpop.eup %2615  ;;  %v1994_v48 = vld [vmem:[%s3648_s0 + $0xc0] sm:$0xff] }
 0x622   :  { %v3528_v49 = vadd.f32 %v1457_v27, %v1456_v22 }
 0x624   :  { %2617 = vtanh.f32 %v3528_v49 }
 0x62e   :  { %v2618_v53 = vpop.eup %2617 }
 0x62f   :  { %v1460_v54 = vmul.f32 %v2618_v53, %v2616_v50  ;;  %v2002_v50 = vld [vmem:[%s3648_s0 + $0xe0] sm:$0xff] }
 0x631   :  { %1993 = vst [vmem:[%s3649_s2 + $0x28] sm:$0xff] %v1460_v54  ;;  %1597 = vmatmul.mubr.f32.vlgmr.msra.gmra.mrb[12].mxu0 %v1460_v54  ;;  %1668 = vmatmul.mubr.f32.vlgmr.msra.gmra.mrb[12].mxu1 %v1460_v54 }
 0x632   :  { %2461 = vmatpush1.bf16.msra.mxu0 %v3221_v37  ;;  %2493 = vmatpush1.bf16.msra.mxu1 %v3230_v0  ;;  %v1738_v37 = vld [vmem:[%s3647_s1 + $0xe8] sm:$0xff] }
 0x633   :  { %2463 = vmatprep.subr.bf16.mxu0 %v3244_v40  ;;  %2495 = vmatprep.subr.bf16.mxu1 %v3255_v20  ;;  %v1733_v40 = vld [vmem:[%s3647_s1 + $0xc0] sm:$0xff] }
 0x634   :  { %1837 = vmatprep.mubr.f32.mxu0 %v2651_v3  ;;  %1908 = vmatprep.mubr.f32.mxu1 %v2651_v3  ;;  %v1734_v3 = vld [vmem:[%s3647_s1 + $0xc8] sm:$0xff]  ;;  %v1737_v20 = vld [vmem:[%s3647_s1 + $0xe0] sm:$0xff] }
 0x635   :  { %v2470_v0 = vpack.c.bf16 %v1738_v37, %v1734_v3 }
 0x636   :  { %2465 = vmatpush1.bf16.msra.mxu0 %v3257_v21  ;;  %2497 = vmatpush1.bf16.msra.mxu1 %v3266_v36  ;;  %v2472_v21 = vpack.c.bf16 %v1737_v20, %v1733_v40  ;;  %v1742_v36 = vld [vmem:[%s3647_s1 + $0x108] sm:$0xff] }
 0x637   :  { %2467 = vmatprep.subr.bf16.mxu0 %v3280_v42  ;;  %2499 = vmatprep.subr.bf16.mxu1 %v3291_v7  ;;  %v1746_v42 = vld [vmem:[%s3647_s1 + $0x128] sm:$0xff] }
 0x638   :  { %v2474_v7 = vpack.c.bf16 %v1746_v42, %v1742_v36  ;;  %v2005_v36 = vld [vmem:[%s3648_s0 + $0xf8] sm:$0xff] }
 0x63a   :  { %2469 = vmatpush1.bf16.msra.mxu0 %v3293_v10  ;;  %2501 = vmatpush1.bf16.msra.mxu1 %v3302_v39  ;;  %v1741_v10 = vld [vmem:[%s3647_s1 + $0x100] sm:$0xff] }
 0x63b   :  { %2503 = vmatprep.subr.bf16.mxu1 %v3314_v44  ;;  %2471 = vmatprep.subr.bf16.mxu0 %v2470_v0  ;;  %v1745_v39 = vld [vmem:[%s3647_s1 + $0x120] sm:$0xff] }
 0x63c   :  { %v2476_v44 = vpack.c.bf16 %v1745_v39, %v1741_v10 }
 0x63e   :  { %2505 = vmatpush1.bf16.msra.mxu1 %v3322_v51  ;;  %2473 = vmatpush1.bf16.msra.mxu0 %v2472_v21  ;;  %v1750_v51 = vld [vmem:[%s3647_s1 + $0x148] sm:$0xff] }
 0x63f   :  { %2507 = vmatprep.subr.bf16.mxu1 %v3334_v56  ;;  %2475 = vmatprep.subr.bf16.mxu0 %v2474_v7  ;;  %v1754_v56 = vld [vmem:[%s3647_s1 + $0x168] sm:$0xff]  ;;  %v2004_v7 = vld [vmem:[%s3648_s0 + $0xf0] sm:$0xff] }
 0x642   :  { %2509 = vmatpush1.bf16.msra.mxu1 %v3342_v60  ;;  %v1749_v60 = vld [vmem:[%s3647_s1 + $0x140] sm:$0xff]  ;;  %2477 = vmatpush1.bf16.msra.mxu0 %v2476_v44 }
 0x643   :  { %2511 = vmatprep.subr.bf16.mxu1 %v3355_v6  ;;  %v2478_v6 = vpack.c.bf16 %v1754_v56, %v1750_v51 }
 0x645   :  { %2479 = vmatprep.subr.bf16.mxu0 %v2478_v6 }
 0x646   :  { %2513 = vmatpush1.bf16.msra.mxu1 %v3368_v9  ;;  %v1753_v9 = vld [vmem:[%s3647_s1 + $0x160] sm:$0xff] }
 0x647   :  { %2515 = vmatprep.subr.bf16.mxu1 %v3371_v17  ;;  %v1758_v17 = vld [vmem:[%s3647_s1 + $0x188] sm:$0xff] }
 0x64a   :  { %2517 = vmatpush1.bf16.msra.mxu1 %v3388_v18  ;;  %v1762_v18 = vld [vmem:[%s3647_s1 + $0x1a8] sm:$0xff] }
 0x64b   :  { %2519 = vmatprep.subr.bf16.mxu1 %v3391_v32  ;;  %v2480_v32 = vpack.c.bf16 %v1753_v9, %v1749_v60 }
 0x64d   :  { %2481 = vmatpush1.bf16.msra.mxu0 %v2480_v32 }
 0x64e   :  { %2521 = vmatpush1.bf16.msra.mxu1 %v3402_v19  ;;  %v2482_v19 = vpack.c.bf16 %v1762_v18, %v1758_v17 }
 0x650   :  { %2483 = vmatprep.subr.bf16.mxu0 %v2482_v19 }
 0x651   :  { %2485 = vmatpush1.bf16.msra.mxu0 %v2484_v2 }
 0x652   :  { %2487 = vmatprep.subr.bf16.mxu0 %v2486_v5 }
 0x655   :  { %2489 = vmatpush1.bf16.msra.mxu0 %v2488_v25 }
 0x704   :  { %v1598_v41 = vpop.f32.mrb[12].mxu0  ;;  %v1669_v16 = vpop.f32.mrb[12].mxu1 }
 0x705   :  { %v1674_v14 = vadd.f32 %v1994_v48, %v1598_v41  ;;  %v1600_v26 = vpop.f32.mrb[13].mxu0  ;;  %v1671_v45 = vpop.f32.mrb[13].mxu1  ;;  %v1676_v8 = vadd.f32 %v1996_v28, %v1669_v16 }
 0x706   :  { %v1675_v62 = vadd.f32 %v1995_v15, %v1600_v26  ;;  %v1677_v23 = vadd.f32 %v1997_v13, %v1671_v45 }
 0x707   :  { %v1998_v31 = vmul.f32 -1.442695, %v1674_v14 }
 0x708   :  { %v1999_v47 = vmul.f32 -1.442695, %v1675_v62  ;;  %v2000_v35 = vmul.f32 -1.442695, %v1677_v23 }
 0x709   :  { %2619 = vpow2.f32 %v1998_v31 }
 0x70a   :  { %2621 = vpow2.f32 %v1999_v47 }
 0x70b   :  { %2623 = vpow2.f32 %v2000_v35 }
 0x70c   :  { %2625 = vtanh.f32 %v1676_v8 }
 0x713   :  { %v2620_v33 = vpop.eup %2619 }
 0x714   :  { %v2622_v52 = vpop.eup %2621  ;;  %v1681_v63 = vadd.f32 1.0, %v2620_v33 }
 0x715   :  { %v1687_v29 = vadd.f32 1.0, %v2622_v52  ;;  %v2624_v34 = vpop.eup %2623 }
 0x716   :  { %2627 = vrcp.f32 %v1681_v63  ;;  %v2626_v38 = vpop.eup %2625  ;;  %v1694_v55 = vadd.f32 1.0, %v2624_v34 }
 0x717   :  { %2629 = vrcp.f32 %v1687_v29 }
 0x718   :  { %2631 = vrcp.f32 %v1694_v55 }
 0x720   :  { %v2628_v43 = vpop.eup %2627 }
 0x721   :  { %v2630_v30 = vpop.eup %2629  ;;  %v1698_v46 = vmul.f32 %v2628_v43, %v2626_v38 }
 0x722   :  { %v1697_v58 = vmul.f32 %v2630_v30, %v3528_v49  ;;  %v2632_v27 = vpop.eup %2631  ;;  %v2003_v49 = vld [vmem:[%s3648_s0 + $0xe8] sm:$0xff] }
 0x724   :  { %v1699_v24 = vadd.f32 %v1698_v46, %v1697_v58 }
 0x726   :  { %2633 = vtanh.f32 %v1699_v24 }
 0x730   :  { %v2634_v4 = vpop.eup %2633 }
 0x731   :  { %v1701_v22 = vmul.f32 %v2634_v4, %v2632_v27 }
 0x733   :  { %2001 = vst [vmem:[%s3649_s2 + $0x30] sm:$0xff] %v1701_v22  ;;  %1838 = vmatmul.mubr.f32.vlgmr.msra.gmra.mrb[14].mxu0 %v1701_v22  ;;  %1909 = vmatmul.mubr.f32.vlgmr.msra.gmra.mrb[14].mxu1 %v1701_v22 }
 0x806   :  { %v1839_v53 = vpop.f32.mrb[14].mxu0  ;;  %v1910_v54 = vpop.f32.mrb[14].mxu1 }
 0x807   :  { %v1915_v3 = vadd.f32 %v2002_v50, %v1839_v53  ;;  %v1841_v37 = vpop.f32.mrb[15].mxu0  ;;  %v1912_v0 = vpop.f32.mrb[15].mxu1  ;;  %v1917_v39 = vadd.f32 %v2004_v7, %v1910_v54 }
 0x808   :  { %v1916_v40 = vadd.f32 %v2003_v49, %v1841_v37  ;;  %v1918_v42 = vadd.f32 %v2005_v36, %v1912_v0 }
 0x809   :  { %v2006_v20 = vmul.f32 -1.442695, %v1915_v3 }
 0x80a   :  { %v2007_v21 = vmul.f32 -1.442695, %v1916_v40  ;;  %v2008_v10 = vmul.f32 -1.442695, %v1918_v42 }
 0x80b   :  { %2635 = vpow2.f32 %v2006_v20 }
 0x80c   :  { %2637 = vpow2.f32 %v2007_v21 }
 0x80d   :  { %2639 = vpow2.f32 %v2008_v10 }
 0x80e   :  { %2641 = vtanh.f32 %v1917_v39 }
 0x815   :  { %v2636_v44 = vpop.eup %2635 }
 0x816   :  { %v2638_v51 = vpop.eup %2637  ;;  %v1922_v56 = vadd.f32 1.0, %v2636_v44 }
 0x817   :  { %v1928_v60 = vadd.f32 1.0, %v2638_v51  ;;  %v2640_v6 = vpop.eup %2639 }
 0x818   :  { %2643 = vrcp.f32 %v1922_v56  ;;  %v2642_v9 = vpop.eup %2641  ;;  %v1935_v19 = vadd.f32 1.0, %v2640_v6 }
 0x819   :  { %2645 = vrcp.f32 %v1928_v60 }
 0x81a   :  { %2647 = vrcp.f32 %v1935_v19 }
 0x822   :  { %v2644_v17 = vpop.eup %2643 }
 0x823   :  { %v2646_v18 = vpop.eup %2645  ;;  %v1939_v32 = vmul.f32 %v2644_v17, %v2642_v9 }
 0x824   :  { %v1938_v57 = vmul.f32 %v2646_v18, %v1699_v24  ;;  %v2648_v61 = vpop.eup %2647 }
 0x826   :  { %v1940_v59 = vadd.f32 %v1939_v32, %v1938_v57 }
 0x828   :  { %2649 = vtanh.f32 %v1940_v59 }
 0x832   :  { %v2650_v1 = vpop.eup %2649 }
 0x833   :  { %v1942_v2 = vmul.f32 %v2650_v1, %v2648_v61 }
 0x835   :  { %2009 = vst [vmem:[%s3649_s2 + $0x38] sm:$0xff] %v1942_v2 }

</bundles_post_ra>
